<compile_context>
chip_gen: v7x
topology: tpu7x:2x2x1
jax: 0.10.0
libtpu: 0.0.40
codegen_flags: <defaults>
</compile_context>

<pallas_src>
import functools

import jax
import jax.numpy as jnp
from jax.experimental import pallas as pl
from jax.experimental.pallas import tpu as pltpu


# ---------------------------------------------------------------------------
# Fused kernel: one batch tile of
#   x      = emb_table[ids].reshape(TB, D)          (one-hot MXU gather)
#   h      = relu(x @ W1 + b1)
#   scores = w2 . h + b2                            (written lane-dense (1,TB))
# ---------------------------------------------------------------------------
def _fused_kernel(ids_ref, gmat_ref, w1_ref, b1_ref, w2_ref, b2_ref, o_ref,
                  *, num_fields, vocab):
    # ids_ref  : (TB, N)    int32  batch tile of field ids
    # gmat_ref : (N*V, D)   bf16   block-diagonal embedding matrix (resident)
    # w1_ref   : (D, H)     bf16   resident
    # b1_ref   : (1, H)     f32    resident
    # w2_ref   : (1, H)     f32    second layer as a row (resident)
    # b2_ref   : (1, 1)     f32    SMEM scalar
    # o_ref    : (1, TB)    f32    lane-dense packed score row
    tb = ids_ref.shape[0]
    nv = num_fields * vocab

    ids = ids_ref[...]                                                 # (TB, N)
    field_off = jax.lax.broadcasted_iota(jnp.int32, (1, num_fields), 1) * vocab
    ids_off = ids + field_off                                          # (TB, N)
    lane = jax.lax.broadcasted_iota(jnp.int32, (tb, nv), 1)            # (TB, NV)

    # Combined one-hot over all fields (fields occupy disjoint column blocks).
    hit = lane == ids_off[:, 0:1]
    for n in range(1, num_fields):                                     # static, N small
        hit = jnp.logical_or(hit, lane == ids_off[:, n:n + 1])
    onehot = jnp.where(hit, 1.0, 0.0).astype(jnp.bfloat16)             # (TB, NV)

    # Gather: exact row selection of bf16 embedding values on the MXU.
    x = jnp.dot(onehot, gmat_ref[...], preferred_element_type=jnp.float32)
    x = x.astype(jnp.bfloat16)                                         # lossless

    # Layer 1: bf16 MXU, f32 accumulation; f32 VPU epilogue.
    h = jnp.dot(x, w1_ref[...], preferred_element_type=jnp.float32)    # (TB, H)
    h = jnp.maximum(h + b1_ref[...], 0.0)
    # TODO(synk): if TB is pushed to 512+ and spills show up, sub-slice this
    # epilogue with lax.fori_loop(..., unroll=True) over 128-row chunks.

    # Layer 2 (O == 1): produce the score row directly in lane orientation.
    scores = jnp.dot(w2_ref[...], h.T, preferred_element_type=jnp.float32)  # (1, TB)
    o_ref[...] = (scores + b2_ref[0, 0]).astype(o_ref.dtype)


def model_forward(field_ids, *, emb_table, w1, b1, w2, b2, batch_tile=256):
    """The `model` half of the Sequential container (fused Pallas hot path)."""
    B, N = field_ids.shape
    V, E = emb_table.shape
    D, H = w1.shape
    assert D == N * E, "W1 input dim must match flattened embedding dim"
    # Hard contract (keeps padded-tail rows out of the output).
    assert B % batch_tile == 0, "batch must be a multiple of the batch tile"
    assert batch_tile % 128 == 0, "lane-dense packed score row needs TB % 128 == 0"
    grid_b = B // batch_tile

    # Block-diagonal gather matrix: field n's (V, E) block is emb_table.
    # N*V*D*2 bytes (64 KB at demo sizes) -- resident in VMEM.
    zeros = jnp.zeros((V, E), emb_table.dtype)
    gmat = jnp.concatenate(
        [jnp.concatenate([emb_table if m == n else zeros for m in range(N)], axis=1)
         for n in range(N)], axis=0)                                   # (N*V, D)

    w2_row = w2.reshape(1, H).astype(jnp.float32)
    b1_row = b1.reshape(1, H).astype(jnp.float32)
    b2_s = b2.reshape(1, 1).astype(jnp.float32)

    # TODO(synk): if D/H grow so that resident W1 (+ gmat) approaches ~20 MB,
    # add a K-tiling grid axis over D with an f32 accumulator scratch and
    # pl.when init/finalize (v7x has only 64 MiB VMEM).
    out = pl.pallas_call(
        functools.partial(_fused_kernel, num_fields=N, vocab=V),
        out_shape=jax.ShapeDtypeStruct((1, B), jnp.float32),
        grid=(grid_b,),
        in_specs=[
            pl.BlockSpec((batch_tile, N), lambda i: (i, 0)),        # ids: batch tiled
            pl.BlockSpec((N * V, D), lambda i: (0, 0)),             # gather mat: resident
            pl.BlockSpec((D, H), lambda i: (0, 0)),                 # W1: resident
            pl.BlockSpec((1, H), lambda i: (0, 0)),                 # b1: resident
            pl.BlockSpec((1, H), lambda i: (0, 0)),                 # w2 row: resident
            pl.BlockSpec(memory_space=pltpu.MemorySpace.SMEM),      # b2 scalar
        ],
        out_specs=pl.BlockSpec((1, batch_tile), lambda i: (0, i)),  # packed score row
        compiler_params=pltpu.CompilerParams(
            dimension_semantics=("parallel",),     # shard batch across TCs (v7x)
            vmem_limit_bytes=32 * 1024 * 1024,
        ),
    )(field_ids, gmat, w1, b1_row, w2_row, b2_s)
    return out.reshape(B, 1)                        # free row-major reshape


def make_inputs_forward():
    """The `inputs` (BaseInput) half: dict of raw tensors -> model feature dict.

    The embedding lookup itself is fused into the model kernel (one-hot MXU
    gather), so the feature handed to the model is the field-id tensor; this
    keeps the Sequential composition `model(**inputs(raw))` intact while
    removing the (B, N, E) HBM round trip.
    """
    def inputs_forward(raw_inputs):
        return {"field_ids": raw_inputs["field_ids"]}
    return inputs_forward


class SequentialPallas:
    """Mirror of torecsys.models.Sequential: inputs module then model."""

    def __init__(self, inputs_fn, model_fn):
        self._inputs = inputs_fn
        self._model = model_fn

    def __call__(self, inputs):
        feats = self._inputs(inputs)        # inputs = self._inputs(inputs)
        return self._model(**feats)         # outputs = self._model(**inputs)


if __name__ == "__main__":
    # Small, vreg/MXU-friendly deterministic shapes.
    B, N, E = 512, 8, 16       # batch, num fields, embedding dim -> D = 128
    V = 32                     # vocab size of the (shared) embedding table
    D = N * E                  # flattened feature dim = 128
    H = 128                    # hidden units
    TB = 256                   # batch tile -> 2 grid steps (both v7x TCs active)

    key = jax.random.PRNGKey(0)
    k_emb, k_w1, k_b1, k_w2, k_b2, k_ids = jax.random.split(key, 6)

    emb_table = (jax.random.normal(k_emb, (V, E), dtype=jnp.float32) * 0.1
                 ).astype(jnp.bfloat16)
    w1 = (jax.random.normal(k_w1, (D, H), dtype=jnp.float32) * 0.1
          ).astype(jnp.bfloat16)
    b1 = jax.random.normal(k_b1, (1, H), dtype=jnp.float32) * 0.01
    w2 = jax.random.normal(k_w2, (H, 1), dtype=jnp.float32) * 0.1
    b2 = jax.random.normal(k_b2, (1, 1), dtype=jnp.float32) * 0.01

    field_ids = jax.random.randint(k_ids, (B, N), 0, V, dtype=jnp.int32)
    raw_inputs = {"field_ids": field_ids}

    seq = SequentialPallas(
        inputs_fn=make_inputs_forward(),
        model_fn=functools.partial(model_forward, emb_table=emb_table,
                                   w1=w1, b1=b1, w2=w2, b2=b2, batch_tile=TB),
    )

    out = seq(raw_inputs)
    out = jax.block_until_ready(out)

    # Pure-JAX reference of the same forward (bf16 weights, f32 math).
    x_ref = jnp.take(emb_table, field_ids, axis=0).reshape(B, D).astype(jnp.float32)
    h_ref = jnp.maximum(x_ref @ w1.astype(jnp.float32) + b1, 0.0)
    ref = h_ref @ w2 + b2

    assert out.shape == (B, 1)
    assert jnp.allclose(out, ref, atol=1e-4, rtol=1e-3), (
        float(jnp.max(jnp.abs(out - ref))))

    print("KERNEL_OK")
</pallas_src>

<mosaic_0001>
module attributes {stable_mosaic.version = 11 : i64} {
  func.func @_fused_kernel(%arg0: i32, %arg1: memref<256x8xi32, #tpu.memory_space<vmem>>, %arg2: memref<256x128xbf16, #tpu.memory_space<vmem>>, %arg3: memref<128x128xbf16, #tpu.memory_space<vmem>>, %arg4: memref<1x128xf32, #tpu.memory_space<vmem>>, %arg5: memref<1x128xf32, #tpu.memory_space<vmem>>, %arg6: memref<1x1xf32, #tpu.memory_space<smem>>, %arg7: memref<1x256xf32, #tpu.memory_space<vmem>>) attributes {dimension_semantics = [#tpu.dimension_semantics<parallel>], iteration_bounds = array<i64: 2>, scalar_prefetch = 0 : i64, scratch_operands = 0 : i64, tpu.core_type = #tpu.core_type<tc>, window_params = [{transform_indices = @transform_0, window_bounds = array<i64: 256, 8>}, {pipeline_mode = #tpu.pipeline_mode<synchronous>, transform_indices = @transform_1, window_bounds = array<i64: 256, 128>}, {pipeline_mode = #tpu.pipeline_mode<synchronous>, transform_indices = @transform_2, window_bounds = array<i64: 128, 128>}, {pipeline_mode = #tpu.pipeline_mode<synchronous>, transform_indices = @transform_3, window_bounds = array<i64: 1, 128>}, {pipeline_mode = #tpu.pipeline_mode<synchronous>, transform_indices = @transform_4, window_bounds = array<i64: 1, 128>}, {transform_indices = @transform_5, window_bounds = array<i64: 1, 1>}, {transform_indices = @transform_6, window_bounds = array<i64: 1, 256>}]} {
    %c0 = arith.constant 0 : index
    %c0_0 = arith.constant 0 : index
    %0 = vector.load %arg1[%c0, %c0_0] : memref<256x8xi32, #tpu.memory_space<vmem>>, vector<256x8xi32>
    %1 = tpu.iota {dimensions = array<i32: 1>} : vector<1x8xi32>
    %c32_i32 = arith.constant 32 : i32
    %2 = vector.broadcast %c32_i32 : i32 to vector<1x8xi32>
    %3 = arith.muli %1, %2 : vector<1x8xi32>
    %4 = vector.broadcast %3 : vector<1x8xi32> to vector<256x8xi32>
    %5 = arith.addi %0, %4 : vector<256x8xi32>
    %6 = tpu.iota {dimensions = array<i32: 1>} : vector<256x256xi32>
    %7 = vector.extract_strided_slice %5 {offsets = [0, 0], sizes = [256, 1], strides = [1, 1]} : vector<256x8xi32> to vector<256x1xi32>
    %8 = vector.broadcast %7 : vector<256x1xi32> to vector<256x256xi32>
    %9 = arith.cmpi eq, %6, %8 : vector<256x256xi32>
    %10 = vector.extract_strided_slice %5 {offsets = [0, 1], sizes = [256, 1], strides = [1, 1]} : vector<256x8xi32> to vector<256x1xi32>
    %11 = vector.broadcast %10 : vector<256x1xi32> to vector<256x256xi32>
    %12 = arith.cmpi eq, %6, %11 : vector<256x256xi32>
    %13 = arith.ori %9, %12 : vector<256x256xi1>
    %14 = vector.extract_strided_slice %5 {offsets = [0, 2], sizes = [256, 1], strides = [1, 1]} : vector<256x8xi32> to vector<256x1xi32>
    %15 = vector.broadcast %14 : vector<256x1xi32> to vector<256x256xi32>
    %16 = arith.cmpi eq, %6, %15 : vector<256x256xi32>
    %17 = arith.ori %13, %16 : vector<256x256xi1>
    %18 = vector.extract_strided_slice %5 {offsets = [0, 3], sizes = [256, 1], strides = [1, 1]} : vector<256x8xi32> to vector<256x1xi32>
    %19 = vector.broadcast %18 : vector<256x1xi32> to vector<256x256xi32>
    %20 = arith.cmpi eq, %6, %19 : vector<256x256xi32>
    %21 = arith.ori %17, %20 : vector<256x256xi1>
    %22 = vector.extract_strided_slice %5 {offsets = [0, 4], sizes = [256, 1], strides = [1, 1]} : vector<256x8xi32> to vector<256x1xi32>
    %23 = vector.broadcast %22 : vector<256x1xi32> to vector<256x256xi32>
    %24 = arith.cmpi eq, %6, %23 : vector<256x256xi32>
    %25 = arith.ori %21, %24 : vector<256x256xi1>
    %26 = vector.extract_strided_slice %5 {offsets = [0, 5], sizes = [256, 1], strides = [1, 1]} : vector<256x8xi32> to vector<256x1xi32>
    %27 = vector.broadcast %26 : vector<256x1xi32> to vector<256x256xi32>
    %28 = arith.cmpi eq, %6, %27 : vector<256x256xi32>
    %29 = arith.ori %25, %28 : vector<256x256xi1>
    %30 = vector.extract_strided_slice %5 {offsets = [0, 6], sizes = [256, 1], strides = [1, 1]} : vector<256x8xi32> to vector<256x1xi32>
    %31 = vector.broadcast %30 : vector<256x1xi32> to vector<256x256xi32>
    %32 = arith.cmpi eq, %6, %31 : vector<256x256xi32>
    %33 = arith.ori %29, %32 : vector<256x256xi1>
    %34 = vector.extract_strided_slice %5 {offsets = [0, 7], sizes = [256, 1], strides = [1, 1]} : vector<256x8xi32> to vector<256x1xi32>
    %35 = vector.broadcast %34 : vector<256x1xi32> to vector<256x256xi32>
    %36 = arith.cmpi eq, %6, %35 : vector<256x256xi32>
    %37 = arith.ori %33, %36 : vector<256x256xi1>
    %cst = arith.constant 1.000000e+00 : f32
    %cst_1 = arith.constant 0.000000e+00 : f32
    %38 = vector.broadcast %cst : f32 to vector<256x256xf32>
    %39 = vector.broadcast %cst_1 : f32 to vector<256x256xf32>
    %40 = arith.select %37, %38, %39 : vector<256x256xi1>, vector<256x256xf32>
    %41 = arith.truncf %40 : vector<256x256xf32> to vector<256x256xbf16>
    %c0_2 = arith.constant 0 : index
    %c0_3 = arith.constant 0 : index
    %42 = vector.load %arg2[%c0_2, %c0_3] : memref<256x128xbf16, #tpu.memory_space<vmem>>, vector<256x128xbf16>
    %cst_4 = arith.constant dense<0.000000e+00> : vector<256x128xf32>
    %43 = tpu.matmul %41, %42, %cst_4 {dimension_numbers = #tpu.dot_dimension_numbers<[1], [0], [0], [1], [0, 0, 1, 1], [], []>} : vector<256x256xbf16>, vector<256x128xbf16>, vector<256x128xf32> -> vector<256x128xf32>
    %44 = arith.truncf %43 : vector<256x128xf32> to vector<256x128xbf16>
    %c0_5 = arith.constant 0 : index
    %c0_6 = arith.constant 0 : index
    %45 = vector.load %arg3[%c0_5, %c0_6] : memref<128x128xbf16, #tpu.memory_space<vmem>>, vector<128x128xbf16>
    %cst_7 = arith.constant dense<0.000000e+00> : vector<256x128xf32>
    %46 = tpu.matmul %44, %45, %cst_7 {dimension_numbers = #tpu.dot_dimension_numbers<[1], [0], [0], [1], [0, 0, 1, 1], [], []>} : vector<256x128xbf16>, vector<128x128xbf16>, vector<256x128xf32> -> vector<256x128xf32>
    %c0_8 = arith.constant 0 : index
    %c0_9 = arith.constant 0 : index
    %47 = vector.load %arg4[%c0_8, %c0_9] : memref<1x128xf32, #tpu.memory_space<vmem>>, vector<1x128xf32>
    %48 = vector.broadcast %47 : vector<1x128xf32> to vector<256x128xf32>
    %49 = arith.addf %46, %48 : vector<256x128xf32>
    %cst_10 = arith.constant 0.000000e+00 : f32
    %50 = vector.broadcast %cst_10 : f32 to vector<256x128xf32>
    %51 = arith.maximumf %49, %50 : vector<256x128xf32>
    %c0_11 = arith.constant 0 : index
    %c0_12 = arith.constant 0 : index
    %52 = vector.load %arg5[%c0_11, %c0_12] : memref<1x128xf32, #tpu.memory_space<vmem>>, vector<1x128xf32>
    %53 = tpu.transpose %51, [1, 0] : vector<256x128xf32> -> vector<128x256xf32>
    %cst_13 = arith.constant dense<0.000000e+00> : vector<1x256xf32>
    %54 = tpu.matmul %52, %53, %cst_13 {dimension_numbers = #tpu.dot_dimension_numbers<[1], [0], [0], [1], [0, 0, 1, 1], [], []>} : vector<1x128xf32>, vector<128x256xf32>, vector<1x256xf32> -> vector<1x256xf32>
    %c0_14 = arith.constant 0 : index
    %c0_15 = arith.constant 0 : index
    %55 = memref.load %arg6[%c0_14, %c0_15] : memref<1x1xf32, #tpu.memory_space<smem>>
    %56 = vector.broadcast %55 : f32 to vector<1x256xf32>
    %57 = arith.addf %54, %56 : vector<1x256xf32>
    %c0_16 = arith.constant 0 : index
    %c0_17 = arith.constant 0 : index
    %58 = vector.load %arg7[%c0_16, %c0_17] : memref<1x256xf32, #tpu.memory_space<vmem>>, vector<1x256xf32>
    tpu.vector_store %arg7[%c0_16, %c0_17], %57 {strides = array<i32>} : memref<1x256xf32, #tpu.memory_space<vmem>>, vector<1x256xf32>,
    return
  }
  func.func @transform_0(%arg0: i32) -> (i32, i32) {
    %c0_i32 = arith.constant 0 : i32
    %c0_i32_0 = arith.constant 0 : i32
    return %arg0, %c0_i32 : i32, i32
  }
  func.func @transform_1(%arg0: i32) -> (i32, i32) {
    %c0_i32 = arith.constant 0 : i32
    %c0_i32_0 = arith.constant 0 : i32
    %c0_i32_1 = arith.constant 0 : i32
    return %c0_i32, %c0_i32_0 : i32, i32
  }
  func.func @transform_2(%arg0: i32) -> (i32, i32) {
    %c0_i32 = arith.constant 0 : i32
    %c0_i32_0 = arith.constant 0 : i32
    %c0_i32_1 = arith.constant 0 : i32
    return %c0_i32, %c0_i32_0 : i32, i32
  }
  func.func @transform_3(%arg0: i32) -> (i32, i32) {
    %c0_i32 = arith.constant 0 : i32
    %c0_i32_0 = arith.constant 0 : i32
    %c0_i32_1 = arith.constant 0 : i32
    return %c0_i32, %c0_i32_0 : i32, i32
  }
  func.func @transform_4(%arg0: i32) -> (i32, i32) {
    %c0_i32 = arith.constant 0 : i32
    %c0_i32_0 = arith.constant 0 : i32
    %c0_i32_1 = arith.constant 0 : i32
    return %c0_i32, %c0_i32_0 : i32, i32
  }
  func.func @transform_5(%arg0: i32) -> (i32, i32) {
    %c0_i32 = arith.constant 0 : i32
    %c0_i32_0 = arith.constant 0 : i32
    %c0_i32_1 = arith.constant 0 : i32
    return %c0_i32, %c0_i32_0 : i32, i32
  }
  func.func @transform_6(%arg0: i32) -> (i32, i32) {
    %c0_i32 = arith.constant 0 : i32
    %c0_i32_0 = arith.constant 0 : i32
    return %c0_i32, %arg0 : i32, i32
  }
}

</mosaic_0001>

<bundles_post_ra>
// kernel: tpu_custom_call.1
= control target key start
LH: loop header
LB: loop body
LE: loop exit
PB: predicated region body
PF: predicated region fallthrough
CT: control target
= control target key end

     0   :  { %s6714_s0 = inlined_call_operand.vmem [shape: s32[512,8], index: 0, kind: input, shape index: {}]   ;;  %s6715_s1 = inlined_call_operand.vmem [shape: bf16[256,128], index: 1, kind: input, shape index: {}]   ;;  %s6716_s2 = inlined_call_operand.vmem [shape: bf16[128,128], index: 2, kind: input, shape index: {}]   ;;  %s6717_s3 = inlined_call_operand.vmem [shape: f32[1,128], index: 3, kind: input, shape index: {}]   ;;  %s6718_s4 = inlined_call_operand.vmem [shape: f32[1,128], index: 4, kind: input, shape index: {}]   ;;  %s6719_s5 = inlined_call_operand.<no memory space> [shape: f32[1,1], index: 5, kind: input, shape index: {}]   ;;  %s6720_s6 = inlined_call_operand.hbm [shape: f32[1,512], index: 6, kind: output, shape index: {}]  }
   0x1   :  { %11 = sst [smem:[#allocation2]] %s6719_s5 }
   0x2   :  { %12 = vsyncpa [#allocation4], 0 }
   0x3   :  { %14 = vsyncpa [#allocation4 + $0x1], 0  ;;  %s3486_s23 = smov 0   ;;  %s3488_s24 = smov 0  }
   0x4   :  { %s3490_s25 = smov 0   ;;  %s3492_s26 = smov 0  }
   0x5 LB: > { %s2886_s5 = sadd.s32 4294967295, %s3435_s26   ;;  %s2887_s27 = sadd.s32 4294967294, %s3435_s26   ;;  %s3435_s26 = sphi %s3492_s26, %s7463_s26   ;;  %s3431_s25 = sphi %s3490_s25, %s7462_s25   ;;  %s3427_s24 = sphi %s3488_s24, %s7461_s24   ;;  %s3423_s23 = sphi %s3486_s23, %s7460_s23  }
   0x6   : > { %s3509_s28 = sadd.s32 1, %s3435_s26   ;;  %s158_s29 = sadd.s32 1, %s3431_s25 }
   0x7   : > { %s155_s30 = ssub.s32 %s3435_s26, %s3509_s28  ;;  %p168_p0 = scmp.ne.s32.totalorder %s3431_s25, %s3427_s24 }
   0x8   : > { %p156_p1 = scmp.eq.s32.totalorder %s155_s30, 0  ;;  %p169_p2 = scmp.eq.s32.totalorder %s2886_s5, 1 }
   0x9   : > { %p174_p3 = scmp.ne.s32.totalorder %s3427_s24, %s3423_s23  ;;  %p175_p4 = scmp.eq.s32.totalorder %s2887_s27, 1 }
   0xa   : > { %s3519_s7 = scalar_select %p156_p1, %s3431_s25, %s158_s29  }
   0xb   : > { %p3521_p5 = por %p169_p2, %p168_p0  ;;  %p3525_p6 = por %p175_p4, %p174_p3 }
   0xc   : > { %p2890_p7 = scmp.ge.s32.totalorder %s3435_s26, 1  ;;  %p217_p8 = scmp.lt.s32.totalorder %s3435_s26, 3 }
   0xe   : > { %p218_p9 = pnand %p2890_p7, %p217_p8 }
  0x10   : > { %221 = sbr.rel (%p218_p9) target bundleno = 1648 (0x670), region = 44 }
  0x17   : > { %s3531_s10 = sshll.u32 %s2886_s5, 5  ;;  %v6721_v0 = vlaneseq  ;;  %v3437_v1 = vmov 0   ;;  %s2717_s20 = sld [smem:[#allocation2]] }
  0x18   : > { %3225 = vset.pattern.permute.xlu1 %v3437_v1  ;;  %3224 = vset.pattern.permute.xlu0 %v3437_v1  ;;  %p248_p10 = scmp.lt.s32.totalorder %s3531_s10, 63  ;;  %s244_s21 = sand.u32 1, %s3427_s24  }
  0x19   : > { %v3535_v2 = vand.u32 127, %v6721_v0  ;;  %s2891_s22 = sshll.u32 %s244_s21, 1  ;;  %s3447_s14 = smov [#allocation3]  }
  0x1a   : > { %s249_s11 = scalar_select %p248_p10, %s3531_s10, 63 }
  0x1b   : > { %v3539_v3 = vmul.u32 32, %v3535_v2  ;;  %s246_s5 = scalar_lea.vmem [#allocation3], %s2891_s22 }
  0x1c   : > { %s2893_s12 = sshll.u32 %s249_s11, 3  ;;  %s2828_s27 = sshll.u32 %s246_s5, 4  ;;  %s6674_s27 = int_to_ptr.vmem [resolvable:$true] %s2828_s27 }
  0x1d   : > { %s3544_s15 = scalar_lea.vmem %s6714_s0, %s2893_s12  ;;  %s6672_s11 = scalar_lea.hbm %s6720_s6, %s3531_s10 }
  0x1e   : > { %v257_v4 = vld [vmem:[%s3544_s15 + $0x10] sm:$0xff]  ;;  %v255_v5 = vld [vmem:[%s3544_s15] sm:$0xff]  ;;  %v258_v6 = vld [vmem:[%s3544_s15 + $0x18] sm:$0xff]  ;;  %s2814_s12 = scalar_lea.sflag [#allocation4], %s244_s21  ;;  %s3373_s13 = scalar_lea.vmem %s6674_s27, 32 }
  0x1f   : > { %v3550_v7 = vadd.s32 %v3539_v3, %v257_v4  ;;  %v3553_v8 = vadd.s32 %v3539_v3, %v255_v5  ;;  %v256_v9 = vld [vmem:[%s3544_s15 + $0x8] sm:$0xff]  ;;  %v3559_v10 = vadd.s32 %v3539_v3, %v258_v6  ;;  %v259_v13 = vld [vmem:[%s3544_s15 + $0x20] sm:$0xff]  ;;  %v262_v16 = vld [vmem:[%s3544_s15 + $0x38] sm:$0xff]  ;;  %p3374_p11 = scmp.ne.s32.totalorder %s6674_s27, %s3373_s13 }
  0x20   : > { %v3562_v11 = vadd.s32 %v3539_v3, %v256_v9  ;;  %v260_v12 = vld [vmem:[%s3544_s15 + $0x28] sm:$0xff]  ;;  %v3572_v15 = vadd.s32 %v3539_v3, %v259_v13  ;;  %v261_v17 = vld [vmem:[%s3544_s15 + $0x30] sm:$0xff]  ;;  %v263_v19 = vld [vmem:[%s3544_s15 + $0x40] sm:$0xff]  ;;  %v3581_v20 = vadd.s32 %v3539_v3, %v262_v16  ;;  %v6733_v9 = vmov 1  }
  0x21   : > { %330 = vperm.xlu1 %3225, %v3550_v7   ;;  %324 = vperm.xlu0 %3224, %v3553_v8   ;;  %v3569_v14 = vadd.s32 %v3539_v3, %v260_v12  ;;  %v264_v18 = vld [vmem:[%s3544_s15 + $0x48] sm:$0xff]  ;;  %v3584_v21 = vadd.s32 %v3539_v3, %v261_v17  ;;  %v266_v22 = vld [vmem:[%s3544_s15 + $0x58] sm:$0xff]  ;;  %v265_v23 = vld [vmem:[%s3544_s15 + $0x50] sm:$0xff]  ;;  %v3594_v25 = vadd.s32 %v3539_v3, %v263_v19  ;;  %v6739_v12 = vmov 7   ;;  %p3375_p12 = pnand %p3374_p11, %p3521_p5 }
  0x22   : > { %v3591_v24 = vadd.s32 %v3539_v3, %v264_v18  ;;  %v268_v26 = vld [vmem:[%s3544_s15 + $0x68] sm:$0xff]  ;;  %v267_v27 = vld [vmem:[%s3544_s15 + $0x60] sm:$0xff]  ;;  %v3601_v28 = vadd.s32 %v3539_v3, %v266_v22  ;;  %v3604_v29 = vadd.s32 %v3539_v3, %v265_v23  ;;  %v270_v32 = vld [vmem:[%s3544_s15 + $0x78] sm:$0xff]  ;;  %v6725_v13 = vmov 3  }
  0x23   : > { %v3609_v30 = vadd.s32 %v3539_v3, %v268_v26  ;;  %v3612_v31 = vadd.s32 %v3539_v3, %v267_v27  ;;  %v269_v33 = vld [vmem:[%s3544_s15 + $0x70] sm:$0xff]  ;;  %v3619_v34 = vadd.s32 %v3539_v3, %v270_v32  ;;  %v272_v36 = vld [vmem:[%s3544_s15 + $0x88] sm:$0xff]  ;;  %v271_v37 = vld [vmem:[%s3544_s15 + $0x80] sm:$0xff]  ;;  %v6723_v16 = vmov 4   ;;  %p3376_p13 = pneg %p3375_p12 }
  0x24   : > { %v3622_v35 = vadd.s32 %v3539_v3, %v269_v33  ;;  %v3629_v38 = vadd.s32 %v3539_v3, %v272_v36  ;;  %v3632_v39 = vadd.s32 %v3539_v3, %v271_v37  ;;  %v274_v40 = vld [vmem:[%s3544_s15 + $0x98] sm:$0xff]  ;;  %v273_v41 = vld [vmem:[%s3544_s15 + $0x90] sm:$0xff]  ;;  %v276_v44 = vld [vmem:[%s3544_s15 + $0xa8] sm:$0xff]  ;;  %v6727_v17 = vmov 5  }
  0x25   : > { %333 = vperm.xlu1 %3225, %v3559_v10   ;;  %327 = vperm.xlu0 %3224, %v3562_v11   ;;  %v3639_v42 = vadd.s32 %v3539_v3, %v274_v40  ;;  %v3642_v43 = vadd.s32 %v3539_v3, %v273_v41  ;;  %v275_v45 = vld [vmem:[%s3544_s15 + $0xa0] sm:$0xff]  ;;  %v3649_v46 = vadd.s32 %v3539_v3, %v276_v44  ;;  %v278_v48 = vld [vmem:[%s3544_s15 + $0xb8] sm:$0xff]  ;;  %v277_v49 = vld [vmem:[%s3544_s15 + $0xb0] sm:$0xff]  ;;  %v6731_v18 = vmov 6  }
  0x26   : > { %6822 = vst [vmem:[#allocation6_spill] sm:$0xff] %v3629_v38  ;;  %6823 = vst [vmem:[#allocation7_spill] sm:$0xff] %v3632_v39  ;;  %v3652_v47 = vadd.s32 %v3539_v3, %v275_v45  ;;  %v3659_v50 = vadd.s32 %v3539_v3, %v278_v48  ;;  %v3662_v51 = vadd.s32 %v3539_v3, %v277_v49  ;;  %v280_v52 = vld [vmem:[%s3544_s15 + $0xc8] sm:$0xff]  ;;  %v279_v53 = vld [vmem:[%s3544_s15 + $0xc0] sm:$0xff] }
  0x27   : > { %6824 = vst [vmem:[#allocation8_spill] sm:$0xff] %v3639_v42  ;;  %6825 = vst [vmem:[#allocation9_spill] sm:$0xff] %v3642_v43  ;;  %v3669_v54 = vadd.s32 %v3539_v3, %v280_v52  ;;  %v3672_v55 = vadd.s32 %v3539_v3, %v279_v53  ;;  %v282_v56 = vld [vmem:[%s3544_s15 + $0xd8] sm:$0xff]  ;;  %v281_v57 = vld [vmem:[%s3544_s15 + $0xd0] sm:$0xff] }
  0x28   : > { %6826 = vst [vmem:[#allocation10_spill] sm:$0xff] %v3649_v46  ;;  %6827 = vst [vmem:[#allocation11_spill] sm:$0xff] %v3652_v47  ;;  %v3679_v58 = vadd.s32 %v3539_v3, %v282_v56  ;;  %v3682_v59 = vadd.s32 %v3539_v3, %v281_v57  ;;  %v284_v60 = vld [vmem:[%s3544_s15 + $0xe8] sm:$0xff]  ;;  %v283_v61 = vld [vmem:[%s3544_s15 + $0xe0] sm:$0xff] }
  0x29   : > { %339 = vperm.xlu1 %3225, %v3569_v14   ;;  %336 = vperm.xlu0 %3224, %v3572_v15   ;;  %6828 = vst [vmem:[#allocation12_spill] sm:$0xff] %v3659_v50  ;;  %6829 = vst [vmem:[#allocation13_spill] sm:$0xff] %v3662_v51  ;;  %v3689_v62 = vadd.s32 %v3539_v3, %v284_v60  ;;  %v3692_v63 = vadd.s32 %v3539_v3, %v283_v61  ;;  %v286_v1 = vld [vmem:[%s3544_s15 + $0xf8] sm:$0xff]  ;;  %v285_v4 = vld [vmem:[%s3544_s15 + $0xf0] sm:$0xff]  ;;  %s3377_s15 = sshll.u32 %s3447_s14, 4  ;;  %s3378_s15 = int_to_ptr.vmem [resolvable:$false] %s3377_s15 }
  0x2a   : > { %6830 = vst [vmem:[#allocation14_spill] sm:$0xff] %v3669_v54  ;;  %6831 = vst [vmem:[#allocation15_spill] sm:$0xff] %v3679_v58  ;;  %v3699_v5 = vadd.s32 %v3539_v3, %v286_v1  ;;  %v3702_v6 = vadd.s32 %v3539_v3, %v285_v4  ;;  %v6729_v3 = vmov 2   ;;  %s3379_s16 = scalar_lea.vmem %s3378_s15, 64  ;;  %p3380_p0 = scmp.lt.s32.totalorder %s6674_s27, %s3378_s15 }
  0x2b   : > { %6832 = vst [vmem:[#allocation16_spill] sm:$0xff] %v3682_v59  ;;  %6833 = vst [vmem:[#allocation17_spill] sm:$0xff] %v3689_v62  ;;  %p3381_p1 = scmp.lt.s32.totalorder %s3379_s16, %s3373_s13 }
  0x2d   : > { %345 = vperm.xlu1 %3225, %v3581_v20   ;;  %342 = vperm.xlu0 %3224, %v3584_v21   ;;  %p3382_p2 = por %p3381_p1, %p3380_p0 }
  0x2f   : > { %p3383_p3 = pnand %p3382_p2, %p3376_p13 }
  0x31   : > { %351 = vperm.xlu1 %3225, %v3591_v24   ;;  %348 = vperm.xlu0 %3224, %v3594_v25  }
  0x35   : > { %357 = vperm.xlu1 %3225, %v3601_v28   ;;  %354 = vperm.xlu0 %3224, %v3604_v29  }
  0x39   : > { %363 = vperm.xlu1 %3225, %v3609_v30   ;;  %360 = vperm.xlu0 %3224, %v3612_v31  }
  0x3d   : > { %369 = vperm.xlu1 %3225, %v3619_v34   ;;  %366 = vperm.xlu0 %3224, %v3622_v35  }
  0x41   : > { %375 = vperm.xlu1 %3225, %v3629_v38   ;;  %372 = vperm.xlu0 %3224, %v3632_v39  }
  0x45   : > { %381 = vperm.xlu1 %3225, %v3639_v42   ;;  %378 = vperm.xlu0 %3224, %v3642_v43  }
  0x49   : > { %387 = vperm.xlu1 %3225, %v3649_v46   ;;  %384 = vperm.xlu0 %3224, %v3652_v47  }
  0x4d   : > { %393 = vperm.xlu1 %3225, %v3659_v50   ;;  %390 = vperm.xlu0 %3224, %v3662_v51  }
  0x51   : > { %399 = vperm.xlu1 %3225, %v3669_v54   ;;  %396 = vperm.xlu0 %3224, %v3672_v55  }
  0x55   : > { %405 = vperm.xlu1 %3225, %v3679_v58   ;;  %402 = vperm.xlu0 %3224, %v3682_v59  }
  0x59   : > { %411 = vperm.xlu1 %3225, %v3689_v62   ;;  %408 = vperm.xlu0 %3224, %v3692_v63  }
  0x5d   : > { %417 = vperm.xlu1 %3225, %v3699_v5   ;;  %414 = vperm.xlu0 %3224, %v3702_v6  }
  0x61   : > { %3226 = vset.pattern.permute.xlu1 %v6733_v9  ;;  %3232 = vset.pattern.permute.xlu0 %v6739_v12 }
  0x62   : > { %487 = vperm.xlu1 %3226, %v3562_v11   ;;  %1828 = vperm.xlu0 %3232, %v3553_v8  }
  0x66   : > { %490 = vperm.xlu1 %3226, %v3550_v7   ;;  %1834 = vperm.xlu0 %3232, %v3550_v7  }
  0x6a   : > { %496 = vperm.xlu1 %3226, %v3572_v15   ;;  %3239 = vset.pattern.permute.xlu0 %v6733_v9 }
  0x6b   : > { %484 = vperm.xlu0 %3239, %v3553_v8  }
  0x6e   : > { %3227 = vset.pattern.permute.xlu1 %v6729_v3 }
  0x6f   : > { %708 = vperm.xlu1 %3227, %v3553_v8   ;;  %493 = vperm.xlu0 %3239, %v3559_v10  }
  0x73   : > { %3228 = vset.pattern.permute.xlu1 %v6725_v13  ;;  %499 = vperm.xlu0 %3239, %v3569_v14  }
  0x74   : > { %932 = vperm.xlu1 %3228, %v3553_v8  }
  0x77   : > { %505 = vperm.xlu0 %3239, %v3581_v20  }
  0x78   : > { %935 = vperm.xlu1 %3228, %v3562_v11  }
  0x7b   : > { %514 = vperm.xlu0 %3239, %v3604_v29  }
  0x7c   : > { %3229 = vset.pattern.permute.xlu1 %v6723_v16 }
  0x7d   : > { %1159 = vperm.xlu1 %3229, %v3562_v11  }
  0x7f   : > { %523 = vperm.xlu0 %3239, %v3609_v30  }
  0x81   : > { %3230 = vset.pattern.permute.xlu1 %v6727_v17 }
  0x82   : > { %1380 = vperm.xlu1 %3230, %v3553_v8  }
  0x83   : > { %3269 = vset.pattern.permute.xlu0 %v6725_v13 }
  0x84   : > { %950 = vperm.xlu0 %3269, %v3584_v21  }
  0x86   : > { %3231 = vset.pattern.permute.xlu1 %v6731_v18 }
  0x87   : > { %1604 = vperm.xlu1 %3231, %v3553_v8  }
  0x88   : > { %959 = vperm.xlu0 %3269, %v3591_v24  }
  0x8b   : > { %1607 = vperm.xlu1 %3231, %v3562_v11  }
  0x8c   : > { %968 = vperm.xlu0 %3269, %v3612_v31  }
  0x8f   : > { %3233 = vset.pattern.permute.xlu1 %v6739_v12 }
  0x90   : > { %1831 = vperm.xlu1 %3233, %v3562_v11   ;;  %977 = vperm.xlu0 %3269, %v3619_v34  }
  0x94   : > { %3234 = vset.pattern.permute.xlu1 %v6729_v3  ;;  %986 = vperm.xlu0 %3269, %v3642_v43  }
  0x95   : > { %714 = vperm.xlu1 %3234, %v3550_v7  }
  0x98   : > { %995 = vperm.xlu0 %3269, %v3649_v46  }
  0x99   : > { %3235 = vset.pattern.permute.xlu1 %v6725_v13 }
  0x9a   : > { %938 = vperm.xlu1 %3235, %v3550_v7  }
  0x9c   : > { %3300 = vset.pattern.permute.xlu0 %v6723_v16 }
  0x9d   : > { %1156 = vperm.xlu0 %3300, %v3553_v8  }
  0x9e   : > { %941 = vperm.xlu1 %3235, %v3559_v10  }
  0xa0   : > { %v3748_v19 = vpop.permute.xlu1 %330  ;;  %v3750_v22 = vpop.permute.xlu0 %324 }
  0xa1   : > { %1162 = vperm.xlu0 %3300, %v3550_v7   ;;  %vm419_vm1 = vcmp.eq.s32.totalorder %v3535_v2, %v3750_v22  ;;  %vm423_vm3 = vcmp.eq.s32.totalorder %v3535_v2, %v3748_v19 }
  0xa2   : > { %3236 = vset.pattern.permute.xlu1 %v6723_v16 }
  0xa3   : > { %1165 = vperm.xlu1 %3236, %v3559_v10  }
  0xa4   : > { %v3755_v23 = vpop.permute.xlu1 %333  ;;  %v3757_v26 = vpop.permute.xlu0 %327 }
  0xa5   : > { %1168 = vperm.xlu0 %3300, %v3572_v15  }
  0xa7   : > { %3237 = vset.pattern.permute.xlu1 %v6727_v17 }
  0xa8   : > { %v3761_v8 = vpop.permute.xlu1 %339  ;;  %1386 = vperm.xlu1 %3237, %v3550_v7   ;;  %v3764_v27 = vpop.permute.xlu0 %336 }
  0xa9   : > { %1177 = vperm.xlu0 %3300, %v3581_v20  }
  0xac   : > { %v3767_v32 = vpop.permute.xlu1 %345  ;;  %3238 = vset.pattern.permute.xlu1 %v6731_v18  ;;  %v3770_v33 = vpop.permute.xlu0 %342 }
  0xad   : > { %1610 = vperm.xlu1 %3238, %v3550_v7   ;;  %1186 = vperm.xlu0 %3300, %v3604_v29  }
  0xb0   : > { %v3774_v36 = vpop.permute.xlu1 %351  ;;  %v3776_v37 = vpop.permute.xlu0 %348 }
  0xb1   : > { %6834 = vst [vmem:[#allocation18_spill] sm:$0xff] %v3774_v36  ;;  %6835 = vst [vmem:[#allocation19_spill] sm:$0xff] %v3776_v37  ;;  %1613 = vperm.xlu1 %3238, %v3559_v10   ;;  %1195 = vperm.xlu0 %3300, %v3609_v30   ;;  %v6870_v36 = vmov 7  }
  0xb4   : > { %v3780_v40 = vpop.permute.xlu1 %357  ;;  %v3782_v41 = vpop.permute.xlu0 %354 }
  0xb5   : > { %6836 = vst [vmem:[#allocation20_spill] sm:$0xff] %v3780_v40  ;;  %6837 = vst [vmem:[#allocation21_spill] sm:$0xff] %v3782_v41  ;;  %3240 = vset.pattern.permute.xlu1 %v6739_v12  ;;  %1204 = vperm.xlu0 %3300, %v3632_v39   ;;  %v3350_v40 = vld [vmem:[%s6715_s1] sm:$0xff]  }
  0xb6   : > { %1837 = vperm.xlu1 %3240, %v3559_v10  }
  0xb8   : > { %v3787_v7 = vpop.permute.xlu1 %363  ;;  %v3789_v44 = vpop.permute.xlu0 %360 }
  0xb9   : > { %6838 = vst [vmem:[#allocation22_spill] sm:$0xff] %v3787_v7  ;;  %6839 = vst [vmem:[#allocation23_spill] sm:$0xff] %v3789_v44  ;;  %1213 = vperm.xlu0 %3300, %v3639_v42   ;;  %v6868_v7 = vmov 6  }
  0xba   : > { %3241 = vset.pattern.permute.xlu1 %v6729_v3 }
  0xbb   : > { %720 = vperm.xlu1 %3241, %v3572_v15  }
  0xbc   : > { %v3794_v45 = vpop.permute.xlu1 %369  ;;  %v3796_v48 = vpop.permute.xlu0 %366 }
  0xbd   : > { %6840 = vst [vmem:[#allocation24_spill] sm:$0xff] %v3794_v45  ;;  %6841 = vst [vmem:[#allocation25_spill] sm:$0xff] %v3796_v48  ;;  %1222 = vperm.xlu0 %3300, %v3662_v51  }
  0xbf   : > { %3242 = vset.pattern.permute.xlu1 %v6725_v13 }
  0xc0   : > { %v3800_v49 = vpop.permute.xlu1 %375  ;;  %944 = vperm.xlu1 %3242, %v3572_v15   ;;  %v3803_v52 = vpop.permute.xlu0 %372 }
  0xc1   : > { %6842 = vst [vmem:[#allocation26_spill] sm:$0xff] %v3800_v49  ;;  %6843 = vst [vmem:[#allocation27_spill] sm:$0xff] %v3803_v52  ;;  %1231 = vperm.xlu0 %3300, %v3669_v54   ;;  %v6864_v49 = vmov 5  }
  0xc4   : > { %v3806_v53 = vpop.permute.xlu1 %381  ;;  %947 = vperm.xlu1 %3242, %v3569_v14   ;;  %v3809_v56 = vpop.permute.xlu0 %378 }
  0xc5   : > { %6844 = vst [vmem:[#allocation28_spill] sm:$0xff] %v3806_v53  ;;  %6845 = vst [vmem:[#allocation29_spill] sm:$0xff] %v3809_v56  ;;  %3316 = vset.pattern.permute.xlu0 %v6731_v18 }
  0xc6   : > { %1622 = vperm.xlu0 %3316, %v3584_v21  }
  0xc8   : > { %v3813_v57 = vpop.permute.xlu1 %387  ;;  %3243 = vset.pattern.permute.xlu1 %v6723_v16  ;;  %v3816_v60 = vpop.permute.xlu0 %384 }
  0xc9   : > { %6846 = vst [vmem:[#allocation30_spill] sm:$0xff] %v3813_v57  ;;  %6847 = vst [vmem:[#allocation31_spill] sm:$0xff] %v3816_v60  ;;  %1171 = vperm.xlu1 %3243, %v3569_v14   ;;  %v6863_v60 = vmov 4  }
  0xca   : > { %1631 = vperm.xlu0 %3316, %v3591_v24  }
  0xcc   : > { %v3820_v61 = vpop.permute.xlu1 %393  ;;  %v3822_v1 = vpop.permute.xlu0 %390 }
  0xcd   : > { %6848 = vst [vmem:[#allocation32_spill] sm:$0xff] %v3820_v61  ;;  %6849 = vst [vmem:[#allocation33_spill] sm:$0xff] %v3822_v1  ;;  %3244 = vset.pattern.permute.xlu1 %v6727_v17 }
  0xce   : > { %1392 = vperm.xlu1 %3244, %v3572_v15   ;;  %1640 = vperm.xlu0 %3316, %v3612_v31  }
  0xd0   : > { %v3827_v4 = vpop.permute.xlu1 %399  ;;  %v3829_v0 = vpop.permute.xlu0 %396 }
  0xd1   : > { %6850 = vst [vmem:[#allocation34_spill] sm:$0xff] %v3827_v4  ;;  %6851 = vst [vmem:[#allocation35_spill] sm:$0xff] %v3829_v0  ;;  %v6862_v4 = vmov 3  }
  0xd2   : > { %3245 = vset.pattern.permute.xlu1 %v6731_v18  ;;  %1649 = vperm.xlu0 %3316, %v3619_v34  }
  0xd3   : > { %1616 = vperm.xlu1 %3245, %v3572_v15  }
  0xd4   : > { %v3834_v16 = vpop.permute.xlu1 %405  ;;  %v3836_v13 = vpop.permute.xlu0 %402 }
  0xd5   : > { %6852 = vst [vmem:[#allocation36_spill] sm:$0xff] %v3834_v16  ;;  %6853 = vst [vmem:[#allocation37_spill] sm:$0xff] %v3836_v13  ;;  %v6858_v16 = vmov 1  }
  0xd6   : > { %1658 = vperm.xlu0 %3316, %v3642_v43  }
  0xd7   : > { %1619 = vperm.xlu1 %3245, %v3569_v14  }
  0xd8   : > { %v3840_v17 = vpop.permute.xlu1 %411  ;;  %v3842_v3 = vpop.permute.xlu0 %408 }
  0xd9   : > { %6854 = vst [vmem:[#allocation38_spill] sm:$0xff] %v3840_v17  ;;  %6855 = vst [vmem:[#allocation39_spill] sm:$0xff] %v3842_v3 }
  0xda   : > { %1667 = vperm.xlu0 %3316, %v3649_v46   ;;  %v3349_v46 = vld [vmem:[%s6715_s1 + $0x40] sm:$0xff]  }
  0xdb   : > { %3246 = vset.pattern.permute.xlu1 %v6739_v12  ;;  %v6860_v12 = vmov 2   ;;  %2925 = vmatprep.subr.bf16.mxu0 %v3349_v46  ;;  %v3352_v46 = vld [vmem:[%s6715_s1 + $0x8] sm:$0xff]  }
  0xdc   : > { %v3846_v18 = vpop.permute.xlu1 %417  ;;  %1843 = vperm.xlu1 %3246, %v3569_v14   ;;  %v3849_v9 = vpop.permute.xlu0 %414  ;;  %2926 = vmatpush3.bf16.msra.mxu0 %v3350_v40  ;;  %v3354_v40 = vld [vmem:[%s6715_s1 + $0x10] sm:$0xff]  }
  0xdd   : > { %6856 = vst [vmem:[#allocation40_spill] sm:$0xff] %v3846_v18  ;;  %6857 = vst [vmem:[#allocation41_spill] sm:$0xff] %v3849_v9 }
  0xde   : > { %1676 = vperm.xlu0 %3316, %v3672_v55  }
  0xe0   : > { %3247 = vset.pattern.permute.xlu1 %v6858_v16 }
  0xe1   : > { %v3853_v13 = vpop.permute.xlu1 %487  ;;  %502 = vperm.xlu1 %3247, %v3584_v21   ;;  %v3856_v17 = vpop.permute.xlu0 %1828 }
  0xe2   : > { %6859 = vst [vmem:[#allocation42_spill] sm:$0xff] %v3856_v17  ;;  %1685 = vperm.xlu0 %3316, %v3679_v58  }
  0xe5   : > { %v3859_v3 = vpop.permute.xlu1 %490  ;;  %3248 = vset.pattern.permute.xlu1 %v6860_v12  ;;  %v3862_v18 = vpop.permute.xlu0 %1834 }
  0xe6   : > { %6861 = vst [vmem:[#allocation43_spill] sm:$0xff] %v3862_v18  ;;  %726 = vperm.xlu1 %3248, %v3584_v21   ;;  %3326 = vset.pattern.permute.xlu0 %v6860_v12  ;;  %vm583_vm0 = vcmp.eq.s32.totalorder %v3535_v2, %v3859_v3 }
  0xe7   : > { %711 = vperm.xlu0 %3326, %v3562_v11   ;;  %vm4156_vm7 = vmor %vm423_vm3, %vm583_vm0 }
  0xe9   : > { %v3867_v9 = vpop.permute.xlu1 %496 }
  0xea   : > { %729 = vperm.xlu1 %3248, %v3581_v20   ;;  %v3870_v0 = vpop.permute.xlu0 %484 }
  0xeb   : > { %717 = vperm.xlu0 %3326, %v3559_v10   ;;  %vm579_vm2 = vcmp.eq.s32.totalorder %v3535_v2, %v3870_v0 }
  0xec   : > { %vm643_vm8 = vmor %vm419_vm1, %vm579_vm2 }
  0xee   : > { %3249 = vset.pattern.permute.xlu1 %v6862_v4  ;;  %v3874_v1 = vpop.permute.xlu1 %708  ;;  %v3876_v61 = vpop.permute.xlu0 %493 }
  0xef   : > { %953 = vperm.xlu1 %3249, %v3581_v20   ;;  %723 = vperm.xlu0 %3326, %v3569_v14   ;;  %vm803_vm9 = vcmp.eq.s32.totalorder %v3535_v2, %v3874_v1 }
  0xf0   : > { %vm867_vm15 = vmor %vm643_vm8, %vm803_vm9  ;;  %vm421_vm8 = vcmp.eq.s32.totalorder %v3535_v2, %v3757_v26  ;;  %vm581_vm9 = vcmp.eq.s32.totalorder %v3535_v2, %v3853_v13 }
  0xf2   : > { %v3880_v57 = vpop.permute.xlu0 %499 }
  0xf3   : > { %3250 = vset.pattern.permute.xlu1 %v6863_v60  ;;  %v3883_v56 = vpop.permute.xlu1 %932  ;;  %732 = vperm.xlu0 %3326, %v3594_v25  }
  0xf4   : > { %1174 = vperm.xlu1 %3250, %v3584_v21   ;;  %vm1027_vm14 = vcmp.eq.s32.totalorder %v3535_v2, %v3883_v56 }
  0xf5   : > { %vm4186_vm3 = vmor %vm867_vm15, %vm1027_vm14 }
  0xf6   : > { %v3887_v53 = vpop.permute.xlu0 %505 }
  0xf7   : > { %v3889_v52 = vpop.permute.xlu1 %935  ;;  %741 = vperm.xlu0 %3326, %v3601_v28  }
  0xf8   : > { %3251 = vset.pattern.permute.xlu1 %v6864_v49 }
  0xf9   : > { %1398 = vperm.xlu1 %3251, %v3584_v21  }
  0xfa   : > { %v3894_v45 = vpop.permute.xlu0 %514 }
  0xfb   : > { %6865 = vst [vmem:[#allocation44_spill] sm:$0xff] %v3894_v45  ;;  %750 = vperm.xlu0 %3326, %v3622_v35   ;;  %v3351_v45 = vld [vmem:[%s6715_s1 + $0x48] sm:$0xff]  }
  0xfc   : > { %v3897_v48 = vpop.permute.xlu1 %1159  ;;  %2927 = vmatprep.subr.bf16.mxu0 %v3351_v45 }
  0xfd   : > { %6866 = vst [vmem:[#allocation45_spill] sm:$0xff] %v3897_v48  ;;  %1401 = vperm.xlu1 %3251, %v3581_v20   ;;  %2928 = vmatpush3.bf16.msra.mxu0 %v3352_v46 }
  0xfe   : > { %v3903_v44 = vpop.permute.xlu0 %523 }
  0xff   : > { %6867 = vst [vmem:[#allocation46_spill] sm:$0xff] %v3903_v44  ;;  %759 = vperm.xlu0 %3326, %v3629_v38   ;;  %v3353_v44 = vld [vmem:[%s6715_s1 + $0x50] sm:$0xff]  }
 0x100   : > { %2929 = vmatprep.subr.bf16.mxu0 %v3353_v44  ;;  %v3357_v44 = vld [vmem:[%s6715_s1 + $0x60] sm:$0xff]  }
 0x101   : > { %3252 = vset.pattern.permute.xlu1 %v6868_v7  ;;  %v3907_v43 = vpop.permute.xlu1 %1380  ;;  %2930 = vmatpush3.bf16.msra.mxu0 %v3354_v40  ;;  %v3358_v40 = vld [vmem:[%s6715_s1 + $0x20] sm:$0xff]  }
 0x102   : > { %1625 = vperm.xlu1 %3252, %v3581_v20  }
 0x103   : > { %v3916_v41 = vpop.permute.xlu0 %950  ;;  %768 = vperm.xlu0 %3326, %v3652_v47  }
 0x104   : > { %6869 = vst [vmem:[#allocation47_spill] sm:$0xff] %v3916_v41  ;;  %v3355_v41 = vld [vmem:[%s6715_s1 + $0x58] sm:$0xff]  }
 0x105   : > { %2931 = vmatprep.subr.bf16.mxu0 %v3355_v41  ;;  %v3359_v41 = vld [vmem:[%s6715_s1 + $0x68] sm:$0xff]  }
 0x106   : > { %3253 = vset.pattern.permute.xlu1 %v6870_v36  ;;  %v3926_v37 = vpop.permute.xlu1 %1604 }
 0x107   : > { %1846 = vperm.xlu1 %3253, %v3584_v21   ;;  %v3929_v18 = vpop.permute.xlu0 %959  ;;  %777 = vperm.xlu0 %3326, %v3659_v50   ;;  %v3356_v21 = vld [vmem:[%s6715_s1 + $0x18] sm:$0xff]  }
 0x108   : > { %6871 = vst [vmem:[#allocation48_spill] sm:$0xff] %v3929_v18  ;;  %2932 = vmatpush3.bf16.msra.mxu0 %v3356_v21  ;;  %v3360_v21 = vld [vmem:[%s6715_s1 + $0x28] sm:$0xff]  }
 0x109   : > { %2933 = vmatprep.subr.bf16.mxu0 %v3357_v44 }
 0x10a   : > { %v3935_v45 = vpop.permute.xlu1 %1607 }
 0x10b   : > { %6872 = vst [vmem:[#allocation49_spill] sm:$0xff] %v3935_v45  ;;  %3254 = vset.pattern.permute.xlu1 %v6858_v16  ;;  %v3941_v48 = vpop.permute.xlu0 %968  ;;  %786 = vperm.xlu0 %3326, %v3682_v59  }
 0x10c   : > { %6873 = vst [vmem:[#allocation50_spill] sm:$0xff] %v3941_v48  ;;  %508 = vperm.xlu1 %3254, %v3594_v25   ;;  %2934 = vmatpush3.bf16.msra.mxu0 %v3358_v40  ;;  %v3362_v40 = vld [vmem:[%s6715_s1 + $0x30] sm:$0xff]  }
 0x10d   : > { %2935 = vmatprep.subr.bf16.mxu0 %v3359_v41 }
 0x10f   : > { %v3951_v46 = vpop.permute.xlu1 %1831  ;;  %v3953_v18 = vpop.permute.xlu0 %977  ;;  %795 = vperm.xlu0 %3326, %v3689_v62  }
 0x110   : > { %6874 = vst [vmem:[#allocation51_spill] sm:$0xff] %v3951_v46  ;;  %6875 = vst [vmem:[#allocation52_spill] sm:$0xff] %v3953_v18  ;;  %511 = vperm.xlu1 %3254, %v3591_v24   ;;  %2936 = vmatpush3.bf16.msra.mxu0 %v3360_v21  ;;  %v3363_v21 = vld [vmem:[%s6715_s1 + $0x78] sm:$0xff]  }
 0x113   : > { %v3960_v48 = vpop.permute.xlu0 %986  ;;  %3330 = vset.pattern.permute.xlu0 %v6864_v49 }
 0x114   : > { %6876 = vst [vmem:[#allocation53_spill] sm:$0xff] %v3960_v48  ;;  %3255 = vset.pattern.permute.xlu1 %v6860_v12  ;;  %v3967_v18 = vpop.permute.xlu1 %714  ;;  %1383 = vperm.xlu0 %3330, %v3562_v11   ;;  %v3361_v11 = vld [vmem:[%s6715_s1 + $0x70] sm:$0xff]  }
 0x115   : > { %735 = vperm.xlu1 %3255, %v3591_v24   ;;  %2937 = vmatprep.subr.bf16.mxu0 %v3361_v11  ;;  %v3364_v11 = vld [vmem:[%s6715_s1 + $0x38] sm:$0xff]   ;;  %vm807_vm2 = vcmp.eq.s32.totalorder %v3535_v2, %v3967_v18 }
 0x116   : > { %2938 = vmatpush3.bf16.msra.mxu0 %v3362_v40 }
 0x117   : > { %v3974_v44 = vpop.permute.xlu0 %995  ;;  %2939 = vmatprep.subr.bf16.mxu0 %v3363_v21 }
 0x118   : > { %6877 = vst [vmem:[#allocation54_spill] sm:$0xff] %v3974_v44  ;;  %1389 = vperm.xlu0 %3330, %v3559_v10  }
 0x119   : > { %3256 = vset.pattern.permute.xlu1 %v6862_v4  ;;  %v3978_v48 = vpop.permute.xlu1 %938 }
 0x11a   : > { %956 = vperm.xlu1 %3256, %v3594_v25   ;;  %2940 = vmatpush3.bf16.msra.mxu0 %v3364_v11 }
 0x11c   : > { %v3987_v44 = vpop.permute.xlu0 %1156  ;;  %1395 = vperm.xlu0 %3330, %v3569_v14  }
 0x11d   : > { %v3990_v10 = vpop.permute.xlu1 %941 }
 0x11e   : > { %3257 = vset.pattern.permute.xlu1 %v6863_v60 }
 0x11f   : > { %1180 = vperm.xlu1 %3257, %v3594_v25  }
 0x120   : > { %v3994_v41 = vpop.permute.xlu0 %1162  ;;  %1404 = vperm.xlu0 %3330, %v3594_v25  }
 0x122   : > { %v4003_v14 = vpop.permute.xlu1 %1165 }
 0x123   : > { %6878 = vst [vmem:[#allocation55_spill] sm:$0xff] %v4003_v14  ;;  %1183 = vperm.xlu1 %3257, %v3591_v24  }
 0x124   : > { %v4006_v40 = vpop.permute.xlu0 %1168  ;;  %1413 = vperm.xlu0 %3330, %v3601_v28  }
 0x125   : > { %6879 = vst [vmem:[#allocation56_spill] sm:$0xff] %v4006_v40 }
 0x127   : > { %3258 = vset.pattern.permute.xlu1 %v6864_v49  ;;  %v4010_v46 = vpop.permute.xlu1 %1386 }
 0x128   : > { %1407 = vperm.xlu1 %3258, %v3591_v24   ;;  %v4013_v45 = vpop.permute.xlu0 %1177  ;;  %1422 = vperm.xlu0 %3330, %v3622_v35  }
 0x129   : > { %6880 = vst [vmem:[#allocation57_spill] sm:$0xff] %v4013_v45 }
 0x12c   : > { %3259 = vset.pattern.permute.xlu1 %v6868_v7  ;;  %v4017_v14 = vpop.permute.xlu1 %1610  ;;  %v4019_v21 = vpop.permute.xlu0 %1186  ;;  %1431 = vperm.xlu0 %3330, %v3629_v38  }
 0x12d   : > { %6881 = vst [vmem:[#allocation58_spill] sm:$0xff] %v4019_v21  ;;  %1628 = vperm.xlu1 %3259, %v3594_v25  }
 0x130   : > { %v4023_v11 = vpop.permute.xlu1 %1613  ;;  %v4025_v40 = vpop.permute.xlu0 %1195  ;;  %1440 = vperm.xlu0 %3330, %v3652_v47  }
 0x131   : > { %6882 = vst [vmem:[#allocation59_spill] sm:$0xff] %v4025_v40  ;;  %3260 = vset.pattern.permute.xlu1 %v6870_v36 }
 0x132   : > { %1852 = vperm.xlu1 %3260, %v3594_v25  }
 0x134   : > { %v4030_v45 = vpop.permute.xlu0 %1204  ;;  %1449 = vperm.xlu0 %3330, %v3659_v50  }
 0x135   : > { %6883 = vst [vmem:[#allocation60_spill] sm:$0xff] %v4030_v45  ;;  %v4033_v17 = vpop.permute.xlu1 %1837 }
 0x136   : > { %1855 = vperm.xlu1 %3260, %v3591_v24  }
 0x138   : > { %v4036_v21 = vpop.permute.xlu0 %1213  ;;  %1458 = vperm.xlu0 %3330, %v3682_v59  }
 0x139   : > { %6884 = vst [vmem:[#allocation61_spill] sm:$0xff] %v4036_v21 }
 0x13a   : > { %3261 = vset.pattern.permute.xlu1 %v6858_v16  ;;  %v4040_v40 = vpop.permute.xlu1 %720 }
 0x13b   : > { %517 = vperm.xlu1 %3261, %v3601_v28  }
 0x13c   : > { %v4043_v47 = vpop.permute.xlu0 %1222  ;;  %1467 = vperm.xlu0 %3330, %v3689_v62  }
 0x13d   : > { %6885 = vst [vmem:[#allocation62_spill] sm:$0xff] %v4043_v47 }
 0x13f   : > { %3262 = vset.pattern.permute.xlu1 %v6860_v12  ;;  %v4047_v25 = vpop.permute.xlu1 %944 }
 0x140   : > { %738 = vperm.xlu1 %3262, %v3604_v29   ;;  %v4050_v24 = vpop.permute.xlu0 %1231  ;;  %3334 = vset.pattern.permute.xlu0 %v6870_v36 }
 0x141   : > { %6886 = vst [vmem:[#allocation63_spill] sm:$0xff] %v4050_v24  ;;  %1840 = vperm.xlu0 %3334, %v3572_v15  }
 0x143   : > { %v4054_v59 = vpop.permute.xlu1 %947 }
 0x144   : > { %3263 = vset.pattern.permute.xlu1 %v6862_v4 }
 0x145   : > { %962 = vperm.xlu1 %3263, %v3604_v29   ;;  %v4058_v47 = vpop.permute.xlu0 %1622  ;;  %1849 = vperm.xlu0 %3334, %v3581_v20  }
 0x146   : > { %6887 = vst [vmem:[#allocation64_spill] sm:$0xff] %v4058_v47 }
 0x148   : > { %v4061_v62 = vpop.permute.xlu1 %1171 }
 0x149   : > { %965 = vperm.xlu1 %3263, %v3601_v28   ;;  %v4064_v21 = vpop.permute.xlu0 %1631  ;;  %1858 = vperm.xlu0 %3334, %v3604_v29  }
 0x14a   : > { %6888 = vst [vmem:[#allocation65_spill] sm:$0xff] %v4064_v21 }
 0x14d   : > { %3264 = vset.pattern.permute.xlu1 %v6863_v60  ;;  %v4068_v15 = vpop.permute.xlu1 %1392  ;;  %v4070_v24 = vpop.permute.xlu0 %1640  ;;  %1867 = vperm.xlu0 %3334, %v3609_v30  }
 0x14e   : > { %6889 = vst [vmem:[#allocation66_spill] sm:$0xff] %v4070_v24  ;;  %1189 = vperm.xlu1 %3264, %v3601_v28  }
 0x151   : > { %v4074_v45 = vpop.permute.xlu0 %1649  ;;  %1876 = vperm.xlu0 %3334, %v3632_v39  }
 0x152   : > { %6890 = vst [vmem:[#allocation67_spill] sm:$0xff] %v4074_v45  ;;  %3265 = vset.pattern.permute.xlu1 %v6864_v49  ;;  %v4078_v20 = vpop.permute.xlu1 %1616 }
 0x153   : > { %6891 = vst [vmem:[#allocation68_spill] sm:$0xff] %v4078_v20  ;;  %1410 = vperm.xlu1 %3265, %v3604_v29  }
 0x155   : > { %v4081_v50 = vpop.permute.xlu0 %1658  ;;  %1885 = vperm.xlu0 %3334, %v3639_v42  }
 0x156   : > { %6892 = vst [vmem:[#allocation69_spill] sm:$0xff] %v4081_v50  ;;  %v4084_v21 = vpop.permute.xlu1 %1619 }
 0x157   : > { %6893 = vst [vmem:[#allocation70_spill] sm:$0xff] %v4084_v21  ;;  %3266 = vset.pattern.permute.xlu1 %v6868_v7 }
 0x158   : > { %1634 = vperm.xlu1 %3266, %v3604_v29  }
 0x159   : > { %v4088_v24 = vpop.permute.xlu0 %1667  ;;  %1894 = vperm.xlu0 %3334, %v3662_v51  }
 0x15a   : > { %6894 = vst [vmem:[#allocation71_spill] sm:$0xff] %v4088_v24 }
 0x15b   : > { %v4091_v45 = vpop.permute.xlu1 %1843 }
 0x15c   : > { %6895 = vst [vmem:[#allocation72_spill] sm:$0xff] %v4091_v45  ;;  %1637 = vperm.xlu1 %3266, %v3601_v28  }
 0x15d   : > { %v4094_v38 = vpop.permute.xlu0 %1676  ;;  %1903 = vperm.xlu0 %3334, %v3669_v54  }
 0x15e   : > { %6896 = vst [vmem:[#allocation73_spill] sm:$0xff] %v4094_v38 }
 0x160   : > { %3267 = vset.pattern.permute.xlu1 %v6870_v36  ;;  %v4098_v50 = vpop.permute.xlu1 %502 }
 0x161   : > { %1861 = vperm.xlu1 %3267, %v3601_v28   ;;  %v4101_v20 = vpop.permute.xlu0 %1685  ;;  %1912 = vperm.xlu0 %3334, %v3692_v63  }
 0x162   : > { %6897 = vst [vmem:[#allocation74_spill] sm:$0xff] %v4101_v20 }
 0x165   : > { %3268 = vset.pattern.permute.xlu1 %v6858_v16  ;;  %v4105_v29 = vpop.permute.xlu1 %726  ;;  %3336 = vset.pattern.permute.xlu0 %v6858_v16 }
 0x166   : > { %520 = vperm.xlu1 %3268, %v3612_v31   ;;  %v4109_v38 = vpop.permute.xlu0 %711  ;;  %532 = vperm.xlu0 %3336, %v3632_v39  }
 0x169   : > { %v4112_v24 = vpop.permute.xlu1 %729 }
 0x16a   : > { %3270 = vset.pattern.permute.xlu1 %v6860_v12  ;;  %v4115_v28 = vpop.permute.xlu0 %717  ;;  %541 = vperm.xlu0 %3336, %v3639_v42   ;;  %v4133_v42 = vadd.s32 128, %v3535_v2 }
 0x16b   : > { %744 = vperm.xlu1 %3270, %v3612_v31  }
 0x16c   : > { %vm420_vm4 = vcmp.eq.s32.totalorder %v4133_v42, %v3750_v22  ;;  %vm580_vm5 = vcmp.eq.s32.totalorder %v4133_v42, %v3870_v0  ;;  %vm584_vm6 = vcmp.eq.s32.totalorder %v4133_v42, %v3859_v3  ;;  %vm424_vm10 = vcmp.eq.s32.totalorder %v4133_v42, %v3748_v19 }
 0x16d   : > { %vm644_vm11 = vmor %vm420_vm4, %vm580_vm5  ;;  %vm804_vm12 = vcmp.eq.s32.totalorder %v4133_v42, %v3874_v1  ;;  %vm1028_vm0 = vcmp.eq.s32.totalorder %v4133_v42, %v3883_v56  ;;  %vm808_vm4 = vcmp.eq.s32.totalorder %v4133_v42, %v3967_v18  ;;  %vm1032_vm14 = vcmp.eq.s32.totalorder %v4133_v42, %v3978_v48 }
 0x16e   : > { %v4119_v20 = vpop.permute.xlu1 %953  ;;  %550 = vperm.xlu0 %3336, %v3662_v51   ;;  %v4122_v45 = vpop.permute.xlu0 %723  ;;  %vm4171_vm13 = vmor %vm424_vm10, %vm584_vm6  ;;  %vm1031_vm6 = vcmp.eq.s32.totalorder %v3535_v2, %v3978_v48  ;;  %vm422_vm15 = vcmp.eq.s32.totalorder %v4133_v42, %v3757_v26  ;;  %v6928_v56 = vmov 0  ;;  %v6954_v22 = vmov 0  ;;  %v7002_v48 = vld [vmem:[#allocation42_spill] sm:$0xff] }
 0x16f   : > { %747 = vperm.xlu1 %3270, %v3609_v30   ;;  %vm868_vm1 = vmor %vm644_vm11, %vm804_vm12  ;;  %vm1251_vm11 = vcmp.eq.s32.totalorder %v3535_v2, %v3987_v44  ;;  %v6968_v26 = vmov 0 }
 0x170   : > { %vm4193_vm5 = vmor %vm868_vm1, %vm1028_vm0  ;;  %vm582_vm0 = vcmp.eq.s32.totalorder %v4133_v42, %v3853_v13  ;;  %vm1252_vm1 = vcmp.eq.s32.totalorder %v4133_v42, %v3987_v44  ;;  %v7008_v13 = vmov 0 }
 0x171   : > { %vm871_vm10 = vmor %vm4156_vm7, %vm807_vm2 }
 0x172   : > { %559 = vperm.xlu0 %3336, %v3669_v54   ;;  %v4129_v21 = vpop.permute.xlu0 %732  ;;  %vm872_vm12 = vmor %vm4171_vm13, %vm808_vm4  ;;  %vm586_vm4 = vcmp.eq.s32.totalorder %v4133_v42, %v3876_v61 }
 0x173   : > { %3271 = vset.pattern.permute.xlu1 %v6862_v4  ;;  %v4127_v39 = vpop.permute.xlu1 %1174  ;;  %vm4220_vm7 = vmor %vm871_vm10, %vm1031_vm6  ;;  %vm1255_vm10 = vcmp.eq.s32.totalorder %v3535_v2, %v3994_v41 }
 0x174   : > { %971 = vperm.xlu1 %3271, %v3609_v30   ;;  %vm4229_vm13 = vmor %vm4186_vm3, %vm1251_vm11  ;;  %vm1475_vm3 = vcmp.eq.s32.totalorder %v3535_v2, %v3907_v43 }
 0x175   : > { %vm4233_vm2 = vmor %vm421_vm8, %vm581_vm9  ;;  %vm1256_vm9 = vcmp.eq.s32.totalorder %v4133_v42, %v3994_v41 }
 0x176   : > { %568 = vperm.xlu0 %3336, %v3692_v63   ;;  %v4138_v51 = vpop.permute.xlu0 %741  ;;  %vm4239_vm6 = vmor %vm872_vm12, %vm1032_vm14  ;;  %vm6927_vm12 = vcmp.eq.s32.totalorder %v3535_v2, %v3764_v27  ;;  %vm6935_vm14 = vcmp.eq.s32.totalorder %v4133_v42, %v3867_v9 }
 0x177   : > { %6898 = vst [vmem:[#allocation75_spill] sm:$0xff] %v4138_v51  ;;  %vm4252_vm8 = vmor %vm4193_vm5, %vm1252_vm1  ;;  %vm426_vm5 = vcmp.eq.s32.totalorder %v4133_v42, %v3755_v23 }
 0x178   : > { %3272 = vset.pattern.permute.xlu1 %v6863_v60  ;;  %v4145_v54 = vpop.permute.xlu1 %1398  ;;  %vm4261_vm11 = vmor %vm422_vm15, %vm582_vm0  ;;  %vm425_vm0 = vcmp.eq.s32.totalorder %v3535_v2, %v3755_v23  ;;  %v6924_v23 = vmov 0 }
 0x179   : > { %1192 = vperm.xlu1 %3272, %v3612_v31   ;;  %vm4278_vm15 = vmor %vm4229_vm13, %vm1475_vm3 }
 0x17a   : > { %577 = vperm.xlu0 %3336, %v3699_v5   ;;  %v4163_v47 = vpop.permute.xlu0 %750  ;;  %vm4294_vm13 = vmor %vm4220_vm7, %vm1255_vm10  ;;  %vm1476_vm7 = vcmp.eq.s32.totalorder %v4133_v42, %v3907_v43  ;;  %v6931_v43 = vmov 0 }
 0x17b   : > { %vm4303_vm1 = vmor %vm426_vm5, %vm586_vm4  ;;  %vm6926_vm5 = vcmp.eq.s32.totalorder %v3535_v2, %v3867_v9  ;;  %v7010_v9 = vld [vmem:[#allocation43_spill] sm:$0xff] }
 0x17c   : > { %v4169_v0 = vpop.permute.xlu1 %1401  ;;  %v6925_v23 = vsel %vm4303_vm1, 4294967295, %v6924_v23  ;;  %vm1320_vm10 = vmor %vm4239_vm6, %vm1256_vm9  ;;  %vm6930_vm6 = vcmp.eq.s32.totalorder %v3535_v2, %v3876_v61  ;;  %vm6936_vm1 = vcmp.eq.s32.totalorder %v4133_v42, %v3764_v27  ;;  %v6937_v61 = vmov 0 }
 0x17d   : > { %3273 = vset.pattern.permute.xlu1 %v6864_v49  ;;  %vm4326_vm3 = vmor %vm6927_vm12, %vm6926_vm5  ;;  %vm429_vm5 = vcmp.eq.s32.totalorder %v3535_v2, %v3761_v8  ;;  %v7017_v27 = vmov 0 }
 0x17e   : > { %1416 = vperm.xlu1 %3273, %v3612_v31   ;;  %v4183_v19 = vpop.permute.xlu0 %759  ;;  %3339 = vset.pattern.permute.xlu0 %v6862_v4  ;;  %v6929_v56 = vsel %vm4326_vm3, 4294967295, %v6928_v56  ;;  %vm4337_vm9 = vmor %vm425_vm0, %vm6930_vm6  ;;  %vm6946_vm0 = vcmp.eq.s32.totalorder %v3535_v2, %v3880_v57  ;;  %vm6949_vm6 = vcmp.eq.s32.totalorder %v3535_v2, %v4109_v38  ;;  %vm1029_vm3 = vcmp.eq.s32.totalorder %v3535_v2, %v3889_v52 }
 0x17f   : > { %1004 = vperm.xlu0 %3339, %v3672_v55   ;;  %v6932_v43 = vsel %vm4337_vm9, 4294967295, %v6931_v43  ;;  %vm4348_vm12 = vmor %vm4252_vm8, %vm1476_vm7  ;;  %vm6939_vm8 = vcmp.eq.s32.totalorder %v4133_v42, %v4010_v46  ;;  %vm433_vm9 = vcmp.eq.s32.totalorder %v3535_v2, %v3767_v32 }
 0x180   : > { %vm4364_vm4 = vmor %vm6936_vm1, %vm6935_vm14  ;;  %vm6953_vm1 = vcmp.eq.s32.totalorder %v4133_v42, %v3761_v8  ;;  %v7022_v8 = vld [vmem:[#allocation47_spill] sm:$0xff] }
 0x181   : > { %v4199_v1 = vpop.permute.xlu1 %1625  ;;  %v6938_v61 = vsel %vm4364_vm4, 4294967295, %v6937_v61  ;;  %vm4371_vm7 = vmor %vm1320_vm10, %vm6939_vm8  ;;  %vm6942_vm10 = vcmp.eq.s32.totalorder %v3535_v2, %v4098_v50  ;;  %vm6943_vm8 = vcmp.eq.s32.totalorder %v3535_v2, %v3770_v33 }
 0x182   : > { %1419 = vperm.xlu1 %3273, %v3609_v30   ;;  %v4214_v18 = vpop.permute.xlu0 %768  ;;  %vm4390_vm4 = vmor %vm6943_vm8, %vm6942_vm10  ;;  %vm1699_vm10 = vcmp.eq.s32.totalorder %v3535_v2, %v3926_v37  ;;  %vm1700_vm8 = vcmp.eq.s32.totalorder %v4133_v42, %v3926_v37  ;;  %v6956_v37 = vmov 0 }
 0x183   : > { %6907 = vst [vmem:[#allocation76_spill] sm:$0xff] %v4214_v18  ;;  %1013 = vperm.xlu0 %3339, %v3679_v58   ;;  %vm4399_vm14 = vmor %vm429_vm5, %vm6946_vm0  ;;  %vm6952_vm0 = vcmp.eq.s32.totalorder %v4133_v42, %v3880_v57 }
 0x184   : > { %vm4415_vm5 = vmor %vm4233_vm2, %vm6949_vm6  ;;  %vm6958_vm6 = vcmp.eq.s32.totalorder %v4133_v42, %v4098_v50  ;;  %v6962_v50 = vmov 0 }
 0x185   : > { %vm4434_vm2 = vmor %vm4278_vm15, %vm1699_vm10  ;;  %vm434_vm10 = vcmp.eq.s32.totalorder %v4133_v42, %v3767_v32  ;;  %v6971_v32 = vmov 0 }
 0x186   : > { %3274 = vset.pattern.permute.xlu1 %v6868_v7  ;;  %v4246_v44 = vpop.permute.xlu1 %1846  ;;  %v4266_v58 = vpop.permute.xlu0 %777  ;;  %v6957_v37 = vsel %vm4434_vm2, 4294967295, %v6956_v37  ;;  %vm4458_vm15 = vmor %vm4348_vm12, %vm1700_vm8  ;;  %vm6970_vm8 = vcmp.eq.s32.totalorder %v4133_v42, %v4017_v14 }
 0x187   : > { %1643 = vperm.xlu1 %3274, %v3609_v30   ;;  %1022 = vperm.xlu0 %3339, %v3702_v6   ;;  %v6963_v50 = vsel %vm4458_vm15, 4294967295, %v6962_v50  ;;  %vm6983_vm15 = vnez %v6925_v23  ;;  %v7059_v23 = vld [vmem:[#allocation51_spill] sm:$0xff] }
 0x18a   : > { %v4344_v51 = vpop.permute.xlu0 %786 }
 0x18b   : > { %3275 = vset.pattern.permute.xlu1 %v6870_v36  ;;  %v4342_v41 = vpop.permute.xlu1 %508  ;;  %3341 = vset.pattern.permute.xlu0 %v6863_v60 }
 0x18c   : > { %1864 = vperm.xlu1 %3275, %v3612_v31   ;;  %v6947_v31 = vmov 0  ;;  %1240 = vperm.xlu0 %3341, %v3692_v63  }
 0x18d   : > { %v6948_v31 = vsel %vm4399_vm14, 4294967295, %v6947_v31  ;;  %vm4425_vm14 = vmor %vm6953_vm1, %vm6952_vm0  ;;  %vm6959_vm1 = vcmp.eq.s32.totalorder %v4133_v42, %v3770_v33  ;;  %v6965_v33 = vmov 0 }
 0x18e   : > { %v6955_v22 = vsel %vm4425_vm14, 4294967295, %v6954_v22  ;;  %vm4444_vm0 = vmor %vm6959_vm1, %vm6958_vm6  ;;  %v4454_v3 = vpop.permute.xlu0 %795  ;;  %vm6964_vm6 = vcmp.eq.s32.totalorder %v3535_v2, %v3887_v53  ;;  %vm6967_vm14 = vcmp.eq.s32.totalorder %v3535_v2, %v4010_v46  ;;  %v6975_v46 = vmov 0 }
 0x18f   : > { %v4452_v57 = vpop.permute.xlu1 %511  ;;  %vm4467_vm1 = vmor %vm433_vm9, %vm6964_vm6  ;;  %vm6973_vm6 = vcmp.eq.s32.totalorder %v4133_v42, %v4109_v38 }
 0x190   : > { %v6966_v33 = vsel %vm4467_vm1, 4294967295, %v6965_v33  ;;  %vm4478_vm12 = vmor %vm4294_vm13, %vm6967_vm14  ;;  %3276 = vset.pattern.permute.xlu1 %v6858_v16  ;;  %vm6974_vm13 = vcmp.eq.s32.totalorder %v4133_v42, %v3887_v53  ;;  %v6980_v53 = vmov 0  ;;  %1249 = vperm.xlu0 %3341, %v3699_v5  }
 0x191   : > { %v6969_v26 = vsel %vm4478_vm12, 4294967295, %v6968_v26  ;;  %vm4487_vm9 = vmor %vm4371_vm7, %vm6970_vm8  ;;  %vm811_vm7 = vcmp.eq.s32.totalorder %v3535_v2, %v4040_v40  ;;  %vm816_vm8 = vcmp.eq.s32.totalorder %v4133_v42, %v4105_v29  ;;  %526 = vperm.xlu1 %3276, %v3622_v35   ;;  %vm813_vm12 = vcmp.eq.s32.totalorder %v3535_v2, %v4122_v45 }
 0x192   : > { %v6972_v32 = vsel %vm4487_vm9, 4294967295, %v6971_v32  ;;  %vm870_vm2 = vmor %vm4261_vm11, %vm6973_vm6  ;;  %vm809_vm11 = vcmp.eq.s32.totalorder %v3535_v2, %v4115_v28  ;;  %vm812_vm6 = vcmp.eq.s32.totalorder %v4133_v42, %v4040_v40  ;;  %v7235_v40 = vld [vmem:[#allocation20_spill] sm:$0xff] }
 0x193   : > { %vm4500_vm14 = vmor %vm434_vm10, %vm6974_vm13  ;;  %vm1030_vm10 = vcmp.eq.s32.totalorder %v4133_v42, %v3889_v52  ;;  %vm6979_vm13 = vcmp.eq.s32.totalorder %v3535_v2, %v4105_v29  ;;  %v6989_v29 = vmov 0  ;;  %v1384_v18 = vpop.permute.xlu0 %1383  ;;  %v7038_v52 = vld [vmem:[#allocation49_spill] sm:$0xff] }
 0x194   : > { %v6976_v46 = vsel %vm4500_vm14, 4294967295, %v6975_v46  ;;  %vm4510_vm9 = vmor %vm4415_vm5, %vm1029_vm3  ;;  %vm6982_vm5 = vcmp.eq.s32.totalorder %v4133_v42, %v4115_v28  ;;  %v4564_v30 = vpop.permute.xlu1 %735  ;;  %3345 = vset.pattern.permute.xlu0 %v6868_v7  ;;  %v7046_v28 = vmov 0 }
 0x195   : > { %vm4526_vm3 = vmor %vm4390_vm4, %vm6979_vm13  ;;  %vm1034_vm4 = vcmp.eq.s32.totalorder %v4133_v42, %v3990_v10  ;;  %vm6986_vm13 = vnez %v6929_v56  ;;  %529 = vperm.xlu1 %3276, %v3619_v34   ;;  %1694 = vperm.xlu0 %3345, %v3702_v6  }
 0x196   : > { %v6981_v53 = vsel %vm4526_vm3, 4294967295, %v6980_v53  ;;  %vm874_vm14 = vmor %vm6983_vm15, %vm6982_vm5 }
 0x197   : > { %vm4536_vm1 = vmor %vm870_vm2, %vm1030_vm10  ;;  %vm6991_vm2 = vnez %v6932_v43  ;;  %v7062_v43 = vmov 0 }
 0x198   : > { %vm4546_vm3 = vmor %vm6986_vm13, %vm811_vm7  ;;  %vm6994_vm7 = vnez %v6938_v61  ;;  %v7004_v61 = vmov 0 }
 0x199   : > { %vm4552_vm15 = vmor %vm4444_vm0, %vm816_vm8  ;;  %vm1033_vm8 = vcmp.eq.s32.totalorder %v3535_v2, %v3990_v10  ;;  %v7003_v10 = vld [vmem:[#allocation45_spill] sm:$0xff]  ;;  %3277 = vset.pattern.permute.xlu1 %v6860_v12  ;;  %3348 = vset.pattern.permute.xlu0 %v6870_v36 }
 0x19a   : > { %v6990_v29 = vsel %vm4552_vm15, 4294967295, %v6989_v29  ;;  %vm4558_vm10 = vmor %vm6991_vm2, %vm809_vm11  ;;  %vm1253_vm5 = vcmp.eq.s32.totalorder %v3535_v2, %v7003_v10  ;;  %vm1254_vm11 = vcmp.eq.s32.totalorder %v4133_v42, %v7003_v10  ;;  %753 = vperm.xlu1 %3277, %v3619_v34   ;;  %1921 = vperm.xlu0 %3348, %v3699_v5  }
 0x19b   : > { %vm4568_vm13 = vmor %vm6994_vm7, %vm812_vm6  ;;  %vm6999_vm6 = vnez %v6948_v31  ;;  %v1390_v31 = vpop.permute.xlu0 %1389 }
 0x19c   : > { %vm4572_vm0 = vmor %vm874_vm14, %vm1034_vm4  ;;  %vm7015_vm4 = vcmp.eq.s32.totalorder %v3535_v2, %v4112_v24 }
 0x19d   : > { %vm4585_vm7 = vmor %vm6999_vm6, %vm813_vm12  ;;  %vm7006_vm12 = vcmp.eq.s32.totalorder %v4133_v42, %v4122_v45  ;;  %vm7007_vm6 = vnez %v6955_v22  ;;  %v7013_v45 = vmov 0  ;;  %v7135_v22 = vmov 0 }
 0x19e   : > { %vm4599_vm2 = vmor %vm4558_vm10, %vm1033_vm8  ;;  %vm7016_vm10 = vnez %v6966_v33  ;;  %v7026_v33 = vmov 0  ;;  %3278 = vset.pattern.permute.xlu1 %v6862_v4 }
 0x19f   : > { %v7005_v61 = vsel %vm4599_vm2, 4294967295, %v7004_v61  ;;  %vm4608_vm14 = vmor %vm7007_vm6, %vm7006_vm12  ;;  %vm7011_vm12 = vcmp.eq.s32.totalorder %v3535_v2, %v4017_v14  ;;  %vm7012_vm6 = vnez %v6969_v26  ;;  %v4646_v14 = vpop.permute.xlu1 %956  ;;  %v7023_v26 = vld [vmem:[#allocation55_spill] sm:$0xff]  ;;  %974 = vperm.xlu1 %3278, %v3622_v35  }
 0x1a0   : > { %v7009_v13 = vsel %vm4608_vm14, 4294967295, %v7008_v13  ;;  %vm1317_vm8 = vmor %vm4510_vm9, %vm1253_vm5  ;;  %vm7019_vm9 = vcmp.eq.s32.totalorder %v3535_v2, %v1384_v18 }
 0x1a1   : > { %vm4626_vm2 = vmor %vm7012_vm6, %vm7011_vm12  ;;  %vm1258_vm6 = vcmp.eq.s32.totalorder %v4133_v42, %v7023_v26  ;;  %vm7039_vm12 = vcmp.eq.s32.totalorder %v4133_v42, %v7010_v9 }
 0x1a2   : > { %v7014_v45 = vsel %vm4626_vm2, 4294967295, %v7013_v45  ;;  %vm4635_vm14 = vmor %vm7016_vm10, %vm7015_vm4  ;;  %vm7024_vm10 = vcmp.eq.s32.totalorder %v4133_v42, %v4112_v24  ;;  %vm7030_vm4 = vcmp.eq.s32.totalorder %v4133_v42, %v7002_v48  ;;  %v7032_v24 = vmov 0 }
 0x1a3   : > { %v7018_v27 = vsel %vm4635_vm14, 4294967295, %v7017_v27  ;;  %vm4641_vm5 = vmor %vm1317_vm8, %vm7019_vm9  ;;  %vm7025_vm8 = vnez %v6976_v46  ;;  %vm7031_vm14 = vnez %v6963_v50  ;;  %v7036_v46 = vmov 0  ;;  %v4760_v56 = vpop.permute.xlu1 %1180  ;;  %3279 = vset.pattern.permute.xlu1 %v6863_v60 }
 0x1a4   : > { %vm4659_vm9 = vmor %vm7025_vm8, %vm7024_vm10  ;;  %vm7034_vm10 = vcmp.eq.s32.totalorder %v3535_v2, %v7002_v48  ;;  %vm1701_vm8 = vcmp.eq.s32.totalorder %v3535_v2, %v7038_v52  ;;  %v7041_v50 = vmov 0  ;;  %1198 = vperm.xlu1 %3279, %v3622_v35  }
 0x1a5   : > { %v7027_v33 = vsel %vm4659_vm9, 4294967295, %v7026_v33  ;;  %vm4665_vm2 = vmor %vm4536_vm1, %vm1254_vm11  ;;  %vm7035_vm1 = vnez %v6957_v37 }
 0x1a6   : > { %vm4676_vm15 = vmor %vm7031_vm14, %vm7030_vm4  ;;  %vm7040_vm14 = vnez %v6972_v32  ;;  %v4714_v32 = vpop.permute.xlu0 %1395 }
 0x1a7   : > { %v7033_v24 = vsel %vm4676_vm15, 4294967295, %v7032_v24  ;;  %vm4685_vm11 = vmor %vm7035_vm1, %vm7034_vm10  ;;  %vm1036_vm15 = vcmp.eq.s32.totalorder %v4133_v42, %v4047_v25  ;;  %vm1478_vm10 = vcmp.eq.s32.totalorder %v4133_v42, %v1384_v18  ;;  %v7050_v18 = vmov 0 }
 0x1a8   : > { %v7037_v46 = vsel %vm4685_vm11, 4294967295, %v7036_v46  ;;  %vm4696_vm4 = vmor %vm7040_vm14, %vm7039_vm12  ;;  %vm7045_vm12 = vcmp.eq.s32.totalorder %v3535_v2, %v4047_v25  ;;  %vm7052_vm11 = vcmp.eq.s32.totalorder %v4133_v42, %v1390_v31  ;;  %v7053_v25 = vmov 0  ;;  %1201 = vperm.xlu1 %3279, %v3619_v34  }
 0x1a9   : > { %v7042_v50 = vsel %vm4696_vm4, 4294967295, %v7041_v50  ;;  %vm1322_vm1 = vmor %vm4572_vm0, %vm1258_vm6  ;;  %vm1037_vm6 = vcmp.eq.s32.totalorder %v3535_v2, %v4054_v59 }
 0x1aa   : > { %vm4710_vm9 = vmor %vm4641_vm5, %vm1701_vm8  ;;  %vm7048_vm5 = vcmp.eq.s32.totalorder %v3535_v2, %v7022_v8  ;;  %vm7049_vm8 = vnez %v6981_v53  ;;  %v7055_v53 = vmov 0  ;;  %v4789_v48 = vpop.permute.xlu0 %1404 }
 0x1ab   : > { %vm4722_vm0 = vmor %vm4546_vm3, %vm7045_vm12  ;;  %vm1706_vm3 = vcmp.eq.s32.totalorder %v4133_v42, %v4023_v11 }
 0x1ac   : > { %v7047_v28 = vsel %vm4722_vm0, 4294967295, %v7046_v28  ;;  %vm4733_vm14 = vmor %vm7049_vm8, %vm7048_vm5  ;;  %vm1042_vm8 = vcmp.eq.s32.totalorder %v4133_v42, %v4119_v20  ;;  %3280 = vset.pattern.permute.xlu1 %v6864_v49 }
 0x1ad   : > { %v7051_v18 = vsel %vm4733_vm14, 4294967295, %v7050_v18  ;;  %vm1546_vm4 = vmor %vm1322_vm1, %vm7052_vm11  ;;  %vm7061_vm11 = vnez %v6990_v29  ;;  %1425 = vperm.xlu1 %3280, %v3619_v34  }
 0x1ae   : > { %vm4743_vm12 = vmor %vm4568_vm13, %vm1036_vm15  ;;  %vm1925_vm15 = vcmp.eq.s32.totalorder %v3535_v2, %v7059_v23  ;;  %vm1041_vm13 = vcmp.eq.s32.totalorder %v3535_v2, %v4119_v20  ;;  %v7239_v20 = vld [vmem:[#allocation7_spill] sm:$0xff] }
 0x1af   : > { %v7054_v25 = vsel %vm4743_vm12, 4294967295, %v7053_v25  ;;  %vm4749_vm0 = vmor %vm4585_vm7, %vm1037_vm6  ;;  %vm7060_vm7 = vcmp.eq.s32.totalorder %v4133_v42, %v7022_v8  ;;  %vm1038_vm6 = vcmp.eq.s32.totalorder %v4133_v42, %v4054_v59  ;;  %v7123_v59 = vmov 0 }
 0x1b0   : > { %v7056_v53 = vsel %vm4749_vm0, 4294967295, %v7055_v53  ;;  %vm4755_vm5 = vmor %vm4665_vm2, %vm1478_vm10  ;;  %vm1930_vm10 = vcmp.eq.s32.totalorder %v4133_v42, %v4033_v17 }
 0x1b1   : > { %vm4771_vm1 = vmor %vm7061_vm11, %vm7060_vm7  ;;  %vm1481_vm7 = vcmp.eq.s32.totalorder %v3535_v2, %v1390_v31  ;;  %vm7066_vm11 = vnez %v7009_v13  ;;  %v4813_v31 = vpop.permute.xlu1 %1183  ;;  %v7075_v13 = vld [vmem:[#allocation19_spill] sm:$0xff]  ;;  %3281 = vset.pattern.permute.xlu1 %v6868_v7 }
 0x1b2   : > { %v7063_v43 = vsel %vm4771_vm1, 4294967295, %v7062_v43  ;;  %vm1770_vm2 = vmor %vm1546_vm4, %vm1706_vm3  ;;  %vm1257_vm3 = vcmp.eq.s32.totalorder %v3535_v2, %v7023_v26  ;;  %vm7074_vm4 = vnez %v7005_v61  ;;  %v7081_v26 = vld [vmem:[#allocation56_spill] sm:$0xff]  ;;  %1646 = vperm.xlu1 %3281, %v3622_v35   ;;  %v7181_v61 = vmov 0 }
 0x1b3   : > { %vm4784_vm0 = vmor %vm4710_vm9, %vm1925_vm15  ;;  %vm7071_vm15 = vnez %v7018_v27  ;;  %v3445_v27 = vmov 0.0  }
 0x1b4   : > { %vm4797_vm12 = vmor %vm7066_vm11, %vm1038_vm6  ;;  %v2053_v8 = vsel %vm4784_vm0, 1.0, %v3445_v27 }
 0x1b5   : > { %vm4801_vm9 = vmor %vm1770_vm2, %vm1930_vm10  ;;  %vm1702_vm2 = vcmp.eq.s32.totalorder %v4133_v42, %v7038_v52  ;;  %vm7076_vm10 = vnez %v7027_v33  ;;  %v7084_v33 = vmov 0  ;;  %v4856_v52 = vpop.permute.xlu0 %1413  ;;  %v4889_v29 = vpop.permute.xlu1 %1407 }
 0x1b6   : > { %vm4807_vm1 = vmor %vm7071_vm15, %vm1041_vm13  ;;  %vm1263_vm13 = vcmp.eq.s32.totalorder %v3535_v2, %v4127_v39  ;;  %v2058_v38 = vsel %vm4801_vm9, 1.0, %v3445_v27  ;;  %vm7088_vm9 = vnez %v7051_v18  ;;  %3282 = vset.pattern.permute.xlu1 %v6870_v36 }
 0x1b7   : > { %vm1321_vm14 = vmor %vm7074_vm4, %vm1257_vm3  ;;  %vm7082_vm3 = vcmp.eq.s32.totalorder %v3535_v2, %v7010_v9  ;;  %1870 = vperm.xlu1 %3282, %v3622_v35   ;;  %v7176_v35 = vmov 0 }
 0x1b8   : > { %vm4821_vm11 = vmor %vm7076_vm10, %vm1042_vm8  ;;  %vm1259_vm8 = vcmp.eq.s32.totalorder %v3535_v2, %v7081_v26  ;;  %vm1926_vm10 = vcmp.eq.s32.totalorder %v4133_v42, %v7059_v23 }
 0x1b9   : > { %vm4827_vm15 = vmor %vm1321_vm14, %vm1481_vm7  ;;  %vm7083_vm14 = vnez %v7014_v45 }
 0x1ba   : > { %vm4844_vm7 = vmor %vm7083_vm14, %vm7082_vm3  ;;  %vm1705_vm3 = vcmp.eq.s32.totalorder %v3535_v2, %v4023_v11  ;;  %vm1264_vm14 = vcmp.eq.s32.totalorder %v4133_v42, %v4127_v39  ;;  %v7102_v39 = vmov 0 }
 0x1bb   : > { %v7085_v33 = vsel %vm4844_vm7, 4294967295, %v7084_v33  ;;  %vm1766_vm0 = vmor %vm4755_vm5, %vm1702_vm2  ;;  %vm7086_vm5 = vnez %v7033_v24  ;;  %vm7087_vm2 = vnez %v7037_v46  ;;  %1873 = vperm.xlu1 %3282, %v3619_v34  }
 0x1bc   : > { %vm1990_vm6 = vmor %vm1766_vm0, %vm1926_vm10  ;;  %v2052_v9 = vsel %vm7086_vm5, 1.0, %v3445_v27  ;;  %v2051_v45 = vsel %vm7087_vm2, 1.0, %v3445_v27  ;;  %vm595_vm0 = vcmp.eq.s32.totalorder %v3535_v2, %v4342_v41  ;;  %vm7091_vm10 = vnez %v7042_v50 }
 0x1bd   : > { %vm4873_vm4 = vmor %vm7088_vm9, %vm1263_vm13  ;;  %v2054_v11 = vsel %vm1990_vm6, 1.0, %v3445_v27  ;;  %v2115_v24 = vpack.c.bf16 %v2053_v8, %v2051_v45  ;;  %v2056_v46 = vsel %vm7091_vm10, 1.0, %v3445_v27  ;;  %vm1261_vm6 = vcmp.eq.s32.totalorder %v3535_v2, %v4061_v62 }
 0x1be   : > { %vm4885_vm5 = vmor %vm4827_vm15, %vm1705_vm3  ;;  %v2116_v18 = vpack.c.bf16 %v2054_v11, %v2052_v9  ;;  %v2118_v23 = vpack.c.bf16 %v2058_v38, %v2056_v46  ;;  %vm7094_vm2 = vnez %v7047_v28  ;;  %v7095_v50 = vmov 0  ;;  %v4918_v28 = vpop.permute.xlu0 %1422  ;;  %v7154_v46 = vld [vmem:[#allocation64_spill] sm:$0xff]  ;;  %v7199_v38 = vld [vmem:[#allocation21_spill] sm:$0xff] }
 0x1bf   : > { %vm4900_vm9 = vmor %vm7094_vm2, %vm1259_vm8  ;;  %vm7097_vm15 = vnez %v7063_v43  ;;  %vm1929_vm8 = vcmp.eq.s32.totalorder %v3535_v2, %v4033_v17  ;;  %vm7100_vm2 = vcmp.eq.s32.totalorder %v4133_v42, %v7081_v26  ;;  %vm7104_vm13 = vcmp.eq.s32.totalorder %v3535_v2, %v7075_v13  ;;  %v7122_v26 = vld [vmem:[#allocation18_spill] sm:$0xff]  ;;  %v7174_v43 = vld [vmem:[#allocation72_spill] sm:$0xff]  ;;  %3283 = vset.pattern.permute.xlu1 %v6858_v16 }
 0x1c0   : > { %v7096_v50 = vsel %vm4900_vm9, 4294967295, %v7095_v50  ;;  %vm4909_vm3 = vmor %vm7097_vm15, %vm1264_vm14  ;;  %vm7101_vm14 = vnez %v7054_v25  ;;  %2307 = vmatprep.mubr.bf16.mxu0 %v2116_v18  ;;  %vm7107_vm9 = vnez %v7056_v53  ;;  %v7110_v25 = vld [vmem:[#allocation57_spill] sm:$0xff]  ;;  %v7114_v53 = vmov 0 }
 0x1c1   : > { %vm4927_vm15 = vmor %vm7101_vm14, %vm7100_vm2  ;;  %vm1265_vm2 = vcmp.eq.s32.totalorder %v3535_v2, %v7110_v25  ;;  %2308 = vmatmul.mubr.bf16.vlgmr.msra.gmra.mrb[0].mxu0 %v2115_v24  ;;  %v7129_v9 = vmov 0  ;;  %v7132_v45 = vmov 0  ;;  %v7150_v24 = vmov 0 }
 0x1c2   : > { %v7103_v39 = vsel %vm4927_vm15, 4294967295, %v7102_v39  ;;  %vm4937_vm10 = vmor %vm7104_vm13, %vm595_vm0  ;;  %vm1262_vm13 = vcmp.eq.s32.totalorder %v4133_v42, %v4061_v62  ;;  %2315 = vmatprep.mubr.bf16.mxu0 %v2118_v23  ;;  %v7163_v23 = vmov 0  ;;  %v7187_v8 = vmov 0 }
 0x1c3   : > { %vm4943_vm7 = vmor %vm7107_vm9, %vm1261_vm6  ;;  %vm7113_vm9 = vcmp.eq.s32.totalorder %v4133_v42, %v4145_v54 }
 0x1c4   : > { %vm4953_vm15 = vmor %vm4885_vm5, %vm1929_vm8  ;;  %vm7116_vm5 = vcmp.eq.s32.totalorder %v4133_v42, %v4342_v41  ;;  %vm7117_vm8 = vcmp.eq.s32.totalorder %v4133_v42, %v7075_v13  ;;  %v4993_v41 = vpop.permute.xlu1 %1628  ;;  %v4995_v13 = vpop.permute.xlu0 %1431 }
 0x1c5   : > { %vm4968_vm14 = vmor %vm4909_vm3, %vm7113_vm9  ;;  %v2057_v10 = vsel %vm4953_vm15, 1.0, %v3445_v27  ;;  %vm821_vm15 = vcmp.eq.s32.totalorder %v3535_v2, %v4564_v30 }
 0x1c6   : > { %v7115_v53 = vsel %vm4968_vm14, 4294967295, %v7114_v53  ;;  %vm4978_vm0 = vmor %vm7117_vm8, %vm7116_vm5  ;;  %vm437_vm5 = vcmp.eq.s32.totalorder %v3535_v2, %v7122_v26  ;;  %vm822_vm14 = vcmp.eq.s32.totalorder %v4133_v42, %v4564_v30  ;;  %v7142_v30 = vmov 0 }
 0x1c7   : > { %vm4988_vm9 = vmor %vm4797_vm12, %vm1262_vm13  ;;  %vm7125_vm13 = vcmp.eq.s32.totalorder %v3535_v2, %v4129_v21  ;;  %vm7128_vm12 = vcmp.eq.s32.totalorder %v4133_v42, %v7110_v25  ;;  %v7175_v25 = vld [vmem:[#allocation48_spill] sm:$0xff] }
 0x1c8   : > { %vm5004_vm8 = vmor %vm4807_vm1, %vm1265_vm2  ;;  %vm438_vm1 = vcmp.eq.s32.totalorder %v4133_v42, %v7122_v26  ;;  %vm1043_vm2 = vcmp.eq.s32.totalorder %v3535_v2, %v4646_v14  ;;  %v5075_v37 = vpop.permute.xlu0 %1440  ;;  %v5099_v11 = vpop.permute.xlu1 %1852  ;;  %v7189_v26 = vmov 0 }
 0x1c9   : > { %v7124_v59 = vsel %vm5004_vm8, 4294967295, %v7123_v59  ;;  %vm5015_vm3 = vmor %vm4937_vm10, %vm7125_vm13  ;;  %vm7131_vm13 = vcmp.eq.s32.totalorder %v4133_v42, %v4129_v21  ;;  %vm1485_vm8 = vcmp.eq.s32.totalorder %v3535_v2, %v4714_v32 }
 0x1ca   : > { %vm5032_vm10 = vmor %vm4821_vm11, %vm7128_vm12  ;;  %vm7134_vm12 = vcmp.eq.s32.totalorder %v3535_v2, %v4145_v54  ;;  %vm7138_vm11 = vnez %v7085_v33  ;;  %v7144_v33 = vmov 0 }
 0x1cb   : > { %v7130_v9 = vsel %vm5032_vm10, 4294967295, %v7129_v9  ;;  %vm5043_vm6 = vmor %vm4978_vm0, %vm7131_vm13  ;;  %vm7137_vm0 = vcmp.eq.s32.totalorder %v3535_v2, %v4452_v57  ;;  %v2055_v54 = vsel %vm7138_vm11, 1.0, %v3445_v27 }
 0x1cc   : > { %v7133_v45 = vsel %vm5043_vm6, 4294967295, %v7132_v45  ;;  %vm5056_vm10 = vmor %vm4873_vm4, %vm7134_vm12  ;;  %vm7139_vm4 = vcmp.eq.s32.totalorder %v4133_v42, %v4452_v57  ;;  %v2117_v21 = vpack.c.bf16 %v2057_v10, %v2055_v54  ;;  %v5138_v18 = vpop.permute.xlu0 %1449  ;;  %v7201_v10 = vmov 0  ;;  %v7209_v54 = vld [vmem:[#allocation6_spill] sm:$0xff]  ;;  %v7218_v57 = vld [vmem:[#allocation65_spill] sm:$0xff] }
 0x1cd   : > { %v7136_v22 = vsel %vm5056_vm10, 4294967295, %v7135_v22  ;;  %vm661_vm13 = vmor %vm437_vm5, %vm7137_vm0  ;;  %vm7140_vm5 = vcmp.eq.s32.totalorder %v3535_v2, %v4068_v15  ;;  %vm7141_vm0 = vnez %v7096_v50  ;;  %vm1489_vm10 = vcmp.eq.s32.totalorder %v3535_v2, %v4169_v0  ;;  %535 = vperm.xlu1 %3283, %v7209_v54  }
 0x1ce   : > { %vm662_vm12 = vmor %vm438_vm1, %vm7139_vm4  ;;  %vm1044_vm1 = vcmp.eq.s32.totalorder %v4133_v42, %v4646_v14  ;;  %v7152_v14 = vmov 0  ;;  %2316 = vmatmul.mubr.bf16.gmra.mrb[4].mxu0 %v2117_v21  ;;  %v7211_v21 = vmov 0 }
 0x1cf   : > { %vm5082_vm6 = vmor %vm7141_vm0, %vm7140_vm5  ;;  %vm7148_vm5 = vcmp.eq.s32.totalorder %v4133_v42, %v4068_v15  ;;  %v7156_v15 = vld [vmem:[#allocation70_spill] sm:$0xff] }
 0x1d0   : > { %v7143_v30 = vsel %vm5082_vm6, 4294967295, %v7142_v30  ;;  %vm5086_vm11 = vmor %vm661_vm13, %vm821_vm15  ;;  %vm7149_vm15 = vnez %v7103_v39  ;;  %v5190_v17 = vpop.permute.xlu0 %1458 }
 0x1d1   : > { %v7145_v33 = vsel %vm5086_vm11, 4294967295, %v7144_v33  ;;  %vm5094_vm4 = vmor %vm5015_vm3, %vm1043_vm2  ;;  %vm1712_vm2 = vcmp.eq.s32.totalorder %v4133_v42, %v7154_v46  ;;  %vm1268_vm11 = vcmp.eq.s32.totalorder %v4133_v42, %v4760_v56  ;;  %3284 = vset.pattern.permute.xlu1 %v6860_v12 }
 0x1d2   : > { %vm5106_vm13 = vmor %vm7149_vm15, %vm7148_vm5  ;;  %vm7155_vm5 = vcmp.eq.s32.totalorder %v4133_v42, %v4714_v32  ;;  %756 = vperm.xlu1 %3284, %v7239_v20  }
 0x1d3   : > { %v7151_v24 = vsel %vm5106_vm13, 4294967295, %v7150_v24  ;;  %vm5110_vm0 = vmor %vm662_vm12, %vm822_vm14  ;;  %vm1709_vm12 = vcmp.eq.s32.totalorder %v3535_v2, %v7156_v15  ;;  %vm7165_vm13 = vnez %v7115_v53  ;;  %v7250_v53 = vmov 0 }
 0x1d4   : > { %v7153_v14 = vsel %vm5110_vm0, 4294967295, %v7152_v14  ;;  %vm1549_vm3 = vmor %vm4943_vm7, %vm1485_vm8  ;;  %vm1490_vm7 = vcmp.eq.s32.totalorder %v4133_v42, %v4169_v0  ;;  %vm7157_vm8 = vnez %v7133_v45  ;;  %vm1267_vm0 = vcmp.eq.s32.totalorder %v3535_v2, %v4760_v56  ;;  %v5148_v0 = vpop.permute.xlu1 %1855  ;;  %v7170_v56 = vld [vmem:[#allocation68_spill] sm:$0xff]  ;;  %v5261_v34 = vpop.permute.xlu0 %1467 }
 0x1d5   : > { %vm1550_vm14 = vmor %vm4988_vm9, %vm7155_vm5  ;;  %vm1710_vm9 = vcmp.eq.s32.totalorder %v4133_v42, %v7156_v15  ;;  %v7205_v45 = vmov 0 }
 0x1d6   : > { %vm5132_vm15 = vmor %vm7157_vm8, %vm1044_vm1  ;;  %vm7162_vm1 = vnez %v7124_v59  ;;  %v7193_v59 = vmov 0  ;;  %3285 = vset.pattern.permute.xlu1 %v6862_v4 }
 0x1d7   : > { %vm5142_vm5 = vmor %vm1549_vm3, %vm1709_vm12  ;;  %vm1711_vm12 = vcmp.eq.s32.totalorder %v3535_v2, %v7154_v46  ;;  %980 = vperm.xlu1 %3285, %v7239_v20  }
 0x1d8   : > { %vm5152_vm8 = vmor %vm7162_vm1, %vm1489_vm10  ;;  %vm7171_vm1 = vnez %v7130_v9  ;;  %v5223_v62 = vpop.permute.xlu1 %517 }
 0x1d9   : > { %v7164_v23 = vsel %vm5152_vm8, 4294967295, %v7163_v23  ;;  %vm5158_vm6 = vmor %vm7165_vm13, %vm1712_vm2  ;;  %vm1491_vm2 = vcmp.eq.s32.totalorder %v3535_v2, %v4789_v48 }
 0x1da   : > { %vm5162_vm3 = vmor %vm1550_vm14, %vm1710_vm9  ;;  %vm1933_vm9 = vcmp.eq.s32.totalorder %v3535_v2, %v7174_v43 }
 0x1db   : > { %vm5173_vm8 = vmor %vm7171_vm1, %vm1490_vm7  ;;  %vm1492_vm1 = vcmp.eq.s32.totalorder %v4133_v42, %v4789_v48  ;;  %v7179_v48 = vmov 0  ;;  %983 = vperm.xlu1 %3285, %v7209_v54  }
 0x1dc   : > { %vm1331_vm13 = vmor %vm5094_vm4, %vm1267_vm0  ;;  %vm1934_vm0 = vcmp.eq.s32.totalorder %v4133_v42, %v7174_v43  ;;  %v5289_v9 = vpop.permute.xlu1 %738  ;;  %v3365_v43 = vld [vmem:[%s6716_s2] sm:$0xff]  }
 0x1dd   : > { %vm1332_vm7 = vmor %vm5132_vm15, %vm1268_vm11  ;;  %vm7178_vm15 = vnez %v7136_v22  ;;  %3095 = vmatprep.subr.bf16.mxu1 %v3365_v43 }
 0x1de   : > { %vm5198_vm14 = vmor %vm5142_vm5, %vm1933_vm9  ;;  %vm7185_vm9 = vcmp.eq.s32.totalorder %v3535_v2, %v7170_v56  ;;  %3096 = vmatpush3.bf16.msra.mxu1 %v3365_v43 }
 0x1df   : > { %v7177_v35 = vsel %vm5198_vm14, 4294967295, %v7176_v35  ;;  %vm5209_vm10 = vmor %vm7178_vm15, %vm1711_vm12  ;;  %vm7186_vm12 = vnez %v7143_v30  ;;  %vm1270_vm14 = vcmp.eq.s32.totalorder %v4133_v42, %v4813_v31  ;;  %3286 = vset.pattern.permute.xlu1 %v6863_v60 }
 0x1e0   : > { %v7180_v48 = vsel %vm5209_vm10, 4294967295, %v7179_v48  ;;  %vm5215_vm4 = vmor %vm5162_vm3, %vm1934_vm0  ;;  %vm1269_vm3 = vcmp.eq.s32.totalorder %v3535_v2, %v4813_v31  ;;  %v7200_v31 = vld [vmem:[#allocation44_spill] sm:$0xff]  ;;  %v963_v46 = vpop.permute.xlu1 %962  ;;  %1207 = vperm.xlu1 %3286, %v7209_v54  }
 0x1e1   : > { %v7182_v61 = vsel %vm5215_vm4, 4294967295, %v7181_v61  ;;  %vm5219_vm5 = vmor %vm1331_vm13, %vm1491_vm2  ;;  %vm7191_vm13 = vcmp.eq.s32.totalorder %v4133_v42, %v7170_v56  ;;  %vm7192_vm2 = vnez %v7151_v24 }
 0x1e2   : > { %vm5230_vm15 = vmor %vm7186_vm12, %vm7185_vm9  ;;  %vm7195_vm9 = vcmp.eq.s32.totalorder %v3535_v2, %v7175_v25  ;;  %vm7196_vm12 = vnez %v7145_v33  ;;  %v1841_v33 = vpop.permute.xlu0 %1840 }
 0x1e3   : > { %v7188_v8 = vsel %vm5230_vm15, 4294967295, %v7187_v8  ;;  %vm5234_vm11 = vmor %vm1332_vm7, %vm1492_vm1  ;;  %vm1936_vm1 = vcmp.eq.s32.totalorder %v4133_v42, %v4246_v44  ;;  %vm7198_vm7 = vnez %v7153_v14  ;;  %vm1493_vm15 = vcmp.eq.s32.totalorder %v3535_v2, %v4889_v29 }
 0x1e4   : > { %v7190_v26 = vsel %vm5234_vm11, 4294967295, %v7189_v26  ;;  %vm5246_vm0 = vmor %vm7192_vm2, %vm7191_vm13  ;;  %vm7197_vm2 = vcmp.eq.s32.totalorder %v4133_v42, %v7175_v25  ;;  %vm599_vm11 = vcmp.eq.s32.totalorder %v3535_v2, %v7200_v31  ;;  %3287 = vset.pattern.permute.xlu1 %v6864_v49 }
 0x1e5   : > { %v7194_v59 = vsel %vm5246_vm0, 4294967295, %v7193_v59  ;;  %vm1109_vm4 = vmor %vm7196_vm12, %vm7195_vm9  ;;  %vm1494_vm9 = vcmp.eq.s32.totalorder %v4133_v42, %v4889_v29  ;;  %vm7204_vm12 = vnez %v7164_v23  ;;  %v7219_v29 = vmov 0  ;;  %1428 = vperm.xlu1 %3287, %v7239_v20  }
 0x1e6   : > { %vm1110_vm0 = vmor %vm7198_vm7, %vm7197_vm2  ;;  %vm1715_vm2 = vcmp.eq.s32.totalorder %v3535_v2, %v4993_v41  ;;  %v1850_v50 = vpop.permute.xlu0 %1849 }
 0x1e7   : > { %vm1333_vm10 = vmor %vm1109_vm4, %vm1269_vm3  ;;  %vm7203_vm3 = vcmp.eq.s32.totalorder %v3535_v2, %v4199_v1 }
 0x1e8   : > { %vm5280_vm13 = vmor %vm5158_vm6, %vm1936_vm1 }
 0x1e9   : > { %v7202_v10 = vsel %vm5280_vm13, 4294967295, %v7201_v10  ;;  %vm1334_vm7 = vmor %vm1110_vm0, %vm1270_vm14  ;;  %vm600_vm0 = vcmp.eq.s32.totalorder %v4133_v42, %v7200_v31  ;;  %vm1931_vm14 = vcmp.eq.s32.totalorder %v3535_v2, %v1841_v33  ;;  %3288 = vset.pattern.permute.xlu1 %v6868_v7  ;;  %v3368_v31 = vld [vmem:[%s6716_s2 + $0x18] sm:$0xff]  }
 0x1ea   : > { %vm5296_vm6 = vmor %vm7204_vm12, %vm7203_vm3  ;;  %vm7210_vm12 = vcmp.eq.s32.totalorder %v4133_v42, %v4199_v1  ;;  %v7216_v1 = vmov 0  ;;  %1652 = vperm.xlu1 %3288, %v7239_v20  }
 0x1eb   : > { %v7206_v45 = vsel %vm5296_vm6, 4294967295, %v7205_v45  ;;  %vm5309_vm4 = vmor %vm1333_vm10, %vm1493_vm15  ;;  %vm1940_vm10 = vcmp.eq.s32.totalorder %v4133_v42, %v5099_v11 }
 0x1ec   : > { %vm5319_vm3 = vmor %vm5173_vm8, %vm7210_vm12  ;;  %vm7215_vm8 = vcmp.eq.s32.totalorder %v3535_v2, %v7199_v38  ;;  %vm7221_vm12 = vcmp.eq.s32.totalorder %v4133_v42, %v4993_v41 }
 0x1ed   : > { %v7212_v21 = vsel %vm5319_vm3, 4294967295, %v7211_v21  ;;  %vm5326_vm1 = vmor %vm1334_vm7, %vm1494_vm9  ;;  %vm7223_vm9 = vcmp.eq.s32.totalorder %v4133_v42, %v7199_v38  ;;  %v7258_v38 = vmov 0 }
 0x1ee   : > { %vm5338_vm15 = vmor %vm7215_vm8, %vm599_vm11  ;;  %vm7222_vm11 = vnez %v7190_v26  ;;  %1655 = vperm.xlu1 %3288, %v7209_v54  }
 0x1ef   : > { %v7217_v1 = vsel %vm5338_vm15, 4294967295, %v7216_v1  ;;  %vm5349_vm7 = vmor %vm5219_vm5, %vm1715_vm2  ;;  %vm1932_vm15 = vcmp.eq.s32.totalorder %v4133_v42, %v1841_v33  ;;  %vm7226_vm2 = vcmp.eq.s32.totalorder %v3535_v2, %v4246_v44 }
 0x1f0   : > { %v7220_v29 = vsel %vm5349_vm7, 4294967295, %v7219_v29  ;;  %vm1780_vm8 = vmor %vm7222_vm11, %vm7221_vm12  ;;  %vm7227_vm7 = vnez %v7180_v48  ;;  %vm7230_vm11 = vnez %v7188_v8 }
 0x1f1   : > { %vm5363_vm13 = vmor %vm7223_vm9, %vm600_vm0  ;;  %vm601_vm0 = vcmp.eq.s32.totalorder %v3535_v2, %v5223_v62  ;;  %vm7233_vm9 = vnez %v7194_v59 }
 0x1f2   : > { %vm5374_vm12 = vmor %vm7227_vm7, %vm7226_vm2  ;;  %vm7234_vm7 = vnez %v7177_v35  ;;  %v3366_v35 = vld [vmem:[%s6716_s2 + $0x8] sm:$0xff]   ;;  %3289 = vset.pattern.permute.xlu1 %v6870_v36 }
 0x1f3   : > { %vm1995_vm3 = vmor %vm7230_vm11, %vm1931_vm14  ;;  %v2061_v15 = vsel %vm7234_vm7, 1.0, %v3445_v27  ;;  %vm441_vm14 = vcmp.eq.s32.totalorder %v3535_v2, %v7235_v40  ;;  %vm1938_vm11 = vcmp.eq.s32.totalorder %v4133_v42, %v1850_v50  ;;  %v2063_v22 = vsel %vm5374_vm12, 1.0, %v3445_v27  ;;  %3097 = vmatprep.subr.bf16.mxu1 %v3366_v35  ;;  %1879 = vperm.xlu1 %3289, %v7209_v54   ;;  %v3369_v54 = vld [vmem:[%s6716_s2 + $0x20] sm:$0xff]  }
 0x1f4   : > { %vm5380_vm6 = vmor %vm1780_vm8, %vm1940_vm10  ;;  %v2059_v44 = vsel %vm1995_vm3, 1.0, %v3445_v27  ;;  %vm7236_vm10 = vcmp.eq.s32.totalorder %v3535_v2, %v7218_v57  ;;  %vm7240_vm3 = vnez %v7182_v61  ;;  %v7249_v61 = vld [vmem:[#allocation75_spill] sm:$0xff]  ;;  %3098 = vmatpush3.bf16.msra.mxu1 %v3366_v35 }
 0x1f5   : > { %vm1996_vm5 = vmor %vm7233_vm9, %vm1932_vm15  ;;  %v2062_v56 = vsel %vm7240_vm3, 1.0, %v3445_v27  ;;  %v2119_v39 = vpack.c.bf16 %v2061_v15, %v2059_v44  ;;  %vm7241_vm15 = vcmp.eq.s32.totalorder %v4133_v42, %v7218_v57  ;;  %vm1942_vm9 = vcmp.eq.s32.totalorder %v4133_v42, %v5148_v0 }
 0x1f6   : > { %vm5400_vm8 = vmor %vm5309_vm4, %vm7236_vm10  ;;  %v2060_v23 = vsel %vm1996_vm5, 1.0, %v3445_v27  ;;  %vm1941_vm4 = vcmp.eq.s32.totalorder %v3535_v2, %v5148_v0  ;;  %vm1937_vm5 = vcmp.eq.s32.totalorder %v3535_v2, %v1850_v50  ;;  %vm7246_vm3 = vnez %v7206_v45  ;;  %v966_v0 = vpop.permute.xlu1 %965 }
 0x1f7   : > { %vm5414_vm2 = vmor %vm5326_vm1, %vm7241_vm15  ;;  %v2120_v25 = vpack.c.bf16 %v2062_v56, %v2060_v23  ;;  %vm7252_vm1 = vnez %v7212_v21  ;;  %v2068_v33 = vsel %vm5380_vm6, 1.0, %v3445_v27  ;;  %v7282_v50 = vmov 0  ;;  %v1859_v56 = vpop.permute.xlu0 %1858  ;;  %3290 = vset.pattern.permute.xlu1 %v6858_v16 }
 0x1f8   : > { %vm5427_vm7 = vmor %vm441_vm14, %vm601_vm0 }
 0x1f9   : > { %vm5437_vm15 = vmor %vm7246_vm3, %vm1937_vm5  ;;  %2323 = vmatprep.mubr.bf16.mxu0 %v2120_v25  ;;  %vm442_vm5 = vcmp.eq.s32.totalorder %v4133_v42, %v7235_v40  ;;  %v3370_v40 = vld [vmem:[%s6716_s2 + $0x28] sm:$0xff]  }
 0x1fa   : > { %vm5445_vm14 = vmor %vm5400_vm8, %vm1941_vm4  ;;  %2324 = vmatmul.mubr.bf16.gmra.mrb[8].mxu0 %v2119_v39  ;;  %vm823_vm8 = vcmp.eq.s32.totalorder %v3535_v2, %v5289_v9  ;;  %vm7255_vm4 = vnez %v7202_v10 }
 0x1fb   : > { %v7251_v53 = vsel %vm5445_vm14, 4294967295, %v7250_v53  ;;  %vm2002_vm10 = vmor %vm7252_vm1, %vm1938_vm11  ;;  %v2064_v59 = vsel %vm7255_vm4, 1.0, %v3445_v27  ;;  %vm7256_vm11 = vcmp.eq.s32.totalorder %v3535_v2, %v5099_v11  ;;  %vm7257_vm1 = vnez %v7220_v29  ;;  %v7271_v29 = vld [vmem:[#allocation58_spill] sm:$0xff] }
 0x1fc   : > { %vm5456_vm3 = vmor %vm5414_vm2, %vm1942_vm9  ;;  %v2066_v26 = vsel %vm2002_vm10, 1.0, %v3445_v27  ;;  %vm7260_vm9 = vcmp.eq.s32.totalorder %v4133_v42, %v5223_v62  ;;  %vm824_vm10 = vcmp.eq.s32.totalorder %v4133_v42, %v5289_v9  ;;  %vm826_vm4 = vcmp.eq.s32.totalorder %v4133_v42, %v7249_v61  ;;  %v1190_v9 = vpop.permute.xlu1 %1189  ;;  %v7287_v62 = vld [vmem:[#allocation22_spill] sm:$0xff] }
 0x1fd   : > { %vm5472_vm2 = vmor %vm7257_vm1, %vm7256_vm11  ;;  %v2122_v10 = vpack.c.bf16 %v2066_v26, %v2064_v59  ;;  %v2065_v11 = vsel %vm5437_vm15, 1.0, %v3445_v27  ;;  %vm7263_vm11 = vcmp.eq.s32.totalorder %v3535_v2, %v7249_v61  ;;  %vm7266_vm1 = vnez %v7217_v1  ;;  %v3367_v26 = vld [vmem:[%s6716_s2 + $0x10] sm:$0xff]  }
 0x1fe   : > { %v7259_v38 = vsel %vm5472_vm2, 4294967295, %v7258_v38  ;;  %vm5479_vm0 = vmor %vm442_vm5, %vm7260_vm9  ;;  %vm1047_vm2 = vcmp.eq.s32.totalorder %v3535_v2, %v963_v46  ;;  %v2070_v45 = vsel %vm5456_vm3, 1.0, %v3445_v27  ;;  %vm1048_vm14 = vcmp.eq.s32.totalorder %v4133_v42, %v963_v46  ;;  %3099 = vmatprep.subr.bf16.mxu1 %v3367_v26  ;;  %v7320_v1 = vld [vmem:[#allocation67_spill] sm:$0xff] }
 0x1ff   : > { %vm5495_vm5 = vmor %vm5427_vm7, %vm7263_vm11  ;;  %2331 = vmatprep.mubr.bf16.mxu0 %v2122_v10  ;;  %v2121_v30 = vpack.c.bf16 %v2065_v11, %v2063_v22  ;;  %vm1050_vm3 = vcmp.eq.s32.totalorder %v4133_v42, %v966_v0  ;;  %v2124_v57 = vpack.c.bf16 %v2070_v45, %v2068_v33  ;;  %vm1271_vm12 = vcmp.eq.s32.totalorder %v3535_v2, %v7271_v29  ;;  %v7286_v11 = vld [vmem:[#allocation46_spill] sm:$0xff]  ;;  %v7318_v45 = vld [vmem:[#allocation24_spill] sm:$0xff] }
 0x200   : > { %vm887_vm9 = vmor %vm7266_vm1, %vm823_vm8  ;;  %vm1049_vm8 = vcmp.eq.s32.totalorder %v3535_v2, %v966_v0  ;;  %vm1273_vm6 = vcmp.eq.s32.totalorder %v3535_v2, %v1190_v9  ;;  %v1411_v41 = vpop.permute.xlu1 %1410  ;;  %vm1497_vm1 = vcmp.eq.s32.totalorder %v3535_v2, %v4856_v52  ;;  %3100 = vmatpush3.bf16.msra.mxu1 %v3367_v26 }
 0x201   : > { %vm888_vm15 = vmor %vm5363_vm13, %vm824_vm10  ;;  %3101 = vmatprep.subr.bf16.mxu1 %v3368_v31 }
 0x202   : > { %vm5514_vm7 = vmor %vm5479_vm0, %vm826_vm4  ;;  %2332 = vmatmul.mubr.bf16.gmra.mrb[12].mxu0 %v2121_v30  ;;  %v7293_v30 = vld [vmem:[#allocation8_spill] sm:$0xff] }
 0x203   : > { %vm5522_vm13 = vmor %vm887_vm9, %vm1047_vm2  ;;  %2339 = vmatprep.mubr.bf16.mxu0 %v2124_v57  ;;  %vm1272_vm2 = vcmp.eq.s32.totalorder %v4133_v42, %v7271_v29  ;;  %v7298_v29 = vld [vmem:[#allocation50_spill] sm:$0xff] }
 0x204   : > { %vm5529_vm0 = vmor %vm888_vm15, %vm1048_vm14  ;;  %vm1274_vm14 = vcmp.eq.s32.totalorder %v4133_v42, %v1190_v9  ;;  %v1635_v32 = vpop.permute.xlu1 %1634  ;;  %3102 = vmatpush3.bf16.msra.mxu1 %v3368_v31  ;;  %v7288_v9 = vld [vmem:[#allocation23_spill] sm:$0xff] }
 0x205   : > { %vm1113_vm10 = vmor %vm5495_vm5, %vm1049_vm8  ;;  %vm7276_vm5 = vnez %v7251_v53  ;;  %vm7279_vm8 = vnez %v7259_v38  ;;  %v7285_v38 = vld [vmem:[#allocation9_spill] sm:$0xff]  ;;  %3103 = vmatprep.subr.bf16.mxu1 %v3369_v54 }
 0x206   : > { %vm1114_vm4 = vmor %vm5514_vm7, %vm1050_vm3  ;;  %v2069_v44 = vsel %vm7276_vm5, 1.0, %v3445_v27  ;;  %vm1495_vm7 = vcmp.eq.s32.totalorder %v3535_v2, %v1411_v41  ;;  %v2067_v15 = vsel %vm7279_vm8, 1.0, %v3445_v27  ;;  %vm1496_vm3 = vcmp.eq.s32.totalorder %v4133_v42, %v1411_v41  ;;  %538 = vperm.xlu1 %3290, %v7285_v38  }
 0x207   : > { %vm5545_vm11 = vmor %vm5522_vm13, %vm1271_vm12  ;;  %v2123_v23 = vpack.c.bf16 %v2069_v44, %v2067_v15  ;;  %vm1719_vm12 = vcmp.eq.s32.totalorder %v3535_v2, %v1635_v32  ;;  %v7303_v44 = vld [vmem:[#allocation59_spill] sm:$0xff] }
 0x208   : > { %vm1337_vm9 = vmor %vm1113_vm10, %vm1273_vm6  ;;  %vm1720_vm6 = vcmp.eq.s32.totalorder %v4133_v42, %v1635_v32  ;;  %v1638_v39 = vpop.permute.xlu1 %1637  ;;  %3104 = vmatpush3.bf16.msra.mxu1 %v3369_v54  ;;  %v7313_v54 = vld [vmem:[#allocation25_spill] sm:$0xff] }
 0x209   : > { %vm5556_vm15 = vmor %vm5529_vm0, %vm1272_vm2  ;;  %vm1498_vm2 = vcmp.eq.s32.totalorder %v4133_v42, %v4856_v52  ;;  %3105 = vmatprep.subr.bf16.mxu1 %v3370_v40 }
 0x20a   : > { %vm5564_vm13 = vmor %vm1114_vm4, %vm1274_vm14  ;;  %2340 = vmatmul.mubr.bf16.gmra.mrb[16].mxu0 %v2123_v23  ;;  %vm1943_vm14 = vcmp.eq.s32.totalorder %v3535_v2, %v1859_v56  ;;  %3291 = vset.pattern.permute.xlu1 %v6860_v12  ;;  %v7308_v23 = vld [vmem:[#allocation66_spill] sm:$0xff] }
 0x20b   : > { %vm5572_vm0 = vmor %vm1337_vm9, %vm1497_vm1  ;;  %vm1944_vm1 = vcmp.eq.s32.totalorder %v4133_v42, %v1859_v56  ;;  %762 = vperm.xlu1 %3291, %v7285_v38  }
 0x20c   : > { %v7283_v50 = vsel %vm5572_vm0, 4294967295, %v7282_v50  ;;  %vm1559_vm10 = vmor %vm5545_vm11, %vm1495_vm7  ;;  %vm1721_vm7 = vcmp.eq.s32.totalorder %v3535_v2, %v1638_v39  ;;  %vm1722_vm0 = vcmp.eq.s32.totalorder %v4133_v42, %v1638_v39  ;;  %v1862_v52 = vpop.permute.xlu1 %1861  ;;  %3106 = vmatpush3.bf16.msra.mxu1 %v3370_v40  ;;  %v1868_v39 = vpop.permute.xlu0 %1867 }
 0x20d   : > { %vm1560_vm4 = vmor %vm5556_vm15, %vm1496_vm3  ;;  %vm7284_vm3 = vnez %v7283_v50  ;;  %v3371_v50 = vld [vmem:[%s6716_s2 + $0x30] sm:$0xff]  }
 0x20e   : > { %vm1783_vm5 = vmor %vm1559_vm10, %vm1719_vm12  ;;  %3107 = vmatprep.subr.bf16.mxu1 %v3371_v50 }
 0x20f   : > { %vm1784_vm9 = vmor %vm1560_vm4, %vm1720_vm6  ;;  %vm1945_vm6 = vcmp.eq.s32.totalorder %v3535_v2, %v1862_v52  ;;  %vm1946_vm4 = vcmp.eq.s32.totalorder %v4133_v42, %v1862_v52  ;;  %765 = vperm.xlu1 %3291, %v7293_v30  }
 0x210   : > { %vm1562_vm11 = vmor %vm5564_vm13, %vm1498_vm2  ;;  %v521_v53 = vpop.permute.xlu1 %520  ;;  %3108 = vmatpush3.bf16.msra.mxu1 %v3371_v50 }
 0x211   : > { %vm2007_vm8 = vmor %vm1783_vm5, %vm1943_vm14  ;;  %vm606_vm14 = vcmp.eq.s32.totalorder %v4133_v42, %v7286_v11  ;;  %vm445_vm5 = vcmp.eq.s32.totalorder %v3535_v2, %v7287_v62 }
 0x212   : > { %vm2008_vm15 = vmor %vm1784_vm9, %vm1944_vm1  ;;  %v2071_v20 = vsel %vm2007_vm8, 1.0, %v3445_v27  ;;  %vm443_vm1 = vcmp.eq.s32.totalorder %v3535_v2, %v7288_v9  ;;  %vm603_vm9 = vcmp.eq.s32.totalorder %v3535_v2, %v521_v53 }
 0x213   : > { %vm1785_vm12 = vmor %vm7284_vm3, %vm1721_vm7  ;;  %v2072_v48 = vsel %vm2008_vm15, 1.0, %v3445_v27  ;;  %vm444_vm7 = vcmp.eq.s32.totalorder %v4133_v42, %v7288_v9  ;;  %vm604_vm15 = vcmp.eq.s32.totalorder %v4133_v42, %v521_v53  ;;  %3292 = vset.pattern.permute.xlu1 %v6862_v4  ;;  %v7316_v9 = vmov 0 }
 0x214   : > { %vm1786_vm10 = vmor %vm1562_vm11, %vm1722_vm0  ;;  %v745_v59 = vpop.permute.xlu1 %744  ;;  %vm605_vm0 = vcmp.eq.s32.totalorder %v3535_v2, %v7286_v11  ;;  %vm446_vm11 = vcmp.eq.s32.totalorder %v4133_v42, %v7287_v62  ;;  %989 = vperm.xlu1 %3292, %v7293_v30  }
 0x215   : > { %vm2009_vm13 = vmor %vm1785_vm12, %vm1945_vm6  ;;  %vm827_vm12 = vcmp.eq.s32.totalorder %v3535_v2, %v745_v59  ;;  %vm828_vm6 = vcmp.eq.s32.totalorder %v4133_v42, %v745_v59  ;;  %v7311_v59 = vld [vmem:[#allocation11_spill] sm:$0xff] }
 0x216   : > { %vm2010_vm2 = vmor %vm1786_vm10, %vm1946_vm4  ;;  %v2073_v25 = vsel %vm2009_vm13, 1.0, %v3445_v27 }
 0x217   : > { %v2074_v0 = vsel %vm2010_vm2, 1.0, %v3445_v27  ;;  %v2125_v61 = vpack.c.bf16 %v2073_v25, %v2071_v20  ;;  %vm5634_vm8 = vmor %vm445_vm5, %vm605_vm0  ;;  %v3372_v20 = vld [vmem:[%s6716_s2 + $0x38] sm:$0xff]  }
 0x218   : > { %v2126_v8 = vpack.c.bf16 %v2074_v0, %v2072_v48  ;;  %v748_v10 = vpop.permute.xlu1 %747  ;;  %vm5639_vm3 = vmor %vm446_vm11, %vm606_vm14  ;;  %vm1051_vm11 = vcmp.eq.s32.totalorder %v3535_v2, %v7298_v29  ;;  %3293 = vset.pattern.permute.xlu1 %v6863_v60  ;;  %3109 = vmatprep.subr.bf16.mxu1 %v3372_v20 }
 0x219   : > { %vm667_vm10 = vmor %vm443_vm1, %vm603_vm9  ;;  %vm829_vm13 = vcmp.eq.s32.totalorder %v3535_v2, %v748_v10  ;;  %vm830_vm0 = vcmp.eq.s32.totalorder %v4133_v42, %v748_v10  ;;  %1210 = vperm.xlu1 %3293, %v7285_v38   ;;  %3110 = vmatpush3.bf16.msra.mxu1 %v3372_v20  ;;  %v7312_v10 = vld [vmem:[#allocation10_spill] sm:$0xff]  ;;  %v7323_v20 = vld [vmem:[#allocation13_spill] sm:$0xff] }
 0x21a   : > { %2347 = vmatprep.mubr.bf16.mxu0 %v2126_v8  ;;  %vm668_vm4 = vmor %vm444_vm7, %vm604_vm15  ;;  %vm1052_vm15 = vcmp.eq.s32.totalorder %v4133_v42, %v7298_v29 }
 0x21b   : > { %2348 = vmatmul.mubr.bf16.gmra.mrb[20].mxu0 %v2125_v61  ;;  %vm5647_vm2 = vmor %vm667_vm10, %vm827_vm12 }
 0x21c   : > { %v972_v22 = vpop.permute.xlu1 %971  ;;  %vm5652_vm14 = vmor %vm668_vm4, %vm828_vm6 }
 0x21d   : > { %vm1053_vm5 = vcmp.eq.s32.totalorder %v3535_v2, %v972_v22  ;;  %vm893_vm1 = vmor %vm5634_vm8, %vm829_vm13  ;;  %vm1054_vm9 = vcmp.eq.s32.totalorder %v4133_v42, %v972_v22  ;;  %3294 = vset.pattern.permute.xlu1 %v6864_v49  ;;  %v5789_v22 = vpop.permute.xlu0 %1876 }
 0x21e   : > { %vm894_vm7 = vmor %vm5639_vm3, %vm830_vm0  ;;  %1434 = vperm.xlu1 %3294, %v7285_v38  }
 0x21f   : > { %vm5668_vm12 = vmor %vm893_vm1, %vm1053_vm5  ;;  %vm1277_vm1 = vcmp.eq.s32.totalorder %v3535_v2, %v7303_v44 }
 0x220   : > { %v1193_v57 = vpop.permute.xlu1 %1192  ;;  %vm5672_vm10 = vmor %vm894_vm7, %vm1054_vm9 }
 0x221   : > { %vm1275_vm8 = vcmp.eq.s32.totalorder %v3535_v2, %v1193_v57  ;;  %vm1115_vm6 = vmor %vm5647_vm2, %vm1051_vm11  ;;  %vm1276_vm4 = vcmp.eq.s32.totalorder %v4133_v42, %v1193_v57  ;;  %vm1278_vm2 = vcmp.eq.s32.totalorder %v4133_v42, %v7303_v44  ;;  %v5799_v33 = vpop.permute.xlu0 %1885 }
 0x222   : > { %vm1116_vm3 = vmor %vm5652_vm14, %vm1052_vm15  ;;  %1437 = vperm.xlu1 %3294, %v7293_v30  }
 0x223   : > { %vm1339_vm0 = vmor %vm1115_vm6, %vm1275_vm8  ;;  %vm1723_vm6 = vcmp.eq.s32.totalorder %v3535_v2, %v7308_v23 }
 0x224   : > { %v1417_v14 = vpop.permute.xlu1 %1416  ;;  %vm1340_vm9 = vmor %vm1116_vm3, %vm1276_vm4 }
 0x225   : > { %vm1499_vm13 = vcmp.eq.s32.totalorder %v3535_v2, %v1417_v14  ;;  %vm1500_vm5 = vcmp.eq.s32.totalorder %v4133_v42, %v1417_v14  ;;  %vm1341_vm15 = vmor %vm5668_vm12, %vm1277_vm1  ;;  %vm1724_vm12 = vcmp.eq.s32.totalorder %v4133_v42, %v7308_v23  ;;  %vm1949_vm1 = vcmp.eq.s32.totalorder %v3535_v2, %v1868_v39  ;;  %v5811_v29 = vpop.permute.xlu0 %1894 }
 0x226   : > { %vm5690_vm11 = vmor %vm1339_vm0, %vm1499_vm13  ;;  %3295 = vset.pattern.permute.xlu1 %v6868_v7 }
 0x227   : > { %vm5697_vm14 = vmor %vm1340_vm9, %vm1500_vm5  ;;  %1661 = vperm.xlu1 %3295, %v7293_v30  }
 0x228   : > { %v1420_v15 = vpop.permute.xlu1 %1419  ;;  %vm1342_vm4 = vmor %vm5672_vm10, %vm1278_vm2  ;;  %vm1950_vm2 = vcmp.eq.s32.totalorder %v4133_v42, %v1868_v39  ;;  %v7322_v39 = vld [vmem:[#allocation12_spill] sm:$0xff] }
 0x229   : > { %vm1501_vm7 = vcmp.eq.s32.totalorder %v3535_v2, %v1420_v15  ;;  %vm1502_vm8 = vcmp.eq.s32.totalorder %v4133_v42, %v1420_v15  ;;  %vm5721_vm10 = vmor %vm5690_vm11, %vm1723_vm6  ;;  %v5824_v44 = vpop.permute.xlu0 %1903 }
 0x22a   : > { %vm1565_vm3 = vmor %vm1341_vm15, %vm1501_vm7 }
 0x22b   : > { %vm1566_vm13 = vmor %vm1342_vm4, %vm1502_vm8  ;;  %3296 = vset.pattern.permute.xlu1 %v6870_v36 }
 0x22c   : > { %v1644_v56 = vpop.permute.xlu1 %1643  ;;  %vm1788_vm15 = vmor %vm5697_vm14, %vm1724_vm12  ;;  %1882 = vperm.xlu1 %3296, %v7285_v38  }
 0x22d   : > { %vm1725_vm0 = vcmp.eq.s32.totalorder %v3535_v2, %v1644_v56  ;;  %vm1726_vm5 = vcmp.eq.s32.totalorder %v4133_v42, %v1644_v56  ;;  %v5829_v50 = vpop.permute.xlu0 %1912 }
 0x22e   : > { %vm1789_vm9 = vmor %vm1565_vm3, %vm1725_vm0  ;;  %vm448_vm0 = vcmp.eq.s32.totalorder %v4133_v42, %v7313_v54 }
 0x22f   : > { %vm1790_vm7 = vmor %vm1566_vm13, %vm1726_vm5  ;;  %vm447_vm13 = vcmp.eq.s32.totalorder %v3535_v2, %v7313_v54 }
 0x230   : > { %vm2013_vm8 = vmor %vm1789_vm9, %vm1949_vm1  ;;  %v1865_v43 = vpop.permute.xlu1 %1864  ;;  %3297 = vset.pattern.permute.xlu1 %v6858_v16  ;;  %vm832_vm9 = vcmp.eq.s32.totalorder %v4133_v42, %v4163_v47 }
 0x231   : > { %vm2014_vm11 = vmor %vm1790_vm7, %vm1950_vm2  ;;  %vm1947_vm6 = vcmp.eq.s32.totalorder %v3535_v2, %v1865_v43  ;;  %vm1948_vm4 = vcmp.eq.s32.totalorder %v4133_v42, %v1865_v43  ;;  %v2077_v35 = vsel %vm2013_vm8, 1.0, %v3445_v27  ;;  %544 = vperm.xlu1 %3297, %v7311_v59   ;;  %v533_v43 = vpop.permute.xlu0 %532 }
 0x232   : > { %vm2011_vm3 = vmor %vm5721_vm10, %vm1947_vm6  ;;  %v2078_v0 = vsel %vm2014_vm11, 1.0, %v3445_v27  ;;  %vm831_vm10 = vcmp.eq.s32.totalorder %v3535_v2, %v4163_v47 }
 0x233   : > { %vm2012_vm14 = vmor %vm1788_vm15, %vm1948_vm4  ;;  %v2075_v25 = vsel %vm2011_vm3, 1.0, %v3445_v27  ;;  %vm1503_vm4 = vcmp.eq.s32.totalorder %v3535_v2, %v4918_v28 }
 0x234   : > { %v2076_v48 = vsel %vm2012_vm14, 1.0, %v3445_v27  ;;  %v2127_v61 = vpack.c.bf16 %v2077_v35, %v2075_v25  ;;  %v527_v53 = vpop.permute.xlu1 %526  ;;  %v7324_v25 = vld [vmem:[#allocation26_spill] sm:$0xff]  ;;  %v7325_v35 = vld [vmem:[#allocation27_spill] sm:$0xff] }
 0x235   : > { %v2128_v8 = vpack.c.bf16 %v2078_v0, %v2076_v48  ;;  %547 = vperm.xlu1 %3297, %v7312_v10   ;;  %vm607_vm12 = vcmp.eq.s32.totalorder %v3535_v2, %v527_v53  ;;  %vm608_vm5 = vcmp.eq.s32.totalorder %v4133_v42, %v527_v53 }
 0x236   : > { %vm671_vm1 = vmor %vm447_vm13, %vm607_vm12  ;;  %vm1504_vm12 = vcmp.eq.s32.totalorder %v4133_v42, %v4918_v28  ;;  %v7319_v28 = vld [vmem:[#allocation52_spill] sm:$0xff] }
 0x237   : > { %2355 = vmatprep.mubr.bf16.mxu0 %v2128_v8  ;;  %vm672_vm2 = vmor %vm448_vm0, %vm608_vm5 }
 0x238   : > { %2356 = vmatmul.mubr.bf16.gmra.mrb[24].mxu0 %v2127_v61  ;;  %v530_v26 = vpop.permute.xlu1 %529  ;;  %vm895_vm15 = vmor %vm671_vm1, %vm831_vm10 }
 0x239   : > { %3298 = vset.pattern.permute.xlu1 %v6860_v12  ;;  %vm896_vm11 = vmor %vm672_vm2, %vm832_vm9  ;;  %vm609_vm10 = vcmp.eq.s32.totalorder %v3535_v2, %v530_v26  ;;  %vm610_vm9 = vcmp.eq.s32.totalorder %v4133_v42, %v530_v26 }
 0x23a   : > { %771 = vperm.xlu1 %3298, %v7312_v10  }
 0x23c   : > { %v754_v31 = vpop.permute.xlu1 %753 }
 0x23e   : > { %3299 = vset.pattern.permute.xlu1 %v6862_v4 }
 0x23f   : > { %992 = vperm.xlu1 %3299, %v7311_v59  }
 0x240   : > { %v975_v38 = vpop.permute.xlu1 %974 }
 0x241   : > { %vm1055_vm7 = vcmp.eq.s32.totalorder %v3535_v2, %v975_v38  ;;  %vm1056_vm8 = vcmp.eq.s32.totalorder %v4133_v42, %v975_v38 }
 0x242   : > { %vm1119_vm6 = vmor %vm895_vm15, %vm1055_vm7  ;;  %vm449_vm7 = vcmp.eq.s32.totalorder %v3535_v2, %v7318_v45  ;;  %vm833_vm15 = vcmp.eq.s32.totalorder %v3535_v2, %v754_v31 }
 0x243   : > { %vm1120_vm3 = vmor %vm896_vm11, %vm1056_vm8  ;;  %3301 = vset.pattern.permute.xlu1 %v6863_v60  ;;  %vm450_vm8 = vcmp.eq.s32.totalorder %v4133_v42, %v7318_v45 }
 0x244   : > { %v1199_v11 = vpop.permute.xlu1 %1198  ;;  %1216 = vperm.xlu1 %3301, %v7311_v59   ;;  %vm673_vm11 = vmor %vm449_vm7, %vm609_vm10 }
 0x245   : > { %vm1279_vm14 = vcmp.eq.s32.totalorder %v3535_v2, %v1199_v11  ;;  %vm1280_vm13 = vcmp.eq.s32.totalorder %v4133_v42, %v1199_v11 }
 0x246   : > { %vm1343_vm0 = vmor %vm1119_vm6, %vm1279_vm14  ;;  %vm834_vm6 = vcmp.eq.s32.totalorder %v4133_v42, %v754_v31 }
 0x247   : > { %vm1344_vm5 = vmor %vm1120_vm3, %vm1280_vm13  ;;  %vm1057_vm3 = vcmp.eq.s32.totalorder %v3535_v2, %v7319_v28  ;;  %vm1058_vm13 = vcmp.eq.s32.totalorder %v4133_v42, %v7319_v28 }
 0x248   : > { %v1202_v47 = vpop.permute.xlu1 %1201  ;;  %vm5770_vm1 = vmor %vm1343_vm0, %vm1503_vm4  ;;  %1219 = vperm.xlu1 %3301, %v7312_v10  }
 0x249   : > { %vm5776_vm2 = vmor %vm1344_vm5, %vm1504_vm12  ;;  %vm1281_vm0 = vcmp.eq.s32.totalorder %v3535_v2, %v1202_v47  ;;  %vm1282_vm10 = vcmp.eq.s32.totalorder %v4133_v42, %v1202_v47 }
 0x24a   : > { %v7317_v9 = vsel %vm5776_vm2, 4294967295, %v7316_v9  ;;  %vm674_vm4 = vmor %vm450_vm8, %vm610_vm9 }
 0x24b   : > { %vm897_vm14 = vmor %vm673_vm11, %vm833_vm15  ;;  %vm1729_vm11 = vcmp.eq.s32.totalorder %v3535_v2, %v7320_v1 }
 0x24c   : > { %v1426_v21 = vpop.permute.xlu1 %1425  ;;  %vm898_vm12 = vmor %vm674_vm4, %vm834_vm6  ;;  %3302 = vset.pattern.permute.xlu1 %v6864_v49  ;;  %vm1730_vm4 = vcmp.eq.s32.totalorder %v4133_v42, %v7320_v1 }
 0x24d   : > { %vm1121_vm5 = vmor %vm897_vm14, %vm1057_vm3  ;;  %vm1505_vm9 = vcmp.eq.s32.totalorder %v3535_v2, %v1426_v21  ;;  %vm1506_vm2 = vcmp.eq.s32.totalorder %v4133_v42, %v1426_v21  ;;  %1443 = vperm.xlu1 %3302, %v7312_v10  }
 0x24e   : > { %vm1122_vm7 = vmor %vm898_vm12, %vm1058_vm13 }
 0x24f   : > { %vm1345_vm8 = vmor %vm1121_vm5, %vm1281_vm0 }
 0x250   : > { %v1647_v30 = vpop.permute.xlu1 %1646  ;;  %vm1346_vm15 = vmor %vm1122_vm7, %vm1282_vm10  ;;  %vm7321_vm7 = vnez %v7317_v9 }
 0x251   : > { %vm1569_vm6 = vmor %vm1345_vm8, %vm1505_vm9  ;;  %vm1727_vm14 = vcmp.eq.s32.totalorder %v3535_v2, %v1647_v30  ;;  %vm1728_vm13 = vcmp.eq.s32.totalorder %v4133_v42, %v1647_v30  ;;  %3303 = vset.pattern.permute.xlu1 %v6868_v7  ;;  %v7335_v30 = vld [vmem:[#allocation28_spill] sm:$0xff] }
 0x252   : > { %vm1570_vm3 = vmor %vm1346_vm15, %vm1506_vm2  ;;  %1664 = vperm.xlu1 %3303, %v7311_v59  }
 0x253   : > { %vm1793_vm12 = vmor %vm1569_vm6, %vm1729_vm11 }
 0x254   : > { %v1871_v57 = vpop.permute.xlu1 %1870  ;;  %vm1794_vm5 = vmor %vm1570_vm3, %vm1730_vm4 }
 0x255   : > { %vm1951_vm0 = vcmp.eq.s32.totalorder %v3535_v2, %v1871_v57  ;;  %vm1791_vm10 = vmor %vm5770_vm1, %vm1727_vm14  ;;  %vm1952_vm2 = vcmp.eq.s32.totalorder %v4133_v42, %v1871_v57 }
 0x256   : > { %vm1792_vm9 = vmor %vm7321_vm7, %vm1728_vm13  ;;  %3304 = vset.pattern.permute.xlu1 %v6870_v36  ;;  %vm453_vm13 = vcmp.eq.s32.totalorder %v3535_v2, %v7324_v25  ;;  %vm612_vm7 = vcmp.eq.s32.totalorder %v4133_v42, %v533_v43 }
 0x257   : > { %vm2015_vm8 = vmor %vm1791_vm10, %vm1951_vm0  ;;  %1888 = vperm.xlu1 %3304, %v7311_v59   ;;  %vm611_vm0 = vcmp.eq.s32.totalorder %v3535_v2, %v533_v43  ;;  %vm452_vm10 = vcmp.eq.s32.totalorder %v4133_v42, %v7325_v35 }
 0x258   : > { %v1874_v24 = vpop.permute.xlu1 %1873  ;;  %vm2016_vm15 = vmor %vm1792_vm9, %vm1952_vm2  ;;  %v2079_v41 = vsel %vm2015_vm8, 1.0, %v3445_v27  ;;  %vm837_vm2 = vcmp.eq.s32.totalorder %v3535_v2, %v4183_v19  ;;  %vm838_vm8 = vcmp.eq.s32.totalorder %v4133_v42, %v4183_v19 }
 0x259   : > { %vm1953_vm11 = vcmp.eq.s32.totalorder %v3535_v2, %v1874_v24  ;;  %vm1954_vm6 = vcmp.eq.s32.totalorder %v4133_v42, %v1874_v24  ;;  %v2080_v46 = vsel %vm2016_vm15, 1.0, %v3445_v27  ;;  %v7338_v24 = vld [vmem:[#allocation29_spill] sm:$0xff] }
 0x25a   : > { %vm2017_vm4 = vmor %vm1793_vm12, %vm1953_vm11  ;;  %vm451_vm12 = vcmp.eq.s32.totalorder %v3535_v2, %v7325_v35 }
 0x25b   : > { %vm2018_vm3 = vmor %vm1794_vm5, %vm1954_vm6  ;;  %v2081_v14 = vsel %vm2017_vm4, 1.0, %v3445_v27  ;;  %1891 = vperm.xlu1 %3304, %v7312_v10   ;;  %vm454_vm5 = vcmp.eq.s32.totalorder %v4133_v42, %v7324_v25 }
 0x25c   : > { %v2082_v15 = vsel %vm2018_vm3, 1.0, %v3445_v27  ;;  %v2129_v40 = vpack.c.bf16 %v2081_v14, %v2079_v41  ;;  %v536_v32 = vpop.permute.xlu1 %535  ;;  %vm675_vm11 = vmor %vm451_vm12, %vm611_vm0  ;;  %vm1509_vm0 = vcmp.eq.s32.totalorder %v3535_v2, %v4995_v13  ;;  %v7341_v14 = vld [vmem:[#allocation14_spill] sm:$0xff] }
 0x25d   : > { %v2130_v23 = vpack.c.bf16 %v2082_v15, %v2080_v46  ;;  %vm613_vm1 = vcmp.eq.s32.totalorder %v3535_v2, %v536_v32  ;;  %vm614_vm14 = vcmp.eq.s32.totalorder %v4133_v42, %v536_v32  ;;  %vm5853_vm4 = vmor %vm452_vm10, %vm612_vm7  ;;  %v7342_v46 = vld [vmem:[#allocation53_spill] sm:$0xff] }
 0x25e   : > { %vm677_vm9 = vmor %vm453_vm13, %vm613_vm1 }
 0x25f   : > { %2363 = vmatprep.mubr.bf16.mxu0 %v2130_v23  ;;  %3305 = vset.pattern.permute.xlu1 %v6858_v16  ;;  %vm678_vm15 = vmor %vm454_vm5, %vm614_vm14 }
 0x260   : > { %2364 = vmatmul.mubr.bf16.gmra.mrb[28].mxu0 %v2129_v40  ;;  %v757_v56 = vpop.permute.xlu1 %756  ;;  %553 = vperm.xlu1 %3305, %v7322_v39   ;;  %vm901_vm3 = vmor %vm677_vm9, %vm837_vm2  ;;  %vm1510_vm9 = vcmp.eq.s32.totalorder %v4133_v42, %v4995_v13  ;;  %v7334_v13 = vld [vmem:[#allocation60_spill] sm:$0xff] }
 0x261   : > { %vm835_vm6 = vcmp.eq.s32.totalorder %v3535_v2, %v757_v56  ;;  %vm902_vm13 = vmor %vm678_vm15, %vm838_vm8  ;;  %vm836_vm15 = vcmp.eq.s32.totalorder %v4133_v42, %v757_v56 }
 0x262   : > { %vm5860_vm14 = vmor %vm675_vm11, %vm835_vm6 }
 0x264   : > { %3306 = vset.pattern.permute.xlu1 %v6860_v12  ;;  %v981_v52 = vpop.permute.xlu1 %980 }
 0x265   : > { %774 = vperm.xlu1 %3306, %v7323_v20   ;;  %vm1059_vm6 = vcmp.eq.s32.totalorder %v3535_v2, %v981_v52 }
 0x268   : > { %v984_v48 = vpop.permute.xlu1 %983 }
 0x269   : > { %3307 = vset.pattern.permute.xlu1 %v6862_v4  ;;  %vm1061_vm1 = vcmp.eq.s32.totalorder %v3535_v2, %v984_v48  ;;  %vm1062_vm5 = vcmp.eq.s32.totalorder %v4133_v42, %v984_v48 }
 0x26a   : > { %998 = vperm.xlu1 %3307, %v7323_v20   ;;  %vm1125_vm12 = vmor %vm901_vm3, %vm1061_vm1  ;;  %vm1060_vm1 = vcmp.eq.s32.totalorder %v4133_v42, %v981_v52 }
 0x26b   : > { %vm1126_vm10 = vmor %vm902_vm13, %vm1062_vm5 }
 0x26c   : > { %v1208_v61 = vpop.permute.xlu1 %1207  ;;  %vm900_vm5 = vmor %vm5853_vm4, %vm836_vm15 }
 0x26d   : > { %vm1285_vm7 = vcmp.eq.s32.totalorder %v3535_v2, %v1208_v61  ;;  %vm1286_vm2 = vcmp.eq.s32.totalorder %v4133_v42, %v1208_v61 }
 0x26e   : > { %1001 = vperm.xlu1 %3307, %v7322_v39   ;;  %vm1349_vm8 = vmor %vm1125_vm12, %vm1285_vm7  ;;  %vm1283_vm12 = vcmp.eq.s32.totalorder %v3535_v2, %v7334_v13 }
 0x26f   : > { %vm1350_vm11 = vmor %vm1126_vm10, %vm1286_vm2  ;;  %vm1284_vm10 = vcmp.eq.s32.totalorder %v4133_v42, %v7334_v13  ;;  %v7354_v13 = vld [vmem:[#allocation69_spill] sm:$0xff] }
 0x270   : > { %vm5873_vm3 = vmor %vm1349_vm8, %vm1509_vm0  ;;  %v1429_v8 = vpop.permute.xlu1 %1428 }
 0x271   : > { %vm5879_vm13 = vmor %vm1350_vm11, %vm1510_vm9  ;;  %vm1507_vm2 = vcmp.eq.s32.totalorder %v3535_v2, %v1429_v8  ;;  %vm1508_vm8 = vcmp.eq.s32.totalorder %v4133_v42, %v1429_v8 }
 0x272   : > { %3308 = vset.pattern.permute.xlu1 %v6863_v60  ;;  %vm1123_vm0 = vmor %vm5860_vm14, %vm1059_vm6 }
 0x273   : > { %1225 = vperm.xlu1 %3308, %v7322_v39   ;;  %vm1124_vm7 = vmor %vm900_vm5, %vm1060_vm1  ;;  %vm1955_vm1 = vcmp.eq.s32.totalorder %v3535_v2, %v5789_v22 }
 0x274   : > { %vm1347_vm9 = vmor %vm1123_vm0, %vm1283_vm12  ;;  %v1653_v59 = vpop.permute.xlu1 %1652  ;;  %vm1956_vm12 = vcmp.eq.s32.totalorder %v4133_v42, %v5789_v22  ;;  %v542_v22 = vpop.permute.xlu0 %541 }
 0x275   : > { %vm1348_vm4 = vmor %vm1124_vm7, %vm1284_vm10  ;;  %vm1731_vm15 = vcmp.eq.s32.totalorder %v3535_v2, %v1653_v59  ;;  %vm1732_vm14 = vcmp.eq.s32.totalorder %v4133_v42, %v1653_v59 }
 0x276   : > { %vm1571_vm11 = vmor %vm1347_vm9, %vm1507_vm2 }
 0x277   : > { %3309 = vset.pattern.permute.xlu1 %v6864_v49  ;;  %vm1572_vm6 = vmor %vm1348_vm4, %vm1508_vm8 }
 0x278   : > { %1446 = vperm.xlu1 %3309, %v7323_v20   ;;  %vm1795_vm5 = vmor %vm1571_vm11, %vm1731_vm15  ;;  %v1656_v31 = vpop.permute.xlu1 %1655 }
 0x279   : > { %vm1796_vm0 = vmor %vm1572_vm6, %vm1732_vm14  ;;  %vm1733_vm10 = vcmp.eq.s32.totalorder %v3535_v2, %v1656_v31  ;;  %vm1734_vm2 = vcmp.eq.s32.totalorder %v4133_v42, %v1656_v31 }
 0x27a   : > { %vm2019_vm7 = vmor %vm1795_vm5, %vm1955_vm1  ;;  %vm457_vm1 = vcmp.eq.s32.totalorder %v3535_v2, %v7335_v30 }
 0x27b   : > { %vm2020_vm9 = vmor %vm1796_vm0, %vm1956_vm12  ;;  %v2083_v54 = vsel %vm2019_vm7, 1.0, %v3445_v27  ;;  %vm458_vm12 = vcmp.eq.s32.totalorder %v4133_v42, %v7335_v30  ;;  %vm455_vm7 = vcmp.eq.s32.totalorder %v3535_v2, %v7338_v24 }
 0x27c   : > { %3310 = vset.pattern.permute.xlu1 %v6868_v7  ;;  %vm1797_vm8 = vmor %vm5873_vm3, %vm1733_vm10  ;;  %v1880_v10 = vpop.permute.xlu1 %1879  ;;  %v2084_v11 = vsel %vm2020_vm9, 1.0, %v3445_v27  ;;  %vm617_vm3 = vcmp.eq.s32.totalorder %v3535_v2, %v542_v22 }
 0x27d   : > { %1670 = vperm.xlu1 %3310, %v7323_v20   ;;  %vm1798_vm4 = vmor %vm5879_vm13, %vm1734_vm2  ;;  %vm1957_vm15 = vcmp.eq.s32.totalorder %v3535_v2, %v1880_v10  ;;  %vm1958_vm11 = vcmp.eq.s32.totalorder %v4133_v42, %v1880_v10  ;;  %vm618_vm13 = vcmp.eq.s32.totalorder %v4133_v42, %v542_v22  ;;  %v7347_v20 = vld [vmem:[#allocation61_spill] sm:$0xff] }
 0x27e   : > { %vm2021_vm14 = vmor %vm1797_vm8, %vm1957_vm15  ;;  %vm456_vm15 = vcmp.eq.s32.totalorder %v4133_v42, %v7338_v24  ;;  %v7359_v24 = vld [vmem:[#allocation16_spill] sm:$0xff] }
 0x27f   : > { %vm2022_vm6 = vmor %vm1798_vm4, %vm1958_vm11  ;;  %v2085_v38 = vsel %vm2021_vm14, 1.0, %v3445_v27  ;;  %vm1063_vm11 = vcmp.eq.s32.totalorder %v3535_v2, %v7342_v46 }
 0x280   : > { %v2086_v47 = vsel %vm2022_vm6, 1.0, %v3445_v27  ;;  %v2131_v62 = vpack.c.bf16 %v2085_v38, %v2083_v54  ;;  %vm5930_vm0 = vmor %vm457_vm1, %vm617_vm3 }
 0x281   : > { %1673 = vperm.xlu1 %3310, %v7322_v39   ;;  %v2132_v45 = vpack.c.bf16 %v2086_v47, %v2084_v11  ;;  %vm5937_vm2 = vmor %vm458_vm12, %vm618_vm13 }
 0x283   : > { %2371 = vmatprep.mubr.bf16.mxu0 %v2132_v45 }
 0x284   : > { %2372 = vmatmul.mubr.bf16.gmra.mrb[32].mxu0 %v2131_v62 }
 0x285   : > { %3311 = vset.pattern.permute.xlu1 %v6870_v36  ;;  %v539_v9 = vpop.permute.xlu1 %538 }
 0x286   : > { %1897 = vperm.xlu1 %3311, %v7322_v39   ;;  %vm615_vm5 = vcmp.eq.s32.totalorder %v3535_v2, %v539_v9  ;;  %vm616_vm9 = vcmp.eq.s32.totalorder %v4133_v42, %v539_v9 }
 0x287   : > { %vm679_vm8 = vmor %vm455_vm7, %vm615_vm5 }
 0x288   : > { %vm680_vm6 = vmor %vm456_vm15, %vm616_vm9  ;;  %vm1064_vm9 = vcmp.eq.s32.totalorder %v4133_v42, %v7342_v46 }
 0x28a   : > { %3312 = vset.pattern.permute.xlu1 %v6858_v16  ;;  %v763_v28 = vpop.permute.xlu1 %762 }
 0x28b   : > { %556 = vperm.xlu1 %3312, %v3672_v55   ;;  %vm839_vm10 = vcmp.eq.s32.totalorder %v3535_v2, %v763_v28  ;;  %vm840_vm4 = vcmp.eq.s32.totalorder %v4133_v42, %v763_v28 }
 0x28c   : > { %vm903_vm14 = vmor %vm679_vm8, %vm839_vm10 }
 0x28d   : > { %vm5949_vm13 = vmor %vm680_vm6, %vm840_vm4  ;;  %vm1289_vm4 = vcmp.eq.s32.totalorder %v3535_v2, %v7347_v20 }
 0x28e   : > { %v766_v21 = vpop.permute.xlu1 %765  ;;  %vm5956_vm12 = vmor %vm903_vm14, %vm1063_vm11  ;;  %vm1290_vm11 = vcmp.eq.s32.totalorder %v4133_v42, %v7347_v20 }
 0x28f   : > { %3313 = vset.pattern.permute.xlu1 %v6860_v12  ;;  %vm841_vm3 = vcmp.eq.s32.totalorder %v3535_v2, %v766_v21  ;;  %vm842_vm1 = vcmp.eq.s32.totalorder %v4133_v42, %v766_v21 }
 0x290   : > { %780 = vperm.xlu1 %3313, %v3672_v55   ;;  %vm905_vm10 = vmor %vm5930_vm0, %vm841_vm3 }
 0x291   : > { %vm906_vm8 = vmor %vm5937_vm2, %vm842_vm1 }
 0x292   : > { %vm5975_vm0 = vmor %vm5949_vm13, %vm1064_vm9 }
 0x293   : > { %v990_v57 = vpop.permute.xlu1 %989 }
 0x294   : > { %783 = vperm.xlu1 %3313, %v7341_v14   ;;  %v2941_v40 = vpop.f32.mrb[0].mxu0  ;;  %vm1065_vm5 = vcmp.eq.s32.totalorder %v3535_v2, %v990_v57  ;;  %vm1066_vm7 = vcmp.eq.s32.totalorder %v4133_v42, %v990_v57 }
 0x295   : > { %v2942_v23 = vpop.f32.mrb[1].mxu0  ;;  %vm1129_vm15 = vmor %vm905_vm10, %vm1065_vm5 }
 0x296   : > { %v2943_v39 = vadd.f32 %v2942_v23, %v2941_v40  ;;  %v2944_v52 = vpop.f32.mrb[2].mxu0  ;;  %vm1130_vm14 = vmor %vm906_vm8, %vm1066_vm7  ;;  %vm1735_vm7 = vcmp.eq.s32.totalorder %v3535_v2, %v7354_v13  ;;  %v7360_v23 = vld [vmem:[#allocation15_spill] sm:$0xff] }
 0x297   : > { %v2945_v43 = vpop.f32.mrb[3].mxu0  ;;  %vm5982_vm3 = vmor %vm1129_vm15, %vm1289_vm4 }
 0x298   : > { %3314 = vset.pattern.permute.xlu1 %v6862_v4  ;;  %v1211_v32 = vpop.permute.xlu1 %1210  ;;  %v2946_v25 = vadd.f32 %v2945_v43, %v2944_v52  ;;  %vm5987_vm5 = vmor %vm1130_vm14, %vm1290_vm11  ;;  %v7362_v52 = vld [vmem:[#allocation76_spill] sm:$0xff] }
 0x299   : > { %1007 = vperm.xlu1 %3314, %v7341_v14   ;;  %vm1287_vm2 = vcmp.eq.s32.totalorder %v3535_v2, %v1211_v32  ;;  %vm1288_vm1 = vcmp.eq.s32.totalorder %v4133_v42, %v1211_v32 }
 0x29a   : > { %v2436_v48 = vpack.c.bf16 %v2946_v25, %v2943_v39  ;;  %vm1351_vm13 = vmor %vm5956_vm12, %vm1287_vm2 }
 0x29b   : > { %vm1352_vm8 = vmor %vm5975_vm0, %vm1288_vm1  ;;  %vm1736_vm0 = vcmp.eq.s32.totalorder %v4133_v42, %v7354_v13 }
 0x29c   : > { %3111 = vmatprep.mubr.bf16.mxu1 %v2436_v48 }
 0x29d   : > { %3315 = vset.pattern.permute.xlu1 %v6863_v60  ;;  %v1435_v35 = vpop.permute.xlu1 %1434 }
 0x29e   : > { %1228 = vperm.xlu1 %3315, %v3672_v55   ;;  %vm1511_vm6 = vcmp.eq.s32.totalorder %v3535_v2, %v1435_v35  ;;  %vm1512_vm10 = vcmp.eq.s32.totalorder %v4133_v42, %v1435_v35 }
 0x29f   : > { %vm1575_vm9 = vmor %vm1351_vm13, %vm1511_vm6  ;;  %vm1961_vm13 = vcmp.eq.s32.totalorder %v3535_v2, %v5799_v33 }
 0x2a0   : > { %vm6001_vm12 = vmor %vm1352_vm8, %vm1512_vm10 }
 0x2a1   : > { %v2947_v61 = vpop.f32.mrb[4].mxu0  ;;  %v1438_v26 = vpop.permute.xlu1 %1437  ;;  %vm6006_vm11 = vmor %vm1575_vm9, %vm1735_vm7 }
 0x2a2   : > { %v2948_v8 = vpop.f32.mrb[5].mxu0  ;;  %3317 = vset.pattern.permute.xlu1 %v6864_v49  ;;  %vm1513_vm4 = vcmp.eq.s32.totalorder %v3535_v2, %v1438_v26  ;;  %vm1514_vm15 = vcmp.eq.s32.totalorder %v4133_v42, %v1438_v26  ;;  %vm1800_vm9 = vmor %vm6001_vm12, %vm1736_vm0 }
 0x2a3   : > { %v2949_v59 = vadd.f32 %v2948_v8, %v2947_v61  ;;  %v2950_v31 = vpop.f32.mrb[6].mxu0  ;;  %1452 = vperm.xlu1 %3317, %v3672_v55   ;;  %vm1577_vm14 = vmor %vm5982_vm3, %vm1513_vm4  ;;  %vm1962_vm3 = vcmp.eq.s32.totalorder %v4133_v42, %v5799_v33 }
 0x2a4   : > { %v2951_v10 = vpop.f32.mrb[7].mxu0  ;;  %vm1578_vm2 = vmor %vm5987_vm5, %vm1514_vm15 }
 0x2a5   : > { %v2952_v54 = vadd.f32 %v2951_v10, %v2950_v31  ;;  %v7367_v31 = vld [vmem:[#allocation30_spill] sm:$0xff] }
 0x2a6   : > { %v1662_v62 = vpop.permute.xlu1 %1661 }
 0x2a7   : > { %v2437_v47 = vpack.c.bf16 %v2952_v54, %v2949_v59  ;;  %vm1737_vm6 = vcmp.eq.s32.totalorder %v3535_v2, %v1662_v62  ;;  %vm1738_vm1 = vcmp.eq.s32.totalorder %v4133_v42, %v1662_v62  ;;  %1455 = vperm.xlu1 %3317, %v7341_v14  }
 0x2a8   : > { %vm1801_vm10 = vmor %vm1577_vm14, %vm1737_vm6 }
 0x2a9   : > { %3112 = vmatmul.mubr.bf16.vlgmr.msra.gmra.mrb[0].mxu1 %v2437_v47  ;;  %vm1802_vm7 = vmor %vm1578_vm2, %vm1738_vm1  ;;  %vm843_vm1 = vcmp.eq.s32.totalorder %v3535_v2, %v7362_v52 }
 0x2aa   : > { %vm2025_vm8 = vmor %vm1801_vm10, %vm1961_vm13  ;;  %vm844_vm10 = vcmp.eq.s32.totalorder %v4133_v42, %v7362_v52 }
 0x2ab   : > { %3318 = vset.pattern.permute.xlu1 %v6868_v7  ;;  %v1883_v9 = vpop.permute.xlu1 %1882  ;;  %vm2026_vm5 = vmor %vm1802_vm7, %vm1962_vm3  ;;  %v2089_v45 = vsel %vm2025_vm8, 1.0, %v3445_v27 }
 0x2ac   : > { %vm1959_vm4 = vcmp.eq.s32.totalorder %v3535_v2, %v1883_v9  ;;  %vm1960_vm15 = vcmp.eq.s32.totalorder %v4133_v42, %v1883_v9  ;;  %1679 = vperm.xlu1 %3318, %v7341_v14   ;;  %v2090_v22 = vsel %vm2026_vm5, 1.0, %v3445_v27  ;;  %v7368_v9 = vld [vmem:[#allocation54_spill] sm:$0xff] }
 0x2ad   : > { %vm2023_vm14 = vmor %vm6006_vm11, %vm1959_vm4 }
 0x2ae   : > { %vm2024_vm6 = vmor %vm1800_vm9, %vm1960_vm15  ;;  %v2087_v33 = vsel %vm2023_vm14, 1.0, %v3445_v27  ;;  %vm1515_vm15 = vcmp.eq.s32.totalorder %v3535_v2, %v5075_v37 }
 0x2af   : > { %v2088_v28 = vsel %vm2024_vm6, 1.0, %v3445_v27  ;;  %v2133_v21 = vpack.c.bf16 %v2089_v45, %v2087_v33  ;;  %v7369_v45 = vld [vmem:[#allocation71_spill] sm:$0xff] }
 0x2b0   : > { %3319 = vset.pattern.permute.xlu1 %v6870_v36  ;;  %v545_v30 = vpop.permute.xlu1 %544  ;;  %v2134_v1 = vpack.c.bf16 %v2090_v22, %v2088_v28 }
 0x2b1   : > { %1900 = vperm.xlu1 %3319, %v3672_v55   ;;  %vm619_vm12 = vcmp.eq.s32.totalorder %v3535_v2, %v545_v30  ;;  %vm620_vm11 = vcmp.eq.s32.totalorder %v4133_v42, %v545_v30  ;;  %v7361_v55 = vld [vmem:[#allocation31_spill] sm:$0xff] }
 0x2b2   : > { %2379 = vmatprep.mubr.bf16.mxu0 %v2134_v1  ;;  %vm459_vm0 = vcmp.eq.s32.totalorder %v3535_v2, %v7361_v55  ;;  %vm460_vm2 = vcmp.eq.s32.totalorder %v4133_v42, %v7361_v55 }
 0x2b3   : > { %2380 = vmatmul.mubr.bf16.gmra.mrb[36].mxu0 %v2133_v21  ;;  %vm683_vm13 = vmor %vm459_vm0, %vm619_vm12 }
 0x2b4   : > { %v6037_v57 = vpop.permute.xlu1 %547  ;;  %vm684_vm3 = vmor %vm460_vm2, %vm620_vm11  ;;  %vm1516_vm11 = vcmp.eq.s32.totalorder %v4133_v42, %v5075_v37 }
 0x2b5   : > { %3320 = vset.pattern.permute.xlu1 %v6858_v16  ;;  %vm907_vm9 = vmor %vm683_vm13, %vm843_vm1  ;;  %vm621_vm1 = vcmp.eq.s32.totalorder %v3535_v2, %v6037_v57 }
 0x2b6   : > { %562 = vperm.xlu1 %3320, %v7359_v24   ;;  %vm908_vm5 = vmor %vm684_vm3, %vm844_vm10  ;;  %vm622_vm10 = vcmp.eq.s32.totalorder %v4133_v42, %v6037_v57 }
 0x2b9   : > { %v772_v40 = vpop.permute.xlu1 %771 }
 0x2ba   : > { %565 = vperm.xlu1 %3320, %v7360_v23  }
 0x2be   : > { %3321 = vset.pattern.permute.xlu1 %v6860_v12  ;;  %v993_v43 = vpop.permute.xlu1 %992 }
 0x2bf   : > { %789 = vperm.xlu1 %3321, %v7360_v23   ;;  %vm1067_vm7 = vcmp.eq.s32.totalorder %v3535_v2, %v993_v43  ;;  %vm1068_vm8 = vcmp.eq.s32.totalorder %v4133_v42, %v993_v43 }
 0x2c0   : > { %vm1131_vm4 = vmor %vm907_vm9, %vm1067_vm7  ;;  %vm461_vm7 = vcmp.eq.s32.totalorder %v3535_v2, %v7367_v31  ;;  %vm845_vm9 = vcmp.eq.s32.totalorder %v3535_v2, %v772_v40 }
 0x2c1   : > { %vm1132_vm14 = vmor %vm908_vm5, %vm1068_vm8  ;;  %vm462_vm8 = vcmp.eq.s32.totalorder %v4133_v42, %v7367_v31 }
 0x2c2   : > { %vm685_vm5 = vmor %vm461_vm7, %vm621_vm1 }
 0x2c3   : > { %3322 = vset.pattern.permute.xlu1 %v6862_v4  ;;  %v1217_v61 = vpop.permute.xlu1 %1216 }
 0x2c4   : > { %vm1291_vm6 = vcmp.eq.s32.totalorder %v3535_v2, %v1217_v61  ;;  %vm1292_vm12 = vcmp.eq.s32.totalorder %v4133_v42, %v1217_v61  ;;  %1010 = vperm.xlu1 %3322, %v7359_v24  }
 0x2c5   : > { %vm1355_vm0 = vmor %vm1131_vm4, %vm1291_vm6  ;;  %vm846_vm4 = vcmp.eq.s32.totalorder %v4133_v42, %v772_v40 }
 0x2c6   : > { %vm1356_vm2 = vmor %vm1132_vm14, %vm1292_vm12  ;;  %vm1069_vm12 = vcmp.eq.s32.totalorder %v3535_v2, %v7368_v9 }
 0x2c7   : > { %v1220_v26 = vpop.permute.xlu1 %1219  ;;  %vm6066_vm13 = vmor %vm1355_vm0, %vm1515_vm15  ;;  %vm1070_vm0 = vcmp.eq.s32.totalorder %v4133_v42, %v7368_v9 }
 0x2c8   : > { %3323 = vset.pattern.permute.xlu1 %v6863_v60  ;;  %vm6073_vm3 = vmor %vm1356_vm2, %vm1516_vm11  ;;  %vm1293_vm11 = vcmp.eq.s32.totalorder %v3535_v2, %v1220_v26  ;;  %vm1294_vm1 = vcmp.eq.s32.totalorder %v4133_v42, %v1220_v26 }
 0x2c9   : > { %1234 = vperm.xlu1 %3323, %v7359_v24   ;;  %vm686_vm15 = vmor %vm462_vm8, %vm622_vm10 }
 0x2ca   : > { %vm909_vm14 = vmor %vm685_vm5, %vm845_vm9 }
 0x2cb   : > { %vm910_vm6 = vmor %vm686_vm15, %vm846_vm4  ;;  %vm1741_vm4 = vcmp.eq.s32.totalorder %v3535_v2, %v7369_v45 }
 0x2cc   : > { %v1444_v47 = vpop.permute.xlu1 %1443  ;;  %vm1133_vm2 = vmor %vm909_vm14, %vm1069_vm12  ;;  %vm1742_vm14 = vcmp.eq.s32.totalorder %v4133_v42, %v7369_v45 }
 0x2cd   : > { %v2953_v41 = vpop.f32.mrb[8].mxu0  ;;  %1237 = vperm.xlu1 %3323, %v7360_v23   ;;  %vm1134_vm10 = vmor %vm910_vm6, %vm1070_vm0  ;;  %vm1517_vm7 = vcmp.eq.s32.totalorder %v3535_v2, %v1444_v47  ;;  %vm1518_vm8 = vcmp.eq.s32.totalorder %v4133_v42, %v1444_v47 }
 0x2ce   : > { %v2954_v14 = vpop.f32.mrb[9].mxu0  ;;  %vm1357_vm9 = vmor %vm1133_vm2, %vm1293_vm11 }
 0x2cf   : > { %v2955_v46 = vadd.f32 %v2954_v14, %v2953_v41  ;;  %v2956_v15 = vpop.f32.mrb[10].mxu0  ;;  %vm1358_vm5 = vmor %vm1134_vm10, %vm1294_vm1 }
 0x2d0   : > { %v2957_v32 = vpop.f32.mrb[11].mxu0  ;;  %vm1581_vm15 = vmor %vm1357_vm9, %vm1517_vm7 }
 0x2d1   : > { %v2958_v56 = vadd.f32 %v2957_v32, %v2956_v15  ;;  %3324 = vset.pattern.permute.xlu1 %v6864_v49  ;;  %v1665_v33 = vpop.permute.xlu1 %1664  ;;  %vm1582_vm12 = vmor %vm1358_vm5, %vm1518_vm8 }
 0x2d2   : > { %1461 = vperm.xlu1 %3324, %v7360_v23   ;;  %vm1739_vm6 = vcmp.eq.s32.totalorder %v3535_v2, %v1665_v33  ;;  %vm1740_vm11 = vcmp.eq.s32.totalorder %v4133_v42, %v1665_v33  ;;  %vm6105_vm0 = vmor %vm1581_vm15, %vm1741_vm4 }
 0x2d3   : > { %v2438_v39 = vpack.c.bf16 %v2958_v56, %v2955_v46  ;;  %vm6111_vm1 = vmor %vm1582_vm12, %vm1742_vm14 }
 0x2d4   : > { %vm1803_vm10 = vmor %vm6066_vm13, %vm1739_vm6 }
 0x2d5   : > { %v2959_v20 = vpop.f32.mrb[12].mxu0  ;;  %3115 = vmatprep.mubr.bf16.mxu1 %v2438_v39  ;;  %vm1804_vm9 = vmor %vm6073_vm3, %vm1740_vm11 }
 0x2d6   : > { %v2960_v25 = vpop.f32.mrb[13].mxu0  ;;  %3325 = vset.pattern.permute.xlu1 %v6868_v7  ;;  %v1889_v22 = vpop.permute.xlu1 %1888 }
 0x2d7   : > { %v2961_v35 = vadd.f32 %v2960_v25, %v2959_v20  ;;  %v2962_v48 = vpop.f32.mrb[14].mxu0  ;;  %vm1963_vm2 = vcmp.eq.s32.totalorder %v3535_v2, %v1889_v22  ;;  %1682 = vperm.xlu1 %3325, %v7359_v24   ;;  %vm1964_vm7 = vcmp.eq.s32.totalorder %v4133_v42, %v1889_v22  ;;  %v7374_v25 = vld [vmem:[#allocation17_spill] sm:$0xff] }
 0x2d8   : > { %v2963_v0 = vpop.f32.mrb[15].mxu0  ;;  %vm2027_vm8 = vmor %vm1803_vm10, %vm1963_vm2  ;;  %vm849_vm10 = vcmp.eq.s32.totalorder %v3535_v2, %v4266_v58 }
 0x2d9   : > { %v2964_v19 = vadd.f32 %v2963_v0, %v2962_v48  ;;  %vm2028_vm5 = vmor %vm1804_vm9, %vm1964_vm7  ;;  %v2091_v32 = vsel %vm2027_vm8, 1.0, %v3445_v27  ;;  %v551_v48 = vpop.permute.xlu0 %550  ;;  %v7375_v0 = vld [vmem:[#allocation32_spill] sm:$0xff]  ;;  %vm850_vm8 = vcmp.eq.s32.totalorder %v4133_v42, %v4266_v58 }
 0x2da   : > { %v1892_v15 = vpop.permute.xlu1 %1891  ;;  %v2092_v55 = vsel %vm2028_vm5, 1.0, %v3445_v27  ;;  %vm465_vm6 = vcmp.eq.s32.totalorder %v3535_v2, %v7375_v0  ;;  %vm466_vm2 = vcmp.eq.s32.totalorder %v4133_v42, %v7375_v0  ;;  %vm624_vm7 = vcmp.eq.s32.totalorder %v4133_v42, %v551_v48 }
 0x2db   : > { %v2439_v53 = vpack.c.bf16 %v2964_v19, %v2961_v35  ;;  %vm1965_vm4 = vcmp.eq.s32.totalorder %v3535_v2, %v1892_v15  ;;  %vm1966_vm15 = vcmp.eq.s32.totalorder %v4133_v42, %v1892_v15  ;;  %3327 = vset.pattern.permute.xlu1 %v6870_v36  ;;  %v7388_v15 = vld [vmem:[#allocation34_spill] sm:$0xff] }
 0x2dc   : > { %vm2029_vm13 = vmor %vm6105_vm0, %vm1965_vm4  ;;  %1906 = vperm.xlu1 %3327, %v7359_v24   ;;  %vm623_vm0 = vcmp.eq.s32.totalorder %v3535_v2, %v551_v48 }
 0x2dd   : > { %v2965_v8 = vpop.f32.mrb[16].mxu0  ;;  %3116 = vmatmul.mubr.bf16.gmra.mrb[4].mxu1 %v2439_v53  ;;  %vm2030_vm3 = vmor %vm6111_vm1, %vm1966_vm15  ;;  %v2093_v56 = vsel %vm2029_vm13, 1.0, %v3445_v27  ;;  %v560_v9 = vpop.permute.xlu0 %559 }
 0x2de   : > { %v2966_v59 = vpop.f32.mrb[17].mxu0  ;;  %v2094_v39 = vsel %vm2030_vm3, 1.0, %v3445_v27  ;;  %v2135_v52 = vpack.c.bf16 %v2093_v56, %v2091_v32  ;;  %v7391_v32 = vld [vmem:[#allocation35_spill] sm:$0xff] }
 0x2df   : > { %v2967_v10 = vadd.f32 %v2966_v59, %v2965_v8  ;;  %v2968_v54 = vpop.f32.mrb[18].mxu0  ;;  %v554_v43 = vpop.permute.xlu1 %553  ;;  %v2136_v20 = vpack.c.bf16 %v2094_v39, %v2092_v55 }
 0x2e0   : > { %v2969_v38 = vpop.f32.mrb[19].mxu0  ;;  %1909 = vperm.xlu1 %3327, %v7360_v23   ;;  %vm625_vm14 = vcmp.eq.s32.totalorder %v3535_v2, %v554_v43  ;;  %vm626_vm12 = vcmp.eq.s32.totalorder %v4133_v42, %v554_v43  ;;  %v7376_v23 = vld [vmem:[#allocation33_spill] sm:$0xff]  ;;  %v7398_v43 = vld [vmem:[#allocation63_spill] sm:$0xff] }
 0x2e1   : > { %v2970_v11 = vadd.f32 %v2969_v38, %v2968_v54  ;;  %2387 = vmatprep.mubr.bf16.mxu0 %v2136_v20  ;;  %vm463_vm11 = vcmp.eq.s32.totalorder %v3535_v2, %v7376_v23  ;;  %vm464_vm1 = vcmp.eq.s32.totalorder %v4133_v42, %v7376_v23  ;;  %vm689_vm9 = vmor %vm465_vm6, %vm625_vm14  ;;  %v7407_v54 = vmov 0 }
 0x2e2   : > { %2388 = vmatmul.mubr.bf16.gmra.mrb[40].mxu0 %v2135_v52  ;;  %vm690_vm5 = vmor %vm466_vm2, %vm626_vm12  ;;  %v7419_v52 = vld [vmem:[#allocation39_spill] sm:$0xff] }
 0x2e3   : > { %v2440_v62 = vpack.c.bf16 %v2970_v11, %v2967_v10  ;;  %vm687_vm4 = vmor %vm463_vm11, %vm623_vm0  ;;  %vm1521_vm0 = vcmp.eq.s32.totalorder %v3535_v2, %v5138_v18 }
 0x2e4   : > { %3328 = vset.pattern.permute.xlu1 %v6858_v16  ;;  %v775_v24 = vpop.permute.xlu1 %774  ;;  %vm6155_vm13 = vmor %vm464_vm1, %vm624_vm7 }
 0x2e5   : > { %3119 = vmatprep.mubr.bf16.mxu1 %v2440_v62  ;;  %571 = vperm.xlu1 %3328, %v7374_v25   ;;  %vm847_vm15 = vcmp.eq.s32.totalorder %v3535_v2, %v775_v24  ;;  %vm913_vm3 = vmor %vm689_vm9, %vm849_vm10  ;;  %vm1522_vm9 = vcmp.eq.s32.totalorder %v4133_v42, %v5138_v18  ;;  %v7385_v18 = vld [vmem:[#allocation62_spill] sm:$0xff] }
 0x2e6   : > { %vm914_vm14 = vmor %vm690_vm5, %vm850_vm8  ;;  %vm848_vm5 = vcmp.eq.s32.totalorder %v4133_v42, %v775_v24 }
 0x2e7   : > { %vm6162_vm12 = vmor %vm687_vm4, %vm847_vm15 }
 0x2e9   : > { %3329 = vset.pattern.permute.xlu1 %v6860_v12  ;;  %v999_v35 = vpop.permute.xlu1 %998 }
 0x2ea   : > { %792 = vperm.xlu1 %3329, %v3692_v63   ;;  %vm1071_vm15 = vcmp.eq.s32.totalorder %v3535_v2, %v999_v35 }
 0x2ed   : > { %v1002_v19 = vpop.permute.xlu1 %1001 }
 0x2ee   : > { %v2971_v28 = vpop.f32.mrb[20].mxu0  ;;  %3331 = vset.pattern.permute.xlu1 %v6862_v4  ;;  %vm1073_vm6 = vcmp.eq.s32.totalorder %v3535_v2, %v1002_v19  ;;  %vm1074_vm2 = vcmp.eq.s32.totalorder %v4133_v42, %v1002_v19 }
 0x2ef   : > { %v2972_v30 = vpop.f32.mrb[21].mxu0  ;;  %1016 = vperm.xlu1 %3331, %v3692_v63   ;;  %vm1137_vm11 = vmor %vm913_vm3, %vm1073_vm6  ;;  %vm1072_vm6 = vcmp.eq.s32.totalorder %v4133_v42, %v999_v35  ;;  %v6449_v35 = vld [vmem:[%s6717_s3] ss:$0 sm:$0xff] }
 0x2f0   : > { %v2973_v57 = vadd.f32 %v2972_v30, %v2971_v28  ;;  %v2974_v41 = vpop.f32.mrb[22].mxu0  ;;  %vm1138_vm1 = vmor %vm914_vm14, %vm1074_vm2 }
 0x2f1   : > { %v2975_v14 = vpop.f32.mrb[23].mxu0  ;;  %vm912_vm2 = vmor %vm6155_vm13, %vm848_vm5 }
 0x2f2   : > { %v2976_v46 = vadd.f32 %v2975_v14, %v2974_v41  ;;  %v1226_v53 = vpop.permute.xlu1 %1225 }
 0x2f3   : > { %vm1297_vm7 = vcmp.eq.s32.totalorder %v3535_v2, %v1226_v53  ;;  %vm1298_vm10 = vcmp.eq.s32.totalorder %v4133_v42, %v1226_v53  ;;  %1019 = vperm.xlu1 %3331, %v7374_v25  }
 0x2f4   : > { %v2441_v40 = vpack.c.bf16 %v2976_v46, %v2973_v57  ;;  %vm1361_vm8 = vmor %vm1137_vm11, %vm1297_vm7  ;;  %v6227_v57 = vpop.permute.xlu0 %568 }
 0x2f5   : > { %vm1362_vm4 = vmor %vm1138_vm1, %vm1298_vm10  ;;  %vm1295_vm1 = vcmp.eq.s32.totalorder %v3535_v2, %v7385_v18  ;;  %vm1296_vm10 = vcmp.eq.s32.totalorder %v4133_v42, %v7385_v18 }
 0x2f6   : > { %3120 = vmatmul.mubr.bf16.gmra.mrb[8].mxu1 %v2441_v40  ;;  %vm6175_vm3 = vmor %vm1361_vm8, %vm1521_vm0 }
 0x2f7   : > { %3332 = vset.pattern.permute.xlu1 %v6863_v60  ;;  %v1447_v26 = vpop.permute.xlu1 %1446  ;;  %vm6181_vm14 = vmor %vm1362_vm4, %vm1522_vm9 }
 0x2f8   : > { %1243 = vperm.xlu1 %3332, %v7374_v25   ;;  %vm1135_vm11 = vmor %vm6162_vm12, %vm1071_vm15  ;;  %vm1519_vm7 = vcmp.eq.s32.totalorder %v3535_v2, %v1447_v26  ;;  %vm1520_vm8 = vcmp.eq.s32.totalorder %v4133_v42, %v1447_v26  ;;  %v6231_v46 = vpop.permute.xlu0 %577 }
 0x2f9   : > { %vm1136_vm0 = vmor %vm912_vm2, %vm1072_vm6  ;;  %vm1967_vm6 = vcmp.eq.s32.totalorder %v3535_v2, %v5811_v29 }
 0x2fa   : > { %vm1359_vm9 = vmor %vm1135_vm11, %vm1295_vm1  ;;  %vm1968_vm11 = vcmp.eq.s32.totalorder %v4133_v42, %v5811_v29 }
 0x2fb   : > { %vm1360_vm13 = vmor %vm1136_vm0, %vm1296_vm10 }
 0x2fc   : > { %3333 = vset.pattern.permute.xlu1 %v6864_v49  ;;  %v1671_v59 = vpop.permute.xlu1 %1670  ;;  %vm1583_vm12 = vmor %vm1359_vm9, %vm1519_vm7 }
 0x2fd   : > { %vm1743_vm5 = vcmp.eq.s32.totalorder %v3535_v2, %v1671_v59  ;;  %1464 = vperm.xlu1 %3333, %v3692_v63   ;;  %vm1744_vm4 = vcmp.eq.s32.totalorder %v4133_v42, %v1671_v59  ;;  %vm1584_vm15 = vmor %vm1360_vm13, %vm1520_vm8 }
 0x2fe   : > { %vm1807_vm2 = vmor %vm1583_vm12, %vm1743_vm5 }
 0x2ff   : > { %vm1808_vm1 = vmor %vm1584_vm15, %vm1744_vm4 }
 0x300   : > { %v1674_v37 = vpop.permute.xlu1 %1673  ;;  %vm6207_vm7 = vmor %vm1807_vm2, %vm1967_vm6  ;;  %vm469_vm6 = vcmp.eq.s32.totalorder %v3535_v2, %v7388_v15 }
 0x301   : > { %3335 = vset.pattern.permute.xlu1 %v6868_v7  ;;  %vm1745_vm0 = vcmp.eq.s32.totalorder %v3535_v2, %v1674_v37  ;;  %vm1746_vm10 = vcmp.eq.s32.totalorder %v4133_v42, %v1674_v37  ;;  %vm2032_vm9 = vmor %vm1808_vm1, %vm1968_vm11  ;;  %v2095_v33 = vsel %vm6207_vm7, 1.0, %v3445_v27  ;;  %vm470_vm11 = vcmp.eq.s32.totalorder %v4133_v42, %v7388_v15 }
 0x302   : > { %1688 = vperm.xlu1 %3335, %v3692_v63   ;;  %vm1809_vm8 = vmor %vm6175_vm3, %vm1745_vm0  ;;  %v2096_v28 = vsel %vm2032_vm9, 1.0, %v3445_v27  ;;  %vm629_vm3 = vcmp.eq.s32.totalorder %v3535_v2, %v560_v9  ;;  %vm467_vm7 = vcmp.eq.s32.totalorder %v3535_v2, %v7391_v32 }
 0x303   : > { %vm1810_vm13 = vmor %vm6181_vm14, %vm1746_vm10  ;;  %vm630_vm14 = vcmp.eq.s32.totalorder %v4133_v42, %v560_v9 }
 0x304   : > { %vm6242_vm1 = vmor %vm469_vm6, %vm629_vm3 }
 0x305   : > { %v1898_v62 = vpop.permute.xlu1 %1897  ;;  %vm6249_vm10 = vmor %vm470_vm11, %vm630_vm14 }
 0x306   : > { %vm1969_vm5 = vcmp.eq.s32.totalorder %v3535_v2, %v1898_v62  ;;  %vm1970_vm12 = vcmp.eq.s32.totalorder %v4133_v42, %v1898_v62  ;;  %1691 = vperm.xlu1 %3335, %v7374_v25   ;;  %v7412_v62 = vld [vmem:[#allocation74_spill] sm:$0xff] }
 0x307   : > { %vm2033_vm4 = vmor %vm1809_vm8, %vm1969_vm5  ;;  %vm468_vm5 = vcmp.eq.s32.totalorder %v4133_v42, %v7391_v32 }
 0x308   : > { %vm2034_vm15 = vmor %vm1810_vm13, %vm1970_vm12  ;;  %v2097_v45 = vsel %vm2033_vm4, 1.0, %v3445_v27 }
 0x309   : > { %v2098_v22 = vsel %vm2034_vm15, 1.0, %v3445_v27  ;;  %v2137_v21 = vpack.c.bf16 %v2097_v45, %v2095_v33 }
 0x30a   : > { %3337 = vset.pattern.permute.xlu1 %v6870_v36  ;;  %v557_v30 = vpop.permute.xlu1 %556  ;;  %v2138_v1 = vpack.c.bf16 %v2098_v22, %v2096_v28 }
 0x30b   : > { %v2977_v31 = vpop.f32.mrb[24].mxu0  ;;  %1915 = vperm.xlu1 %3337, %v7374_v25   ;;  %vm627_vm2 = vcmp.eq.s32.totalorder %v3535_v2, %v557_v30  ;;  %vm628_vm9 = vcmp.eq.s32.totalorder %v4133_v42, %v557_v30  ;;  %v7403_v25 = vld [vmem:[#allocation73_spill] sm:$0xff] }
 0x30c   : > { %v2978_v10 = vpop.f32.mrb[25].mxu0  ;;  %2395 = vmatprep.mubr.bf16.mxu0 %v2138_v1  ;;  %vm691_vm8 = vmor %vm467_vm7, %vm627_vm2 }
 0x30d   : > { %v2979_v38 = vadd.f32 %v2978_v10, %v2977_v31  ;;  %v2980_v11 = vpop.f32.mrb[26].mxu0  ;;  %2396 = vmatmul.mubr.bf16.gmra.mrb[44].mxu0 %v2137_v21  ;;  %vm692_vm15 = vmor %vm468_vm5, %vm628_vm9  ;;  %v7406_v10 = vld [vmem:[#allocation37_spill] sm:$0xff] }
 0x30e   : > { %v2981_v47 = vpop.f32.mrb[27].mxu0 }
 0x30f   : > { %v2982_v29 = vadd.f32 %v2981_v47, %v2980_v11  ;;  %3338 = vset.pattern.permute.xlu1 %v6858_v16  ;;  %v781_v41 = vpop.permute.xlu1 %780  ;;  %v7411_v11 = vld [vmem:[#allocation36_spill] sm:$0xff] }
 0x310   : > { %574 = vperm.xlu1 %3338, %v3702_v6   ;;  %vm851_vm0 = vcmp.eq.s32.totalorder %v3535_v2, %v781_v41  ;;  %vm852_vm13 = vcmp.eq.s32.totalorder %v4133_v42, %v781_v41 }
 0x311   : > { %v2442_v63 = vpack.c.bf16 %v2982_v29, %v2979_v38  ;;  %vm915_vm12 = vmor %vm691_vm8, %vm851_vm0  ;;  %v7409_v38 = vmov 0 }
 0x312   : > { %vm6260_vm14 = vmor %vm692_vm15, %vm852_vm13  ;;  %vm1302_vm15 = vcmp.eq.s32.totalorder %v4133_v42, %v7398_v43 }
 0x313   : > { %3123 = vmatprep.mubr.bf16.mxu1 %v2442_v63  ;;  %v784_v14 = vpop.permute.xlu1 %783 }
 0x314   : > { %3340 = vset.pattern.permute.xlu1 %v6860_v12  ;;  %v1005_v12 = vpop.permute.xlu0 %1004  ;;  %vm853_vm3 = vcmp.eq.s32.totalorder %v3535_v2, %v784_v14  ;;  %vm854_vm6 = vcmp.eq.s32.totalorder %v4133_v42, %v784_v14 }
 0x315   : > { %798 = vperm.xlu1 %3340, %v3702_v6   ;;  %vm1075_vm4 = vcmp.eq.s32.totalorder %v3535_v2, %v1005_v12  ;;  %vm917_vm0 = vmor %vm6242_vm1, %vm853_vm3  ;;  %vm1076_vm9 = vcmp.eq.s32.totalorder %v4133_v42, %v1005_v12 }
 0x316   : > { %vm6266_vm2 = vmor %vm915_vm12, %vm1075_vm4  ;;  %vm1301_vm12 = vcmp.eq.s32.totalorder %v3535_v2, %v7398_v43  ;;  %v7421_v43 = vmov 0 }
 0x317   : > { %vm918_vm8 = vmor %vm6249_vm10, %vm854_vm6 }
 0x318   : > { %v1008_v40 = vpop.permute.xlu1 %1007  ;;  %vm1140_vm4 = vmor %vm6260_vm14, %vm1076_vm9  ;;  %v1014_v47 = vpop.permute.xlu0 %1013 }
 0x319   : > { %801 = vperm.xlu1 %3340, %v3699_v5   ;;  %vm1077_vm11 = vcmp.eq.s32.totalorder %v3535_v2, %v1008_v40  ;;  %vm1078_vm7 = vcmp.eq.s32.totalorder %v4133_v42, %v1008_v40 }
 0x31a   : > { %vm1141_vm13 = vmor %vm917_vm0, %vm1077_vm11 }
 0x31b   : > { %vm1142_vm5 = vmor %vm918_vm8, %vm1078_vm7 }
 0x31c   : > { %vm6288_vm3 = vmor %vm1141_vm13, %vm1301_vm12  ;;  %vm1747_vm13 = vcmp.eq.s32.totalorder %v3535_v2, %v7403_v25 }
 0x31d   : > { %3342 = vset.pattern.permute.xlu1 %v6862_v4  ;;  %v1229_v39 = vpop.permute.xlu1 %1228  ;;  %vm6293_vm11 = vmor %vm1142_vm5, %vm1302_vm15 }
 0x31e   : > { %1025 = vperm.xlu1 %3342, %v3699_v5   ;;  %vm1299_vm1 = vcmp.eq.s32.totalorder %v3535_v2, %v1229_v39  ;;  %vm1300_vm6 = vcmp.eq.s32.totalorder %v4133_v42, %v1229_v39 }
 0x31f   : > { %vm1363_vm14 = vmor %vm6266_vm2, %vm1299_vm1 }
 0x320   : > { %vm1364_vm9 = vmor %vm1140_vm4, %vm1300_vm6  ;;  %vm1973_vm6 = vcmp.eq.s32.totalorder %v3535_v2, %v5824_v44 }
 0x322   : > { %3343 = vset.pattern.permute.xlu1 %v6863_v60  ;;  %v1453_v4 = vpop.permute.xlu1 %1452  ;;  %v6429_v60 = vpop.permute.xlu0 %1022 }
 0x323   : > { %1246 = vperm.xlu1 %3343, %v3702_v6   ;;  %vm1523_vm10 = vcmp.eq.s32.totalorder %v3535_v2, %v1453_v4  ;;  %vm1524_vm0 = vcmp.eq.s32.totalorder %v4133_v42, %v1453_v4  ;;  %v7420_v4 = vld [vmem:[#allocation38_spill] sm:$0xff] }
 0x324   : > { %vm1587_vm7 = vmor %vm1363_vm14, %vm1523_vm10 }
 0x325   : > { %vm1588_vm5 = vmor %vm1364_vm9, %vm1524_vm0  ;;  %vm1748_vm0 = vcmp.eq.s32.totalorder %v4133_v42, %v7403_v25 }
 0x326   : > { %v1456_v24 = vpop.permute.xlu1 %1455  ;;  %vm6306_vm15 = vmor %vm1587_vm7, %vm1747_vm13 }
 0x327   : > { %3344 = vset.pattern.permute.xlu1 %v6864_v49  ;;  %vm1525_vm8 = vcmp.eq.s32.totalorder %v3535_v2, %v1456_v24  ;;  %vm1526_vm12 = vcmp.eq.s32.totalorder %v4133_v42, %v1456_v24  ;;  %vm1812_vm9 = vmor %vm1588_vm5, %vm1748_vm0  ;;  %vm855_vm0 = vcmp.eq.s32.totalorder %v3535_v2, %v4344_v51 }
 0x328   : > { %1470 = vperm.xlu1 %3344, %v3702_v6   ;;  %vm1589_vm2 = vmor %vm6288_vm3, %vm1525_vm8  ;;  %vm1974_vm3 = vcmp.eq.s32.totalorder %v4133_v42, %v5824_v44 }
 0x329   : > { %vm1590_vm4 = vmor %vm6293_vm11, %vm1526_vm12 }
 0x32b   : > { %v1680_v48 = vpop.permute.xlu1 %1679 }
 0x32c   : > { %vm1749_vm1 = vcmp.eq.s32.totalorder %v3535_v2, %v1680_v48  ;;  %vm1750_vm10 = vcmp.eq.s32.totalorder %v4133_v42, %v1680_v48  ;;  %1473 = vperm.xlu1 %3344, %v3699_v5   ;;  %v1241_v48 = vpop.permute.xlu0 %1240 }
 0x32d   : > { %vm1813_vm14 = vmor %vm1589_vm2, %vm1749_vm1  ;;  %vm471_vm1 = vcmp.eq.s32.totalorder %v3535_v2, %v7406_v10 }
 0x32e   : > { %vm1814_vm7 = vmor %vm1590_vm4, %vm1750_vm10  ;;  %vm472_vm10 = vcmp.eq.s32.totalorder %v4133_v42, %v7406_v10 }
 0x32f   : > { %vm2037_vm8 = vmor %vm1813_vm14, %vm1973_vm6 }
 0x330   : > { %3346 = vset.pattern.permute.xlu1 %v6868_v7  ;;  %v1901_v0 = vpop.permute.xlu1 %1900  ;;  %vm2038_vm11 = vmor %vm1814_vm7, %vm1974_vm3  ;;  %v2101_v61 = vsel %vm2037_vm8, 1.0, %v3445_v27  ;;  %vm856_vm7 = vcmp.eq.s32.totalorder %v4133_v42, %v4344_v51 }
 0x331   : > { %vm1971_vm13 = vcmp.eq.s32.totalorder %v3535_v2, %v1901_v0  ;;  %vm1972_vm12 = vcmp.eq.s32.totalorder %v4133_v42, %v1901_v0  ;;  %1697 = vperm.xlu1 %3346, %v3699_v5   ;;  %v2102_v53 = vsel %vm2038_vm11, 1.0, %v3445_v27  ;;  %v7444_v0 = vmov 0 }
 0x332   : > { %vm2035_vm2 = vmor %vm6306_vm15, %vm1971_vm13 }
 0x333   : > { %v2983_v49 = vpop.f32.mrb[28].mxu0  ;;  %vm2036_vm5 = vmor %vm1812_vm9, %vm1972_vm12  ;;  %v2099_v58 = vsel %vm2035_vm2, 1.0, %v3445_v27 }
 0x334   : > { %v2984_v23 = vpop.f32.mrb[29].mxu0  ;;  %v2100_v8 = vsel %vm2036_vm5, 1.0, %v3445_v27  ;;  %v2139_v13 = vpack.c.bf16 %v2101_v61, %v2099_v58 }
 0x335   : > { %v2985_v19 = vadd.f32 %v2984_v23, %v2983_v49  ;;  %v2986_v44 = vpop.f32.mrb[30].mxu0  ;;  %3347 = vset.pattern.permute.xlu1 %v6870_v36  ;;  %v563_v5 = vpop.permute.xlu1 %562  ;;  %v2140_v18 = vpack.c.bf16 %v2102_v53, %v2100_v8 }
 0x336   : > { %v2987_v7 = vpop.f32.mrb[31].mxu0  ;;  %1918 = vperm.xlu1 %3347, %v3702_v6   ;;  %vm631_vm15 = vcmp.eq.s32.totalorder %v3535_v2, %v563_v5  ;;  %vm632_vm4 = vcmp.eq.s32.totalorder %v4133_v42, %v563_v5 }
 0x337   : > { %v2988_v26 = vadd.f32 %v2987_v7, %v2986_v44  ;;  %2403 = vmatprep.mubr.bf16.mxu0 %v2140_v18  ;;  %vm695_vm6 = vmor %vm471_vm1, %vm631_vm15 }
 0x338   : > { %2404 = vmatmul.mubr.bf16.gmra.mrb[48].mxu0 %v2139_v13  ;;  %vm696_vm14 = vmor %vm472_vm10, %vm632_vm4  ;;  %vm1527_vm4 = vcmp.eq.s32.totalorder %v3535_v2, %v5190_v17  ;;  %vm1528_vm10 = vcmp.eq.s32.totalorder %v4133_v42, %v5190_v17 }
 0x339   : > { %v2443_v59 = vpack.c.bf16 %v2988_v26, %v2985_v19  ;;  %v566_v37 = vpop.permute.xlu1 %565  ;;  %vm919_vm9 = vmor %vm695_vm6, %vm855_vm0 }
 0x33a   : > { %vm920_vm11 = vmor %vm696_vm14, %vm856_vm7  ;;  %vm633_vm6 = vcmp.eq.s32.totalorder %v3535_v2, %v566_v37  ;;  %vm634_vm14 = vcmp.eq.s32.totalorder %v4133_v42, %v566_v37  ;;  %vm473_vm7 = vcmp.eq.s32.totalorder %v3535_v2, %v7411_v11 }
 0x33b   : > { %3124 = vmatmul.mubr.bf16.gmra.mrb[12].mxu1 %v2443_v59 }
 0x33e   : > { %v790_v31 = vpop.permute.xlu1 %789 }
 0x343   : > { %v1011_v36 = vpop.permute.xlu1 %1010 }
 0x344   : > { %vm1079_vm3 = vcmp.eq.s32.totalorder %v3535_v2, %v1011_v36  ;;  %vm1080_vm8 = vcmp.eq.s32.totalorder %v4133_v42, %v1011_v36 }
 0x345   : > { %vm1143_vm13 = vmor %vm919_vm9, %vm1079_vm3  ;;  %vm857_vm9 = vcmp.eq.s32.totalorder %v3535_v2, %v790_v31 }
 0x346   : > { %vm1144_vm12 = vmor %vm920_vm11, %vm1080_vm8  ;;  %vm474_vm8 = vcmp.eq.s32.totalorder %v4133_v42, %v7411_v11 }
 0x347   : > { %vm697_vm11 = vmor %vm473_vm7, %vm633_vm6 }
 0x348   : > { %v1235_v6 = vpop.permute.xlu1 %1234 }
 0x349   : > { %vm1303_vm2 = vcmp.eq.s32.totalorder %v3535_v2, %v1235_v6  ;;  %vm1304_vm5 = vcmp.eq.s32.totalorder %v4133_v42, %v1235_v6 }
 0x34a   : > { %vm1367_vm15 = vmor %vm1143_vm13, %vm1303_vm2  ;;  %vm858_vm13 = vcmp.eq.s32.totalorder %v4133_v42, %v790_v31 }
 0x34b   : > { %vm1368_vm1 = vmor %vm1144_vm12, %vm1304_vm5  ;;  %vm1081_vm5 = vcmp.eq.s32.totalorder %v3535_v2, %v1014_v47 }
 0x34c   : > { %v1238_v51 = vpop.permute.xlu1 %1237  ;;  %vm6354_vm0 = vmor %vm1367_vm15, %vm1527_vm4  ;;  %vm1082_vm4 = vcmp.eq.s32.totalorder %v4133_v42, %v1014_v47 }
 0x34d   : > { %v7408_v54 = vsel %vm6354_vm0, 4294967295, %v7407_v54  ;;  %vm6359_vm3 = vmor %vm1368_vm1, %vm1528_vm10  ;;  %vm1305_vm1 = vcmp.eq.s32.totalorder %v3535_v2, %v1238_v51 }
 0x34e   : > { %v7410_v38 = vsel %vm6359_vm3, 4294967295, %v7409_v38  ;;  %vm698_vm12 = vmor %vm474_vm8, %vm634_vm14  ;;  %vm1306_vm3 = vcmp.eq.s32.totalorder %v4133_v42, %v1238_v51 }
 0x34f   : > { %vm921_vm2 = vmor %vm697_vm11, %vm857_vm9 }
 0x350   : > { %vm922_vm15 = vmor %vm698_vm12, %vm858_vm13  ;;  %vm1753_vm13 = vcmp.eq.s32.totalorder %v3535_v2, %v7412_v62 }
 0x351   : > { %v1462_v17 = vpop.permute.xlu1 %1461  ;;  %vm1145_vm10 = vmor %vm921_vm2, %vm1081_vm5  ;;  %vm1754_vm2 = vcmp.eq.s32.totalorder %v4133_v42, %v7412_v62 }
 0x352   : > { %vm1146_vm0 = vmor %vm922_vm15, %vm1082_vm4  ;;  %vm1529_vm6 = vcmp.eq.s32.totalorder %v3535_v2, %v1462_v17  ;;  %vm1530_vm8 = vcmp.eq.s32.totalorder %v4133_v42, %v1462_v17  ;;  %vm7417_vm4 = vnez %v7408_v54 }
 0x353   : > { %vm1369_vm7 = vmor %vm1145_vm10, %vm1305_vm1 }
 0x354   : > { %vm1370_vm14 = vmor %vm1146_vm0, %vm1306_vm3 }
 0x355   : > { %vm1593_vm9 = vmor %vm1369_vm7, %vm1529_vm6  ;;  %vm7418_vm6 = vnez %v7410_v38 }
 0x356   : > { %v1683_v29 = vpop.permute.xlu1 %1682  ;;  %vm1594_vm11 = vmor %vm1370_vm14, %vm1530_vm8 }
 0x357   : > { %vm1751_vm12 = vcmp.eq.s32.totalorder %v3535_v2, %v1683_v29  ;;  %vm1752_vm5 = vcmp.eq.s32.totalorder %v4133_v42, %v1683_v29  ;;  %v2989_v63 = vpop.f32.mrb[32].mxu0  ;;  %vm6381_vm15 = vmor %vm1593_vm9, %vm1753_vm13 }
 0x358   : > { %v2990_v45 = vpop.f32.mrb[33].mxu0  ;;  %vm6386_vm3 = vmor %vm1594_vm11, %vm1754_vm2  ;;  %vm475_vm2 = vcmp.eq.s32.totalorder %v3535_v2, %v7419_v52 }
 0x359   : > { %vm1815_vm1 = vmor %vm7417_vm4, %vm1751_vm12  ;;  %v2991_v22 = vadd.f32 %v2990_v45, %v2989_v63  ;;  %v2992_v21 = vpop.f32.mrb[34].mxu0  ;;  %vm476_vm4 = vcmp.eq.s32.totalorder %v4133_v42, %v7419_v52 }
 0x35a   : > { %vm1816_vm7 = vmor %vm7418_vm6, %vm1752_vm5  ;;  %v2993_v30 = vpop.f32.mrb[35].mxu0  ;;  %vm635_vm5 = vcmp.eq.s32.totalorder %v3535_v2, %v6227_v57  ;;  %vm478_vm6 = vcmp.eq.s32.totalorder %v4133_v42, %v7420_v4 }
 0x35b   : > { %v1907_v9 = vpop.permute.xlu1 %1906  ;;  %v2994_v1 = vadd.f32 %v2993_v30, %v2992_v21 }
 0x35c   : > { %vm1975_vm0 = vcmp.eq.s32.totalorder %v3535_v2, %v1907_v9  ;;  %vm1976_vm10 = vcmp.eq.s32.totalorder %v4133_v42, %v1907_v9 }
 0x35d   : > { %vm2039_vm8 = vmor %vm1815_vm1, %vm1975_vm0  ;;  %v2444_v14 = vpack.c.bf16 %v2994_v1, %v2991_v22  ;;  %vm636_vm1 = vcmp.eq.s32.totalorder %v4133_v42, %v6227_v57 }
 0x35e   : > { %vm2040_vm14 = vmor %vm1816_vm7, %vm1976_vm10  ;;  %v2103_v15 = vsel %vm2039_vm8, 1.0, %v3445_v27 }
 0x35f   : > { %v1910_v41 = vpop.permute.xlu1 %1909  ;;  %v2104_v12 = vsel %vm2040_vm14, 1.0, %v3445_v27  ;;  %3127 = vmatprep.mubr.bf16.mxu1 %v2444_v14  ;;  %vm6417_vm10 = vmor %vm475_vm2, %vm635_vm5  ;;  %vm861_vm14 = vcmp.eq.s32.totalorder %v3535_v2, %v4454_v3 }
 0x360   : > { %vm1977_vm9 = vcmp.eq.s32.totalorder %v3535_v2, %v1910_v41  ;;  %vm1978_vm11 = vcmp.eq.s32.totalorder %v4133_v42, %v1910_v41  ;;  %v7422_v43 = vsel %vm6417_vm10, 4294967295, %v7421_v43 }
 0x361   : > { %vm2041_vm13 = vmor %vm6381_vm15, %vm1977_vm9 }
 0x362   : > { %vm2042_vm12 = vmor %vm6386_vm3, %vm1978_vm11  ;;  %v2105_v16 = vsel %vm2041_vm13, 1.0, %v3445_v27  ;;  %vm477_vm3 = vcmp.eq.s32.totalorder %v3535_v2, %v7420_v4  ;;  %vm862_vm13 = vcmp.eq.s32.totalorder %v4133_v42, %v4454_v3 }
 0x363   : > { %v2106_v40 = vsel %vm2042_vm12, 1.0, %v3445_v27  ;;  %v2141_v32 = vpack.c.bf16 %v2105_v16, %v2103_v15  ;;  %vm700_vm9 = vmor %vm476_vm4, %vm636_vm1  ;;  %v7436_v15 = vld [vmem:[#allocation40_spill] sm:$0xff] }
 0x364   : > { %v572_v56 = vpop.permute.xlu1 %571  ;;  %v2142_v55 = vpack.c.bf16 %v2106_v40, %v2104_v12 }
 0x365   : > { %vm637_vm15 = vcmp.eq.s32.totalorder %v3535_v2, %v572_v56  ;;  %vm638_vm0 = vcmp.eq.s32.totalorder %v4133_v42, %v572_v56 }
 0x366   : > { %2411 = vmatprep.mubr.bf16.mxu0 %v2142_v55  ;;  %vm701_vm7 = vmor %vm477_vm3, %vm637_vm15  ;;  %vm7423_vm15 = vnez %v7422_v43  ;;  %v7439_v55 = vld [vmem:[#allocation41_spill] sm:$0xff] }
 0x367   : > { %2412 = vmatmul.mubr.bf16.gmra.mrb[52].mxu0 %v2141_v32  ;;  %vm702_vm8 = vmor %vm478_vm6, %vm638_vm0 }
 0x368   : > { %vm925_vm2 = vmor %vm701_vm7, %vm861_vm14 }
 0x369   : > { %v793_v39 = vpop.permute.xlu1 %792  ;;  %vm926_vm10 = vmor %vm702_vm8, %vm862_vm13 }
 0x36a   : > { %vm859_vm11 = vcmp.eq.s32.totalorder %v3535_v2, %v793_v39  ;;  %vm860_vm12 = vcmp.eq.s32.totalorder %v4133_v42, %v793_v39 }
 0x36b   : > { %vm923_vm0 = vmor %vm7423_vm15, %vm859_vm11  ;;  %vm1533_vm11 = vcmp.eq.s32.totalorder %v3535_v2, %v5261_v34  ;;  %vm1307_vm15 = vcmp.eq.s32.totalorder %v3535_v2, %v1241_v48 }
 0x36c   : > { %vm6435_vm4 = vmor %vm700_vm9, %vm860_vm12 }
 0x36e   : > { %v1017_v20 = vpop.permute.xlu1 %1016 }
 0x36f   : > { %vm1083_vm5 = vcmp.eq.s32.totalorder %v3535_v2, %v1017_v20  ;;  %vm1084_vm12 = vcmp.eq.s32.totalorder %v4133_v42, %v1017_v20 }
 0x370   : > { %vm6440_vm6 = vmor %vm923_vm0, %vm1083_vm5 }
 0x372   : > { %v1020_v57 = vpop.permute.xlu1 %1019 }
 0x373   : > { %vm1085_vm3 = vcmp.eq.s32.totalorder %v3535_v2, %v1020_v57  ;;  %vm1086_vm1 = vcmp.eq.s32.totalorder %v4133_v42, %v1020_v57 }
 0x374   : > { %vm1149_vm7 = vmor %vm925_vm2, %vm1085_vm3 }
 0x375   : > { %vm1150_vm14 = vmor %vm926_vm10, %vm1086_vm1  ;;  %vm1534_vm10 = vcmp.eq.s32.totalorder %v4133_v42, %v5261_v34  ;;  %vm1308_vm1 = vcmp.eq.s32.totalorder %v4133_v42, %v1241_v48 }
 0x376   : > { %vm1148_vm3 = vmor %vm6435_vm4, %vm1084_vm12 }
 0x377   : > { %v1244_v25 = vpop.permute.xlu1 %1243  ;;  %vm1372_vm4 = vmor %vm1148_vm3, %vm1308_vm1 }
 0x378   : > { %vm1309_vm8 = vcmp.eq.s32.totalorder %v3535_v2, %v1244_v25  ;;  %vm1310_vm13 = vcmp.eq.s32.totalorder %v4133_v42, %v1244_v25 }
 0x379   : > { %vm1373_vm9 = vmor %vm1149_vm7, %vm1309_vm8 }
 0x37a   : > { %vm1374_vm5 = vmor %vm1150_vm14, %vm1310_vm13 }
 0x37b   : > { %vm6456_vm2 = vmor %vm1373_vm9, %vm1533_vm11 }
 0x37c   : > { %v3113_v49 = vpop.f32.mrb[0].mxu1  ;;  %v1465_v44 = vpop.permute.xlu1 %1464  ;;  %vm6462_vm0 = vmor %vm1374_vm5, %vm1534_vm10  ;;  %vm1979_vm5 = vcmp.eq.s32.totalorder %v3535_v2, %v5829_v50 }
 0x37d   : > { %v2566_v23 = vadd.f32 %v3113_v49, %v6449_v35  ;;  %v2557_v19 = vpop.f32.mrb[1].mxu1  ;;  %vm1531_vm7 = vcmp.eq.s32.totalorder %v3535_v2, %v1465_v44  ;;  %vm1371_vm14 = vmor %vm6440_vm6, %vm1307_vm15  ;;  %vm1532_vm8 = vcmp.eq.s32.totalorder %v4133_v42, %v1465_v44  ;;  %vm1980_vm15 = vcmp.eq.s32.totalorder %v4133_v42, %v5829_v50  ;;  %v1250_v49 = vpop.permute.xlu0 %1249 }
 0x37e   : > { %v2558_v34 = vadd.f32 %v6449_v35, %v2557_v19  ;;  %v3114_v58 = vpop.f32.mrb[2].mxu1  ;;  %vm1595_vm13 = vmor %vm1371_vm14, %vm1531_vm7 }
 0x37f   : > { %v2569_v7 = vadd.f32 %v3114_v58, %v6449_v35  ;;  %v2560_v53 = vpop.f32.mrb[3].mxu1  ;;  %v2686_v26 = vmax.f32 %v2566_v23, 0.0  ;;  %vm1596_vm9 = vmor %vm1372_vm4, %vm1532_vm8 }
 0x380   : > { %v2561_v8 = vadd.f32 %v6449_v35, %v2560_v53  ;;  %v2684_v5 = vmax.f32 %v2558_v34, 0.0 }
 0x381   : > { %v2687_v13 = vmax.f32 %v2569_v7, 0.0  ;;  %v1689_v59 = vpop.permute.xlu1 %1688 }
 0x382   : > { %v2685_v18 = vmax.f32 %v2561_v8, 0.0  ;;  %vm1755_vm11 = vcmp.eq.s32.totalorder %v3535_v2, %v1689_v59  ;;  %vm1756_vm12 = vcmp.eq.s32.totalorder %v4133_v42, %v1689_v59 }
 0x383   : > { %v6476_v37 = vpack.c.bf16 %v2687_v13, %v2686_v26  ;;  %vm1819_vm6 = vmor %vm1595_vm13, %vm1755_vm11 }
 0x384   : > { %v6480_v31 = vpack.c.bf16 %v2685_v18, %v2684_v5  ;;  %vm1820_vm10 = vmor %vm1596_vm9, %vm1756_vm12 }
 0x385   : > { %vm6486_vm3 = vmor %vm1819_vm6, %vm1979_vm5  ;;  %v1692_v36 = vpop.permute.xlu1 %1691  ;;  %vm481_vm6 = vcmp.eq.s32.totalorder %v3535_v2, %v7436_v15 }
 0x386   : > { %vm6490_vm1 = vmor %vm1820_vm10, %vm1980_vm15  ;;  %v2995_v51 = vpop.f32.mrb[36].mxu0  ;;  %vm1757_vm7 = vcmp.eq.s32.totalorder %v3535_v2, %v1692_v36  ;;  %vm1758_vm14 = vcmp.eq.s32.totalorder %v4133_v42, %v1692_v36  ;;  %v2107_v62 = vsel %vm6486_vm3, 1.0, %v3445_v27  ;;  %vm482_vm10 = vcmp.eq.s32.totalorder %v4133_v42, %v7436_v15 }
 0x387   : > { %v2996_v54 = vpop.f32.mrb[37].mxu0  ;;  %vm1821_vm8 = vmor %vm6456_vm2, %vm1757_vm7  ;;  %v2108_v9 = vsel %vm6490_vm1, 1.0, %v3445_v27  ;;  %vm641_vm2 = vcmp.eq.s32.totalorder %v3535_v2, %v6231_v46  ;;  %vm479_vm1 = vcmp.eq.s32.totalorder %v3535_v2, %v7439_v55 }
 0x388   : > { %v2997_v38 = vadd.f32 %v2996_v54, %v2995_v51  ;;  %v2998_v11 = vpop.f32.mrb[38].mxu0  ;;  %vm1822_vm4 = vmor %vm6462_vm0, %vm1758_vm14  ;;  %vm642_vm0 = vcmp.eq.s32.totalorder %v4133_v42, %v6231_v46 }
 0x389   : > { %v2999_v47 = vpop.f32.mrb[39].mxu0  ;;  %vm6521_vm15 = vmor %vm481_vm6, %vm641_vm2 }
 0x38a   : > { %v3000_v50 = vadd.f32 %v2999_v47, %v2998_v11  ;;  %v1916_v17 = vpop.permute.xlu1 %1915  ;;  %vm6529_vm7 = vmor %vm482_vm10, %vm642_vm0 }
 0x38b   : > { %vm1981_vm13 = vcmp.eq.s32.totalorder %v3535_v2, %v1916_v17  ;;  %vm1982_vm9 = vcmp.eq.s32.totalorder %v4133_v42, %v1916_v17 }
 0x38c   : > { %v2445_v29 = vpack.c.bf16 %v3000_v50, %v2997_v38  ;;  %vm2045_vm11 = vmor %vm1821_vm8, %vm1981_vm13  ;;  %vm480_vm13 = vcmp.eq.s32.totalorder %v4133_v42, %v7439_v55 }
 0x38d   : > { %vm2046_vm12 = vmor %vm1822_vm4, %vm1982_vm9  ;;  %v2109_v63 = vsel %vm2045_vm11, 1.0, %v3445_v27  ;;  %vm1087_vm9 = vcmp.eq.s32.totalorder %v3535_v2, %v6429_v60 }
 0x38e   : > { %v2110_v33 = vsel %vm2046_vm12, 1.0, %v3445_v27  ;;  %3128 = vmatmul.mubr.bf16.gmra.mrb[16].mxu1 %v2445_v29  ;;  %v2143_v45 = vpack.c.bf16 %v2109_v63, %v2107_v62 }
 0x38f   : > { %v575_v28 = vpop.permute.xlu1 %574  ;;  %v2144_v22 = vpack.c.bf16 %v2110_v33, %v2108_v9 }
 0x390   : > { %vm639_vm5 = vcmp.eq.s32.totalorder %v3535_v2, %v575_v28  ;;  %vm640_vm14 = vcmp.eq.s32.totalorder %v4133_v42, %v575_v28 }
 0x391   : > { %2419 = vmatprep.mubr.bf16.mxu0 %v2144_v22  ;;  %vm703_vm8 = vmor %vm479_vm1, %vm639_vm5 }
 0x392   : > { %2420 = vmatmul.mubr.bf16.gmra.mrb[56].mxu0 %v2143_v45  ;;  %vm704_vm12 = vmor %vm480_vm13, %vm640_vm14  ;;  %vm1088_vm14 = vcmp.eq.s32.totalorder %v4133_v42, %v6429_v60  ;;  %vm1313_vm13 = vcmp.eq.s32.totalorder %v3535_v2, %v1250_v49  ;;  %v1695_v60 = vpop.permute.xlu0 %1694 }
 0x394   : > { %v799_v21 = vpop.permute.xlu1 %798 }
 0x395   : > { %vm863_vm3 = vcmp.eq.s32.totalorder %v3535_v2, %v799_v21  ;;  %vm864_vm4 = vcmp.eq.s32.totalorder %v4133_v42, %v799_v21 }
 0x396   : > { %vm927_vm11 = vmor %vm703_vm8, %vm863_vm3  ;;  %v1922_v58 = vpop.permute.xlu0 %1921 }
 0x397   : > { %vm6543_vm0 = vmor %vm704_vm12, %vm864_vm4 }
 0x398   : > { %v802_v30 = vpop.permute.xlu1 %801  ;;  %vm6551_vm10 = vmor %vm927_vm11, %vm1087_vm9  ;;  %vm1314_vm9 = vcmp.eq.s32.totalorder %v4133_v42, %v1250_v49 }
 0x399   : > { %vm865_vm2 = vcmp.eq.s32.totalorder %v3535_v2, %v802_v30  ;;  %vm866_vm6 = vcmp.eq.s32.totalorder %v4133_v42, %v802_v30  ;;  %v7445_v0 = vsel %vm6551_vm10, 4294967295, %v7444_v0  ;;  %vm1152_vm11 = vmor %vm6543_vm0, %vm1088_vm14  ;;  %vm1759_vm14 = vcmp.eq.s32.totalorder %v3535_v2, %v1695_v60 }
 0x39a   : > { %vm929_vm3 = vmor %vm6521_vm15, %vm865_vm2 }
 0x39b   : > { %vm930_vm8 = vmor %vm6529_vm7, %vm866_vm6 }
 0x39d   : > { %v1026_v56 = vpop.permute.xlu1 %1025 }
 0x39e   : > { %vm1089_vm5 = vcmp.eq.s32.totalorder %v3535_v2, %v1026_v56  ;;  %vm1090_vm1 = vcmp.eq.s32.totalorder %v4133_v42, %v1026_v56 }
 0x39f   : > { %vm1153_vm4 = vmor %vm929_vm3, %vm1089_vm5  ;;  %vm7450_vm5 = vnez %v7445_v0 }
 0x3a0   : > { %vm1154_vm12 = vmor %vm930_vm8, %vm1090_vm1 }
 0x3a1   : > { %vm6567_vm2 = vmor %vm1153_vm4, %vm1313_vm13 }
 0x3a2   : > { %v1247_v48 = vpop.permute.xlu1 %1246  ;;  %vm6572_vm7 = vmor %vm1154_vm12, %vm1314_vm9 }
 0x3a3   : > { %vm1311_vm15 = vcmp.eq.s32.totalorder %v3535_v2, %v1247_v48  ;;  %vm1312_vm6 = vcmp.eq.s32.totalorder %v4133_v42, %v1247_v48 }
 0x3a4   : > { %vm1375_vm3 = vmor %vm7450_vm5, %vm1311_vm15  ;;  %vm1985_vm5 = vcmp.eq.s32.totalorder %v3535_v2, %v1922_v58 }
 0x3a5   : > { %vm1376_vm8 = vmor %vm1152_vm11, %vm1312_vm6 }
 0x3a7   : > { %v1471_v23 = vpop.permute.xlu1 %1470 }
 0x3a8   : > { %vm1535_vm10 = vcmp.eq.s32.totalorder %v3535_v2, %v1471_v23  ;;  %vm1536_vm0 = vcmp.eq.s32.totalorder %v4133_v42, %v1471_v23 }
 0x3a9   : > { %vm1599_vm1 = vmor %vm1375_vm3, %vm1535_vm10 }
 0x3aa   : > { %vm6582_vm13 = vmor %vm1376_vm8, %vm1536_vm0  ;;  %vm1986_vm0 = vcmp.eq.s32.totalorder %v4133_v42, %v1922_v58 }
 0x3ab   : > { %v1474_v61 = vpop.permute.xlu1 %1473  ;;  %vm6587_vm9 = vmor %vm1599_vm1, %vm1759_vm14  ;;  %vm1760_vm1 = vcmp.eq.s32.totalorder %v4133_v42, %v1695_v60 }
 0x3ac   : > { %vm1537_vm4 = vcmp.eq.s32.totalorder %v3535_v2, %v1474_v61  ;;  %vm1538_vm12 = vcmp.eq.s32.totalorder %v4133_v42, %v1474_v61  ;;  %vm1824_vm8 = vmor %vm6582_vm13, %vm1760_vm1 }
 0x3ad   : > { %vm1601_vm15 = vmor %vm6567_vm2, %vm1537_vm4 }
 0x3ae   : > { %vm1602_vm10 = vmor %vm6572_vm7, %vm1538_vm12 }
 0x3b0   : > { %v3117_v1 = vpop.f32.mrb[4].mxu1  ;;  %v1698_v53 = vpop.permute.xlu1 %1697 }
 0x3b1   : > { %v2582_v41 = vadd.f32 %v3117_v1, %v6449_v35  ;;  %v2573_v14 = vpop.f32.mrb[5].mxu1  ;;  %vm1761_vm11 = vcmp.eq.s32.totalorder %v3535_v2, %v1698_v53  ;;  %vm1762_vm6 = vcmp.eq.s32.totalorder %v4133_v42, %v1698_v53 }
 0x3b2   : > { %v2574_v16 = vadd.f32 %v6449_v35, %v2573_v14  ;;  %v3118_v12 = vpop.f32.mrb[6].mxu1  ;;  %vm1825_vm3 = vmor %vm1601_vm15, %vm1761_vm11 }
 0x3b3   : > { %v2585_v46 = vadd.f32 %v3118_v12, %v6449_v35  ;;  %v2576_v32 = vpop.f32.mrb[7].mxu1  ;;  %v2690_v4 = vmax.f32 %v2582_v41, 0.0  ;;  %vm1826_vm2 = vmor %vm1602_vm10, %vm1762_vm6 }
 0x3b4   : > { %v2577_v52 = vadd.f32 %v6449_v35, %v2576_v32  ;;  %v2688_v20 = vmax.f32 %v2574_v16, 0.0  ;;  %vm6602_vm7 = vmor %vm1825_vm3, %vm1985_vm5 }
 0x3b5   : > { %v2691_v43 = vmax.f32 %v2585_v46, 0.0  ;;  %vm6607_vm14 = vmor %vm1826_vm2, %vm1986_vm0  ;;  %v3001_v54 = vpop.f32.mrb[40].mxu0  ;;  %v1919_v38 = vpop.permute.xlu1 %1918  ;;  %v2113_v9 = vsel %vm6602_vm7, 1.0, %v3445_v27 }
 0x3b6   : > { %v2689_v57 = vmax.f32 %v2577_v52, 0.0  ;;  %vm1983_vm4 = vcmp.eq.s32.totalorder %v3535_v2, %v1919_v38  ;;  %vm1984_vm12 = vcmp.eq.s32.totalorder %v4133_v42, %v1919_v38  ;;  %v3002_v50 = vpop.f32.mrb[41].mxu0  ;;  %v2114_v33 = vsel %vm6607_vm14, 1.0, %v3445_v27 }
 0x3b7   : > { %v6541_v24 = vpack.c.bf16 %v2691_v43, %v2690_v4  ;;  %vm2047_vm15 = vmor %vm6587_vm9, %vm1983_vm4  ;;  %v3003_v62 = vadd.f32 %v3002_v50, %v3001_v54  ;;  %v3004_v63 = vpop.f32.mrb[42].mxu0 }
 0x3b8   : > { %v6548_v25 = vpack.c.bf16 %v2689_v57, %v2688_v20  ;;  %vm2048_vm13 = vmor %vm1824_vm8, %vm1984_vm12  ;;  %v2111_v2 = vsel %vm2047_vm15, 1.0, %v3445_v27  ;;  %v3005_v42 = vpop.f32.mrb[43].mxu0 }
 0x3b9   : > { %v2112_v22 = vsel %vm2048_vm13, 1.0, %v3445_v27  ;;  %v2145_v21 = vpack.c.bf16 %v2113_v9, %v2111_v2  ;;  %v3006_v30 = vadd.f32 %v3005_v42, %v3004_v63 }
 0x3ba   : > { %v2146_v1 = vpack.c.bf16 %v2114_v33, %v2112_v22 }
 0x3bb   : > { %v2446_v41 = vpack.c.bf16 %v3006_v30, %v3003_v62 }
 0x3bc   : > { %2427 = vmatprep.mubr.bf16.mxu0 %v2146_v1 }
 0x3bd   : > { %2428 = vmatmul.mubr.bf16.gmra.mrb[60].mxu0 %v2145_v21  ;;  %3131 = vmatprep.mubr.bf16.mxu1 %v2446_v41 }
 0x3c9   : > { %v3121_v8 = vpop.f32.mrb[8].mxu1 }
 0x3ca   : > { %v2598_v26 = vadd.f32 %v3121_v8, %v6449_v35  ;;  %v2589_v13 = vpop.f32.mrb[9].mxu1 }
 0x3cb   : > { %v2590_v5 = vadd.f32 %v6449_v35, %v2589_v13  ;;  %v3122_v18 = vpop.f32.mrb[10].mxu1 }
 0x3cc   : > { %v2601_v10 = vadd.f32 %v3122_v18, %v6449_v35  ;;  %v2592_v36 = vpop.f32.mrb[11].mxu1  ;;  %v2694_v11 = vmax.f32 %v2598_v26, 0.0 }
 0x3cd   : > { %v2593_v51 = vadd.f32 %v6449_v35, %v2592_v36  ;;  %v2692_v17 = vmax.f32 %v2590_v5, 0.0 }
 0x3ce   : > { %v2695_v47 = vmax.f32 %v2601_v10, 0.0 }
 0x3cf   : > { %v2693_v29 = vmax.f32 %v2593_v51, 0.0 }
 0x3d0   : > { %v6624_v45 = vpack.c.bf16 %v2695_v47, %v2694_v11 }
 0x3d1   : > { %v6627_v28 = vpack.c.bf16 %v2693_v29, %v2692_v17 }
 0x3e0   : > { %v3007_v14 = vpop.f32.mrb[44].mxu0 }
 0x3e1   : > { %v3008_v15 = vpop.f32.mrb[45].mxu0 }
 0x3e2   : > { %v3009_v16 = vadd.f32 %v3008_v15, %v3007_v14  ;;  %v3010_v12 = vpop.f32.mrb[46].mxu0 }
 0x3e3   : > { %v3011_v40 = vpop.f32.mrb[47].mxu0 }
 0x3e4   : > { %v3012_v46 = vadd.f32 %v3011_v40, %v3010_v12 }
 0x3e6   : > { %v2447_v32 = vpack.c.bf16 %v3012_v46, %v3009_v16 }
 0x3e8   : > { %3132 = vmatmul.mubr.bf16.gmra.mrb[20].mxu1 %v2447_v32 }
 0x40b   : > { %v3013_v56 = vpop.f32.mrb[48].mxu0 }
 0x40c   : > { %v3014_v27 = vpop.f32.mrb[49].mxu0 }
 0x40d   : > { %v3015_v4 = vadd.f32 %v3014_v27, %v3013_v56  ;;  %v3016_v20 = vpop.f32.mrb[50].mxu0 }
 0x40e   : > { %v3125_v55 = vpop.f32.mrb[12].mxu1  ;;  %v3017_v48 = vpop.f32.mrb[51].mxu0 }
 0x40f   : > { %v2614_v39 = vadd.f32 %v3125_v55, %v6449_v35  ;;  %v2605_v52 = vpop.f32.mrb[13].mxu1  ;;  %v3018_v0 = vadd.f32 %v3017_v48, %v3016_v20 }
 0x410   : > { %v2606_v43 = vadd.f32 %v6449_v35, %v2605_v52  ;;  %v3126_v57 = vpop.f32.mrb[14].mxu1 }
 0x411   : > { %v2617_v3 = vadd.f32 %v3126_v57, %v6449_v35  ;;  %v2608_v49 = vpop.f32.mrb[15].mxu1  ;;  %v2698_v19 = vmax.f32 %v2614_v39, 0.0  ;;  %v2448_v61 = vpack.c.bf16 %v3018_v0, %v3015_v4 }
 0x412   : > { %v2609_v23 = vadd.f32 %v6449_v35, %v2608_v49  ;;  %v2696_v44 = vmax.f32 %v2606_v43, 0.0  ;;  %v2716_v49 = vld [vmem:[%s6718_s4] sm:$0x1] }
 0x413   : > { %v2699_v60 = vmax.f32 %v2617_v3, 0.0  ;;  %3135 = vmatprep.mubr.bf16.mxu1 %v2448_v61 }
 0x414   : > { %v2697_v34 = vmax.f32 %v2609_v23, 0.0 }
 0x415   : > { %v6634_v58 = vpack.c.bf16 %v2699_v60, %v2698_v19 }
 0x416   : > { %v6636_v7 = vpack.c.bf16 %v2697_v34, %v2696_v44 }
 0x43a   : > { %v3019_v53 = vpop.f32.mrb[52].mxu0 }
 0x43b   : > { %v3020_v8 = vpop.f32.mrb[53].mxu0 }
 0x43c   : > { %v3021_v26 = vadd.f32 %v3020_v8, %v3019_v53  ;;  %v3022_v13 = vpop.f32.mrb[54].mxu0 }
 0x43d   : > { %v3023_v5 = vpop.f32.mrb[55].mxu0 }
 0x43e   : > { %v3024_v18 = vadd.f32 %v3023_v5, %v3022_v13 }
 0x440   : > { %v2449_v59 = vpack.c.bf16 %v3024_v18, %v3021_v26 }
 0x442   : > { %3136 = vmatmul.mubr.bf16.gmra.mrb[24].mxu1 %v2449_v59 }
 0x461   : > { %v3129_v10 = vpop.f32.mrb[16].mxu1 }
 0x462   : > { %v2630_v36 = vadd.f32 %v3129_v10, %v6449_v35  ;;  %v2621_v6 = vpop.f32.mrb[17].mxu1 }
 0x463   : > { %v2622_v51 = vadd.f32 %v6449_v35, %v2621_v6  ;;  %v3130_v54 = vpop.f32.mrb[18].mxu1 }
 0x464   : > { %v2633_v38 = vadd.f32 %v3130_v54, %v6449_v35  ;;  %v2624_v11 = vpop.f32.mrb[19].mxu1  ;;  %v2702_v17 = vmax.f32 %v2630_v36, 0.0 }
 0x465   : > { %v2625_v47 = vadd.f32 %v6449_v35, %v2624_v11  ;;  %v3025_v50 = vpop.f32.mrb[56].mxu0  ;;  %v2700_v63 = vmax.f32 %v2622_v51, 0.0 }
 0x466   : > { %v2703_v29 = vmax.f32 %v2633_v38, 0.0  ;;  %v3026_v62 = vpop.f32.mrb[57].mxu0 }
 0x467   : > { %v2701_v9 = vmax.f32 %v2625_v47, 0.0  ;;  %v3027_v33 = vadd.f32 %v3026_v62, %v3025_v50  ;;  %v3028_v2 = vpop.f32.mrb[58].mxu0 }
 0x468   : > { %v3147_v42 = vpack.c.bf16 %v2703_v29, %v2702_v17  ;;  %v3029_v22 = vpop.f32.mrb[59].mxu0 }
 0x469   : > { %v3143_v21 = vpack.c.bf16 %v2701_v9, %v2700_v63  ;;  %v3030_v30 = vadd.f32 %v3029_v22, %v3028_v2  ;;  %v2718_v63 = vstv %s2717_s20  ;;  %v7459_v9 = vlaneseq }
 0x46b   : > { %v2450_v1 = vpack.c.bf16 %v3030_v30, %v3027_v33  ;;  %3144 = vmatprep.subr.bf16.mxu1 %v3143_v21  ;;  %v2797_v33 = vshrl.u32 %v7459_v9, 7  ;;  %vm2810_vm9 = vcmp.lt.s32.totalorder %v7459_v9, 256 }
 0x46c   : > { %3146 = vmatpush3.bf16.xpose.msra.mxu1 %v6480_v31 }
 0x46d   : > { %3139 = vmatprep.mubr.bf16.mxu1 %v2450_v1  ;;  %3148 = vmatprep.subr.bf16.mxu1 %v3147_v42 }
 0x474   : > { %3150 = vmatpush3.bf16.xpose.msra.mxu1 %v6476_v37 }
 0x490   : > { %v3031_v41 = vpop.f32.mrb[60].mxu0 }
 0x491   : > { %v3032_v14 = vpop.f32.mrb[61].mxu0 }
 0x492   : > { %v3033_v15 = vadd.f32 %v3032_v14, %v3031_v41  ;;  %v3034_v16 = vpop.f32.mrb[62].mxu0 }
 0x493   : > { %v3035_v12 = vpop.f32.mrb[63].mxu0 }
 0x494   : > { %v3036_v40 = vadd.f32 %v3035_v12, %v3034_v16 }
 0x496   : > { %v2451_v46 = vpack.c.bf16 %v3036_v40, %v3033_v15 }
 0x498   : > { %3140 = vmatmul.mubr.bf16.gmra.mrb[28].mxu1 %v2451_v46 }
 0x499   : > { %3093 = vmatprep.mubr.f32.mxu1 %v2716_v49 }
 0x4bb   : > { %v3133_v32 = vpop.f32.mrb[20].mxu1 }
 0x4bc   : > { %v2646_v56 = vadd.f32 %v3133_v32, %v6449_v35  ;;  %v2637_v55 = vpop.f32.mrb[21].mxu1 }
 0x4bd   : > { %v2638_v39 = vadd.f32 %v6449_v35, %v2637_v55  ;;  %v3134_v27 = vpop.f32.mrb[22].mxu1 }
 0x4be   : > { %v2649_v31 = vadd.f32 %v3134_v27, %v6449_v35  ;;  %v2640_v52 = vpop.f32.mrb[23].mxu1  ;;  %v2706_v4 = vmax.f32 %v2646_v56, 0.0 }
 0x4bf   : > { %v2641_v37 = vadd.f32 %v6449_v35, %v2640_v52  ;;  %v2704_v20 = vmax.f32 %v2638_v39, 0.0 }
 0x4c0   : > { %v2707_v43 = vmax.f32 %v2649_v31, 0.0 }
 0x4c1   : > { %v2705_v57 = vmax.f32 %v2641_v37, 0.0 }
 0x4c2   : > { %v3155_v3 = vpack.c.bf16 %v2707_v43, %v2706_v4 }
 0x4c3   : > { %v3151_v48 = vpack.c.bf16 %v2705_v57, %v2704_v20 }
 0x4c5   : > { %3152 = vmatprep.subr.bf16.mxu1 %v3151_v48 }
 0x4c6   : > { %3154 = vmatpush3.bf16.xpose.msra.mxu1 %v6548_v25 }
 0x4c7   : > { %3156 = vmatprep.subr.bf16.mxu1 %v3155_v3 }
 0x4ce   : > { %3158 = vmatpush3.bf16.xpose.msra.mxu1 %v6541_v24 }
 0x515   : > { %v3137_v0 = vpop.f32.mrb[24].mxu1 }
 0x516   : > { %v2662_v23 = vadd.f32 %v3137_v0, %v6449_v35  ;;  %v2653_v19 = vpop.f32.mrb[25].mxu1 }
 0x517   : > { %v2654_v60 = vadd.f32 %v6449_v35, %v2653_v19  ;;  %v3138_v44 = vpop.f32.mrb[26].mxu1 }
 0x518   : > { %v2665_v61 = vadd.f32 %v3138_v44, %v6449_v35  ;;  %v2656_v34 = vpop.f32.mrb[27].mxu1  ;;  %v2710_v53 = vmax.f32 %v2662_v23, 0.0 }
 0x519   : > { %v2657_v25 = vadd.f32 %v6449_v35, %v2656_v34  ;;  %v2708_v24 = vmax.f32 %v2654_v60, 0.0 }
 0x51a   : > { %v2711_v8 = vmax.f32 %v2665_v61, 0.0 }
 0x51b   : > { %v2709_v26 = vmax.f32 %v2657_v25, 0.0 }
 0x51c   : > { %v3163_v13 = vpack.c.bf16 %v2711_v8, %v2710_v53 }
 0x51d   : > { %v3159_v5 = vpack.c.bf16 %v2709_v26, %v2708_v24 }
 0x51f   : > { %3160 = vmatprep.subr.bf16.mxu1 %v3159_v5 }
 0x520   : > { %3162 = vmatpush3.bf16.xpose.msra.mxu1 %v6627_v28 }
 0x521   : > { %3164 = vmatprep.subr.bf16.mxu1 %v3163_v13 }
 0x528   : > { %3166 = vmatpush3.bf16.xpose.msra.mxu1 %v6624_v45  ;;  %v3446_v45 = vmov 1966171168  }
 0x529   : > { %v2794_v62 = vunpack.c.l.s4 %v3446_v45 }
 0x56b   : > { %v3141_v18 = vpop.f32.mrb[28].mxu1 }
 0x56c   : > { %v2678_v59 = vadd.f32 %v3141_v18, %v6449_v35  ;;  %v2669_v10 = vpop.f32.mrb[29].mxu1 }
 0x56d   : > { %v2670_v36 = vadd.f32 %v6449_v35, %v2669_v10  ;;  %v3142_v6 = vpop.f32.mrb[30].mxu1 }
 0x56e   : > { %v2681_v51 = vadd.f32 %v3142_v6, %v6449_v35  ;;  %v2672_v54 = vpop.f32.mrb[31].mxu1  ;;  %v2714_v11 = vmax.f32 %v2678_v59, 0.0 }
 0x56f   : > { %v2673_v38 = vadd.f32 %v6449_v35, %v2672_v54  ;;  %v2712_v50 = vmax.f32 %v2670_v36, 0.0  ;;  %v2795_v35 = vunpack.c.0.s8 %v2794_v62 }
 0x570   : > { %v2715_v47 = vmax.f32 %v2681_v51, 0.0 }
 0x571   : > { %v2713_v28 = vmax.f32 %v2673_v38, 0.0 }
 0x572   : > { %v3171_v17 = vpack.c.bf16 %v2715_v47, %v2714_v11 }
 0x573   : > { %v3167_v29 = vpack.c.bf16 %v2713_v28, %v2712_v50 }
 0x575   : > { %3168 = vmatprep.subr.bf16.mxu1 %v3167_v29 }
 0x576   : > { %3170 = vmatpush3.bf16.xpose.msra.mxu1 %v6636_v7  ;;  %v2798_v7 = vsub.s32 %v2795_v35, %v2797_v33 }
 0x577   : > { %3172 = vmatprep.subr.bf16.mxu1 %v3171_v17 }
 0x57e   : > { %3174 = vmatpush3.bf16.xpose.msra.mxu1 %v6634_v58 }
 0x585   : > { %3094 = vmatmul.mubr.f32.vlgmr.msra.gmra.mrb[32].mxu1 %v2716_v49 }
 0x658   : > { %v2785_v2 = vpop.f32.mrb[32].mxu1 }
 0x659   : > { %v2786_v42 = vadd.f32 %v2785_v2, %v2718_v63  ;;  %v2787_v22 = vpop.f32.mrb[33].mxu1 }
 0x65a   : > { %v2788_v21 = vadd.f32 %v2787_v22, %v2718_v63 }
 0x65c   : > { %v2792_v30 = vcombine.low %v2786_v42, %v2788_v21 }
 0x65e   : > { %v2799_v58 = vrot.slane %v2792_v30, %v2798_v7 }
 0x660   : > { %v2806_v1 = vrot.slane %v2799_v58, %v2798_v7 }
 0x662   : > { %2812 = vst.msk [vmem:[%s246_s5] sm:$0x3] %vm2810_vm9, %v2806_v1 }
 0x663   : > { %3386 = shalt.err (!%p3383_p3)
}
 0x664   : > { %s3387_s10 = scalar_lea.hbm %s6672_s11, 32  ;;  %s3391_s19 = scalar_lea.hbm %s6720_s6, 64 }
 0x665   : > { %p3388_p4 = scmp.ne.s32.totalorder %s6672_s11, %s3387_s10  ;;  %p3392_p9 = scmp.lt.u32.totalorder %s6672_s11, %s6720_s6 }
 0x666   : > { %p3393_p10 = scmp.lt.u32.totalorder %s3391_s19, %s3387_s10  ;;  %p3395_p12 = scmp.lt.u32.totalorder %s3387_s10, %s6672_s11 }
 0x667   : > { %p3389_p7 = pnand %p3388_p4, %p3521_p5 }
 0x668   : > { %p3394_p11 = por %p3393_p10, %p3392_p9 }
 0x669   : > { %p3390_p8 = pneg %p3389_p7 }
 0x66a   : > { %p3396_p13 = por %p3395_p12, %p3394_p11 }
 0x66c   : > { %p3397_p0 = pnand %p3396_p13, %p3390_p8 }
 0x66e   : > { %3400 = shalt.err (!%p3397_p0)
}
 0x66f   : > { %3175 = dma.vmem_to_hbm [thread:$0]  (%p3521_p5), %s6674_s27, 32, %s6672_s11, %s2814_s12  }
 0x670 PF: > { %p3181_p1 = scmp.ge.s32.totalorder %s3435_s26, 2  ;;  %s2840_s22 = sand.u32 1, %s3423_s23  }
 0x671   : > { %s2841_s5 = scalar_lea.sflag [#allocation4], %s2840_s22 }
 0x672   : > { %p3178_p2 = pnand %p3181_p1, %p3525_p6 }
 0x674   : > { %3418 = dma.done.wait (!%p3178_p2), %s2841_s5, 32  }
 0x675   : > { %3420 = vsyncadd (!%p3178_p2), %s2841_s5, 4294967264  ;;  %p17_p3 = scmp.ge.s32.totalorder %s3509_s28, 4   ;;  %s7460_s23 = smov %s3427_s24 }
 0x676   : > { %s7461_s24 = smov %s3431_s25  ;;  %s7462_s25 = smov %s3519_s7 }
 0x677   : > { %s7463_s26 = smov %s3509_s28  ;;  %19 = sbr.rel (!%p17_p3) target bundleno = 5 (0x5), region = 79 }
 0x67e   :  { %2846 = vsyncpa [#allocation4], 1 }
 0x67f   :  { %2848 = vsyncpa [#allocation4 + $0x1], 1 }

</bundles_post_ra>
